<compile_context>
chip_gen: v7x
topology: tpu7x:2x2x1
jax: 0.10.0
libtpu: 0.0.40
codegen_flags: <defaults>
</compile_context>

<pallas_src>
import functools
import math

import jax
import jax.numpy as jnp
from jax.experimental import pallas as pl
from jax.experimental.pallas import tpu as pltpu


# ----------------------------------------------------------------------------
# Kernel: item-blocked multi-head self-attention + additive-attention pooling
# (used for both the news encoder and the user encoder)
# ----------------------------------------------------------------------------
def _selfattn_pool_kernel(x_ref, wqkv_ref, watt_ref, batt_ref, qatt_ref, o_ref,
                          *, num_heads, head_dim):
    IB, T, Din = x_ref.shape
    hd = num_heads * head_dim

    # Fused QKV projection: one (IB*T, Din) x (Din, 3*H*d) MXU matmul
    # (bf16 operands, f32 accumulation).
    x2 = x_ref[...].reshape(IB * T, Din)                                   # bf16
    qkv = jnp.dot(x2, wqkv_ref[...], preferred_element_type=jnp.float32)  # (IB*T, 3hd)
    qkv = qkv.astype(jnp.bfloat16)   # bf16 operands for the attention matmuls

    scale = 1.0 / math.sqrt(head_dim)
    head_ctx = []
    for h in range(num_heads):       # short, statically unrolled
        lo = h * head_dim
        qh = qkv[:, lo:lo + head_dim].reshape(IB, T, head_dim)
        kh = qkv[:, hd + lo:hd + lo + head_dim].reshape(IB, T, head_dim)
        vh = qkv[:, 2 * hd + lo:2 * hd + lo + head_dim].reshape(IB, T, head_dim)
        # scores[i, t, s] = <q[i, t], k[i, s]> / sqrt(d)  — batched over IB items
        s = jnp.einsum("itd,isd->its", qh, kh,
                       preferred_element_type=jnp.float32) * scale         # (IB, T, T)
        s = s - jnp.max(s, axis=-1, keepdims=True)
        p = jnp.exp(s)
        p = p * pl.reciprocal(jnp.sum(p, axis=-1, keepdims=True), approx=True)
        head_ctx.append(jnp.einsum("its,isd->itd", p.astype(jnp.bfloat16), vh,
                                   preferred_element_type=jnp.float32))    # (IB, T, d)
    ctx = jnp.concatenate(head_ctx, axis=-1)                               # (IB, T, hd) f32

    # Additive attention pooling: softmax_t( q_att . tanh(W ctx_t + b) )
    ctx2 = ctx.reshape(IB * T, hd)
    e = jnp.tanh(jnp.dot(ctx2.astype(jnp.bfloat16), watt_ref[...],
                         preferred_element_type=jnp.float32) + batt_ref[...])  # (IB*T, A)
    # q_att dot-product as VPU multiply + lane reduction (no degenerate N=1 matmul).
    logits = jnp.sum(e.reshape(IB, T, -1) * qatt_ref[...], axis=-1)        # (IB, T)
    logits = logits - jnp.max(logits, axis=-1, keepdims=True)
    a = jnp.exp(logits)
    a = a * pl.reciprocal(jnp.sum(a, axis=-1, keepdims=True), approx=True)  # (IB, T)
    pooled = jnp.sum(ctx * a[:, :, None], axis=1)                          # (IB, hd)

    o_ref[...] = pooled.astype(o_ref.dtype)


def _vmem_capacity_bytes(default=64 * 1024 * 1024):
    """Generation-aware VMEM capacity (falls back to the v7x 64 MiB floor)."""
    try:
        info = pltpu.get_tpu_info()
        return int(getattr(info, "vmem_capacity_bytes", default))
    except Exception:
        return default


def selfattn_pool(x, wqkv, watt, batt, qatt, *, num_heads, head_dim):
    """x: (NB, T, Din) -> (NB, H*d) bf16 news/user vectors.

    wqkv: (Din, 3*H*d) bf16 (fused [Wq | Wk | Wv]),
    watt: (H*d, A) bf16, batt: (1, A) f32, qatt: (1, A) f32 (row vector).
    """
    NB, T, Din = x.shape
    hd = num_heads * head_dim
    assert wqkv.shape == (Din, 3 * hd)
    A = watt.shape[1]

    # --- generation-aware tile budget (v5e/v6e: 128 MiB VMEM, v7x: 64 MiB) ----
    vmem_cap = _vmem_capacity_bytes()
    step_budget = max(8 << 20, min(vmem_cap // 3, 40 << 20))
    vmem_limit = max(32 << 20, min(vmem_cap * 3 // 4, 112 << 20))

    weight_bytes = 2 * (wqkv.size * 2 + watt.size * 2 + batt.size * 4 + qatt.size * 4)

    def _step_bytes(b):
        return (weight_bytes
                + 2 * b * T * Din * 2            # x block, double-buffered, bf16
                + b * T * 3 * hd * (4 + 2)       # fused qkv (f32 acc + bf16 copy)
                + num_heads * b * T * T * 4      # per-head scores/probs (conservative)
                + 2 * b * T * hd * 4             # head contexts + concatenated ctx
                + b * T * A * 4                  # additive-attention hidden
                + 2 * b * hd * 2)                # pooled output, double-buffered, bf16

    # Items per block: aim for a tall projection M-dim (~1024 rows), rounded to
    # sublane multiples, shrunk to fit the per-step VMEM budget.
    ib = -(-1024 // T)
    ib = -(-ib // 8) * 8
    ib = min(ib, -(-NB // 8) * 8)
    while ib > 8 and _step_bytes(ib) > step_budget:
        ib -= 8
    # Guarantee >= 2 grid steps when possible so the 'parallel' axis can be
    # sharded across v7x's two TensorCores (harmless on v5e/v6e).
    if NB > 8 and -(-NB // ib) < 2:
        ib = max(8, -(-((NB + 1) // 2) // 8) * 8)

    NB_pad = -(-NB // ib) * ib
    if NB_pad != NB:
        x = jnp.pad(x, ((0, NB_pad - NB), (0, 0), (0, 0)))

    # bf16 operands for the MXU; accumulation / elementwise math stays f32.
    xb = x if x.dtype == jnp.bfloat16 else x.astype(jnp.bfloat16)
    wqkv_b = wqkv if wqkv.dtype == jnp.bfloat16 else wqkv.astype(jnp.bfloat16)
    watt_b = watt if watt.dtype == jnp.bfloat16 else watt.astype(jnp.bfloat16)
    batt_f = batt.astype(jnp.float32)
    qatt_f = qatt.astype(jnp.float32)

    kernel = functools.partial(_selfattn_pool_kernel,
                               num_heads=num_heads, head_dim=head_dim)

    def _run(weight_pipeline_mode):
        wkw = ({} if weight_pipeline_mode is None
               else {"pipeline_mode": weight_pipeline_mode})
        return pl.pallas_call(
            kernel,
            out_shape=jax.ShapeDtypeStruct((NB_pad, hd), jnp.bfloat16),
            grid=(NB_pad // ib,),
            in_specs=[
                pl.BlockSpec((ib, T, Din), lambda i: (i, 0, 0)),
                # Weights stay resident (constant block index) -> single buffer.
                pl.BlockSpec((Din, 3 * hd), lambda i: (0, 0), **wkw),
                pl.BlockSpec((hd, A), lambda i: (0, 0), **wkw),
                pl.BlockSpec((1, A), lambda i: (0, 0), **wkw),
                pl.BlockSpec((1, A), lambda i: (0, 0), **wkw),
            ],
            out_specs=pl.BlockSpec((ib, hd), lambda i: (i, 0)),   # lane-dense output
            compiler_params=pltpu.CompilerParams(
                dimension_semantics=("parallel",),
                vmem_limit_bytes=vmem_limit),
        )(xb, wqkv_b, watt_b, batt_f, qatt_f)

    try:
        out = _run(pl.Buffered(1))
    except Exception:
        # Fallback if this JAX version rejects single-buffered pipeline_mode.
        out = _run(None)
    return out[:NB]


# ----------------------------------------------------------------------------
# Model: parameters + forward (glue in plain JAX, hot path in Pallas)
# ----------------------------------------------------------------------------
def init_params(key, *, vocab_size, embed_dim, num_heads, head_dim, att_dim):
    hd = num_heads * head_dim
    ks = jax.random.split(key, 13)
    n = lambda k, shp, s=0.1: jax.random.normal(k, shp, jnp.float32) * s
    news_wqkv = jnp.concatenate(
        [n(ks[1], (embed_dim, hd)), n(ks[2], (embed_dim, hd)), n(ks[3], (embed_dim, hd))],
        axis=1)
    user_wqkv = jnp.concatenate(
        [n(ks[7], (hd, hd)), n(ks[8], (hd, hd)), n(ks[9], (hd, hd))], axis=1)
    return {
        # bf16 embedding table: the XLA gather writes bf16 activations directly.
        "embedding": n(ks[0], (vocab_size, embed_dim)).astype(jnp.bfloat16),
        # news encoder (input dim = embed_dim), fused QKV weight in bf16
        "news_wqkv": news_wqkv.astype(jnp.bfloat16),
        "news_watt": n(ks[4], (hd, att_dim)).astype(jnp.bfloat16),
        "news_batt": n(ks[5], (1, att_dim)),
        "news_qatt": n(ks[6], (1, att_dim)),          # stored as a row vector
        # user encoder (input dim = hd, i.e. news-vector dim)
        "user_wqkv": user_wqkv.astype(jnp.bfloat16),
        "user_watt": n(ks[10], (hd, att_dim)).astype(jnp.bfloat16),
        "user_batt": n(ks[11], (1, att_dim)),
        "user_qatt": n(ks[12], (1, att_dim)),
        "num_heads": num_heads,
        "head_dim": head_dim,
    }


def news_encoder(params, tokens):
    """tokens: (NB, T) int32 -> (NB, H*d) bf16."""
    x = jnp.take(params["embedding"], tokens, axis=0)          # (NB, T, D) bf16 — glue gather
    return selfattn_pool(
        x, params["news_wqkv"], params["news_watt"],
        params["news_batt"], params["news_qatt"],
        num_heads=params["num_heads"], head_dim=params["head_dim"])


def nrms_forward(params, his_input_title, pred_input_title, pred_input_title_one=None):
    """Mirrors NRMSModel.forward."""
    batch_size, effective_batch_size, title_size = pred_input_title.shape
    _, hist_size, _ = his_input_title.shape
    hd = params["num_heads"] * params["head_dim"]

    # Merge every news-encoder invocation (history titles, candidate titles,
    # and the optional single title) into ONE batched pallas_call.
    token_groups = [his_input_title.reshape(batch_size * hist_size, title_size),
                    pred_input_title.reshape(batch_size * effective_batch_size, title_size)]
    if pred_input_title_one is not None:
        token_groups.append(pred_input_title_one.reshape(batch_size, title_size))
    all_tokens = jnp.concatenate(token_groups, axis=0)
    all_news = news_encoder(params, all_tokens)                 # (sum NB, hd) bf16

    n_his = batch_size * hist_size
    n_cand = batch_size * effective_batch_size
    his_reps = all_news[:n_his].reshape(batch_size, hist_size, hd)          # bf16
    news_present = all_news[n_his:n_his + n_cand].reshape(
        batch_size, effective_batch_size, hd)                               # bf16

    # user encoder: self-attention + pooling over the encoded history titles
    # (consumes the bf16 kernel output directly — no convert pass).
    user_representation = selfattn_pool(
        his_reps, params["user_wqkv"], params["user_watt"],
        params["user_batt"], params["user_qatt"],
        num_heads=params["num_heads"], head_dim=params["head_dim"])   # (B, hd) bf16

    # Scoring is ~B*N*E FLOPs — far below pallas_call dispatch cost, so it stays
    # in plain JAX (per perf review); XLA fuses it with the surrounding ops.
    preds = jnp.einsum("bne,be->bn", news_present, user_representation,
                       preferred_element_type=jnp.float32)

    pred_one = None
    if pred_input_title_one is not None:
        news_present_one = all_news[n_his + n_cand:]            # (B, hd) bf16
        pred_one = jax.nn.sigmoid(
            jnp.einsum("be,be->b", news_present_one, user_representation,
                       preferred_element_type=jnp.float32))[:, None]
    return preds, pred_one


if __name__ == "__main__":
    # small, module-consistent shapes
    B, HIST, NPR, T = 2, 4, 3, 8          # batch, history len, candidates, title len
    VOCAB, D = 64, 32                      # vocab, word-embedding dim
    HEADS, HDIM, ADIM = 2, 16, 16          # head_num, head_dim, attention_hidden_dim

    params = init_params(jax.random.PRNGKey(42), vocab_size=VOCAB, embed_dim=D,
                         num_heads=HEADS, head_dim=HDIM, att_dim=ADIM)

    key = jax.random.PRNGKey(0)
    k1, k2, k3 = jax.random.split(key, 3)
    his_input_title = jax.random.randint(k1, (B, HIST, T), 0, VOCAB, dtype=jnp.int32)
    pred_input_title = jax.random.randint(k2, (B, NPR, T), 0, VOCAB, dtype=jnp.int32)
    pred_input_title_one = jax.random.randint(k3, (B, 1, T), 0, VOCAB, dtype=jnp.int32)

    preds, pred_one = nrms_forward(params, his_input_title,
                                   pred_input_title, pred_input_title_one)
    jax.block_until_ready((preds, pred_one))

    assert preds.shape == (B, NPR), preds.shape
    assert pred_one.shape == (B, 1), pred_one.shape
    assert bool(jnp.all(jnp.isfinite(preds))) and bool(jnp.all(jnp.isfinite(pred_one)))
    assert bool(jnp.all((pred_one > 0.0) & (pred_one < 1.0)))
    print("KERNEL_OK")
</pallas_src>

<mosaic_0001>
module attributes {stable_mosaic.version = 11 : i64} {
  func.func @_selfattn_pool_kernel(%arg0: i32, %arg1: memref<8x8x32xbf16, #tpu.memory_space<vmem>>, %arg2: memref<32x96xbf16, #tpu.memory_space<vmem>>, %arg3: memref<32x16xbf16, #tpu.memory_space<vmem>>, %arg4: memref<1x16xf32, #tpu.memory_space<vmem>>, %arg5: memref<1x16xf32, #tpu.memory_space<vmem>>, %arg6: memref<8x32xbf16, #tpu.memory_space<vmem>>) attributes {dimension_semantics = [#tpu.dimension_semantics<parallel>], iteration_bounds = array<i64: 2>, scalar_prefetch = 0 : i64, scratch_operands = 0 : i64, tpu.core_type = #tpu.core_type<tc>, window_params = [{transform_indices = @transform_0, window_bounds = array<i64: 8, 8, 32>}, {pipeline_mode = #tpu.pipeline_mode<synchronous>, transform_indices = @transform_1, window_bounds = array<i64: 32, 96>}, {pipeline_mode = #tpu.pipeline_mode<synchronous>, transform_indices = @transform_2, window_bounds = array<i64: 32, 16>}, {pipeline_mode = #tpu.pipeline_mode<synchronous>, transform_indices = @transform_3, window_bounds = array<i64: 1, 16>}, {pipeline_mode = #tpu.pipeline_mode<synchronous>, transform_indices = @transform_4, window_bounds = array<i64: 1, 16>}, {transform_indices = @transform_5, window_bounds = array<i64: 8, 32>}]} {
    %c0 = arith.constant 0 : index
    %c0_0 = arith.constant 0 : index
    %c0_1 = arith.constant 0 : index
    %0 = vector.load %arg1[%c0, %c0_0, %c0_1] : memref<8x8x32xbf16, #tpu.memory_space<vmem>>, vector<8x8x32xbf16>
    %1 = vector.shape_cast %0 : vector<8x8x32xbf16> to vector<64x32xbf16>
    %c0_2 = arith.constant 0 : index
    %c0_3 = arith.constant 0 : index
    %2 = vector.load %arg2[%c0_2, %c0_3] : memref<32x96xbf16, #tpu.memory_space<vmem>>, vector<32x96xbf16>
    %cst = arith.constant dense<0.000000e+00> : vector<64x96xf32>
    %3 = tpu.matmul %1, %2, %cst {dimension_numbers = #tpu.dot_dimension_numbers<[1], [0], [0], [1], [0, 0, 1, 1], [], []>} : vector<64x32xbf16>, vector<32x96xbf16>, vector<64x96xf32> -> vector<64x96xf32>
    %4 = arith.truncf %3 : vector<64x96xf32> to vector<64x96xbf16>
    %5 = vector.extract_strided_slice %4 {offsets = [0, 0], sizes = [64, 16], strides = [1, 1]} : vector<64x96xbf16> to vector<64x16xbf16>
    %6 = vector.shape_cast %5 : vector<64x16xbf16> to vector<8x8x16xbf16>
    %7 = vector.extract_strided_slice %4 {offsets = [0, 32], sizes = [64, 16], strides = [1, 1]} : vector<64x96xbf16> to vector<64x16xbf16>
    %8 = vector.shape_cast %7 : vector<64x16xbf16> to vector<8x8x16xbf16>
    %9 = vector.extract_strided_slice %4 {offsets = [0, 64], sizes = [64, 16], strides = [1, 1]} : vector<64x96xbf16> to vector<64x16xbf16>
    %10 = vector.shape_cast %9 : vector<64x16xbf16> to vector<8x8x16xbf16>
    "tpu.trace_start"() <{level = 10 : i32, message = "itd,isd->its"}> : () -> ()
    %cst_4 = arith.constant dense<0.000000e+00> : vector<8x8x8xf32>
    %11 = tpu.matmul %6, %8, %cst_4 {dimension_numbers = #tpu.dot_dimension_numbers<[2], [2], [1], [1], [0, 0, 0, 1, 1, 1], [0], [0]>} : vector<8x8x16xbf16>, vector<8x8x16xbf16>, vector<8x8x8xf32> -> vector<8x8x8xf32>
    "tpu.trace_stop"() : () -> ()
    %cst_5 = arith.constant 2.500000e-01 : f32
    %12 = vector.broadcast %cst_5 : f32 to vector<8x8x8xf32>
    %13 = arith.mulf %11, %12 : vector<8x8x8xf32>
    %cst_6 = arith.constant dense<0xFF800000> : vector<8x8xf32>
    %14 = vector.multi_reduction <maximumf>, %13, %cst_6 [2] : vector<8x8x8xf32> to vector<8x8xf32>
    %15 = vector.shape_cast %14 : vector<8x8xf32> to vector<8x8x1xf32>
    %16 = vector.broadcast %15 : vector<8x8x1xf32> to vector<8x8x8xf32>
    %17 = arith.subf %13, %16 : vector<8x8x8xf32>
    %18 = math.exp %17 : vector<8x8x8xf32>
    %cst_7 = arith.constant dense<0.000000e+00> : vector<8x8xf32>
    %19 = vector.multi_reduction <add>, %18, %cst_7 [2] : vector<8x8x8xf32> to vector<8x8xf32>
    %20 = vector.shape_cast %19 : vector<8x8xf32> to vector<8x8x1xf32>
    %21 = tpu.reciprocal %20 {approx = true} : vector<8x8x1xf32> -> vector<8x8x1xf32>
    %22 = vector.broadcast %21 : vector<8x8x1xf32> to vector<8x8x8xf32>
    %23 = arith.mulf %18, %22 : vector<8x8x8xf32>
    %24 = arith.truncf %23 : vector<8x8x8xf32> to vector<8x8x8xbf16>
    "tpu.trace_start"() <{level = 10 : i32, message = "its,isd->itd"}> : () -> ()
    %cst_8 = arith.constant dense<0.000000e+00> : vector<8x8x16xf32>
    %25 = tpu.matmul %24, %10, %cst_8 {dimension_numbers = #tpu.dot_dimension_numbers<[2], [1], [1], [2], [0, 0, 0, 1, 1, 2], [0], [0]>} : vector<8x8x8xbf16>, vector<8x8x16xbf16>, vector<8x8x16xf32> -> vector<8x8x16xf32>
    "tpu.trace_stop"() : () -> ()
    %26 = vector.extract_strided_slice %4 {offsets = [0, 16], sizes = [64, 16], strides = [1, 1]} : vector<64x96xbf16> to vector<64x16xbf16>
    %27 = vector.shape_cast %26 : vector<64x16xbf16> to vector<8x8x16xbf16>
    %28 = vector.extract_strided_slice %4 {offsets = [0, 48], sizes = [64, 16], strides = [1, 1]} : vector<64x96xbf16> to vector<64x16xbf16>
    %29 = vector.shape_cast %28 : vector<64x16xbf16> to vector<8x8x16xbf16>
    %30 = vector.extract_strided_slice %4 {offsets = [0, 80], sizes = [64, 16], strides = [1, 1]} : vector<64x96xbf16> to vector<64x16xbf16>
    %31 = vector.shape_cast %30 : vector<64x16xbf16> to vector<8x8x16xbf16>
    "tpu.trace_start"() <{level = 10 : i32, message = "itd,isd->its"}> : () -> ()
    %cst_9 = arith.constant dense<0.000000e+00> : vector<8x8x8xf32>
    %32 = tpu.matmul %27, %29, %cst_9 {dimension_numbers = #tpu.dot_dimension_numbers<[2], [2], [1], [1], [0, 0, 0, 1, 1, 1], [0], [0]>} : vector<8x8x16xbf16>, vector<8x8x16xbf16>, vector<8x8x8xf32> -> vector<8x8x8xf32>
    "tpu.trace_stop"() : () -> ()
    %cst_10 = arith.constant 2.500000e-01 : f32
    %33 = vector.broadcast %cst_10 : f32 to vector<8x8x8xf32>
    %34 = arith.mulf %32, %33 : vector<8x8x8xf32>
    %cst_11 = arith.constant dense<0xFF800000> : vector<8x8xf32>
    %35 = vector.multi_reduction <maximumf>, %34, %cst_11 [2] : vector<8x8x8xf32> to vector<8x8xf32>
    %36 = vector.shape_cast %35 : vector<8x8xf32> to vector<8x8x1xf32>
    %37 = vector.broadcast %36 : vector<8x8x1xf32> to vector<8x8x8xf32>
    %38 = arith.subf %34, %37 : vector<8x8x8xf32>
    %39 = math.exp %38 : vector<8x8x8xf32>
    %cst_12 = arith.constant dense<0.000000e+00> : vector<8x8xf32>
    %40 = vector.multi_reduction <add>, %39, %cst_12 [2] : vector<8x8x8xf32> to vector<8x8xf32>
    %41 = vector.shape_cast %40 : vector<8x8xf32> to vector<8x8x1xf32>
    %42 = tpu.reciprocal %41 {approx = true} : vector<8x8x1xf32> -> vector<8x8x1xf32>
    %43 = vector.broadcast %42 : vector<8x8x1xf32> to vector<8x8x8xf32>
    %44 = arith.mulf %39, %43 : vector<8x8x8xf32>
    %45 = arith.truncf %44 : vector<8x8x8xf32> to vector<8x8x8xbf16>
    "tpu.trace_start"() <{level = 10 : i32, message = "its,isd->itd"}> : () -> ()
    %cst_13 = arith.constant dense<0.000000e+00> : vector<8x8x16xf32>
    %46 = tpu.matmul %45, %31, %cst_13 {dimension_numbers = #tpu.dot_dimension_numbers<[2], [1], [1], [2], [0, 0, 0, 1, 1, 2], [0], [0]>} : vector<8x8x8xbf16>, vector<8x8x16xbf16>, vector<8x8x16xf32> -> vector<8x8x16xf32>
    "tpu.trace_stop"() : () -> ()
    %47 = tpu.concatenate %25, %46 in 2 : vector<8x8x16xf32>, vector<8x8x16xf32> -> vector<8x8x32xf32>
    %48 = vector.shape_cast %47 : vector<8x8x32xf32> to vector<64x32xf32>
    %49 = arith.truncf %48 : vector<64x32xf32> to vector<64x32xbf16>
    %c0_14 = arith.constant 0 : index
    %c0_15 = arith.constant 0 : index
    %50 = vector.load %arg3[%c0_14, %c0_15] : memref<32x16xbf16, #tpu.memory_space<vmem>>, vector<32x16xbf16>
    %cst_16 = arith.constant dense<0.000000e+00> : vector<64x16xf32>
    %51 = tpu.matmul %49, %50, %cst_16 {dimension_numbers = #tpu.dot_dimension_numbers<[1], [0], [0], [1], [0, 0, 1, 1], [], []>} : vector<64x32xbf16>, vector<32x16xbf16>, vector<64x16xf32> -> vector<64x16xf32>
    %c0_17 = arith.constant 0 : index
    %c0_18 = arith.constant 0 : index
    %52 = vector.load %arg4[%c0_17, %c0_18] : memref<1x16xf32, #tpu.memory_space<vmem>>, vector<1x16xf32>
    %53 = vector.broadcast %52 : vector<1x16xf32> to vector<64x16xf32>
    %54 = arith.addf %51, %53 : vector<64x16xf32>
    %55 = math.tanh %54 : vector<64x16xf32>
    %56 = vector.shape_cast %55 : vector<64x16xf32> to vector<8x8x16xf32>
    %c0_19 = arith.constant 0 : index
    %c0_20 = arith.constant 0 : index
    %57 = vector.load %arg5[%c0_19, %c0_20] : memref<1x16xf32, #tpu.memory_space<vmem>>, vector<1x16xf32>
    %58 = vector.shape_cast %57 : vector<1x16xf32> to vector<1x1x16xf32>
    %59 = vector.broadcast %58 : vector<1x1x16xf32> to vector<8x8x16xf32>
    %60 = arith.mulf %56, %59 : vector<8x8x16xf32>
    %cst_21 = arith.constant dense<0.000000e+00> : vector<8x8xf32>
    %61 = vector.multi_reduction <add>, %60, %cst_21 [2] : vector<8x8x16xf32> to vector<8x8xf32>
    %cst_22 = arith.constant dense<0xFF800000> : vector<8xf32>
    %62 = vector.multi_reduction <maximumf>, %61, %cst_22 [1] : vector<8x8xf32> to vector<8xf32>
    %63 = vector.shape_cast %62 : vector<8xf32> to vector<8x1xf32>
    %64 = vector.broadcast %63 : vector<8x1xf32> to vector<8x8xf32>
    %65 = arith.subf %61, %64 : vector<8x8xf32>
    %66 = math.exp %65 : vector<8x8xf32>
    %cst_23 = arith.constant dense<0.000000e+00> : vector<8xf32>
    %67 = vector.multi_reduction <add>, %66, %cst_23 [1] : vector<8x8xf32> to vector<8xf32>
    %68 = vector.shape_cast %67 : vector<8xf32> to vector<8x1xf32>
    %69 = tpu.reciprocal %68 {approx = true} : vector<8x1xf32> -> vector<8x1xf32>
    %70 = vector.broadcast %69 : vector<8x1xf32> to vector<8x8xf32>
    %71 = arith.mulf %66, %70 : vector<8x8xf32>
    %72 = vector.shape_cast %71 : vector<8x8xf32> to vector<8x8x1xf32>
    %73 = vector.broadcast %72 : vector<8x8x1xf32> to vector<8x8x32xf32>
    %74 = arith.mulf %47, %73 : vector<8x8x32xf32>
    %cst_24 = arith.constant dense<0.000000e+00> : vector<8x32xf32>
    %75 = vector.multi_reduction <add>, %74, %cst_24 [1] : vector<8x8x32xf32> to vector<8x32xf32>
    %76 = arith.truncf %75 : vector<8x32xf32> to vector<8x32xbf16>
    %c0_25 = arith.constant 0 : index
    %c0_26 = arith.constant 0 : index
    %77 = vector.load %arg6[%c0_25, %c0_26] : memref<8x32xbf16, #tpu.memory_space<vmem>>, vector<8x32xbf16>
    tpu.vector_store %arg6[%c0_25, %c0_26], %76 {strides = array<i32>} : memref<8x32xbf16, #tpu.memory_space<vmem>>, vector<8x32xbf16>,
    return
  }
  func.func @transform_0(%arg0: i32) -> (i32, i32, i32) {
    %c0_i32 = arith.constant 0 : i32
    %c0_i32_0 = arith.constant 0 : i32
    %c0_i32_1 = arith.constant 0 : i32
    return %arg0, %c0_i32, %c0_i32_0 : i32, i32, i32
  }
  func.func @transform_1(%arg0: i32) -> (i32, i32) {
    %c0_i32 = arith.constant 0 : i32
    %c0_i32_0 = arith.constant 0 : i32
    %c0_i32_1 = arith.constant 0 : i32
    return %c0_i32, %c0_i32_0 : i32, i32
  }
  func.func @transform_2(%arg0: i32) -> (i32, i32) {
    %c0_i32 = arith.constant 0 : i32
    %c0_i32_0 = arith.constant 0 : i32
    %c0_i32_1 = arith.constant 0 : i32
    return %c0_i32, %c0_i32_0 : i32, i32
  }
  func.func @transform_3(%arg0: i32) -> (i32, i32) {
    %c0_i32 = arith.constant 0 : i32
    %c0_i32_0 = arith.constant 0 : i32
    %c0_i32_1 = arith.constant 0 : i32
    return %c0_i32, %c0_i32_0 : i32, i32
  }
  func.func @transform_4(%arg0: i32) -> (i32, i32) {
    %c0_i32 = arith.constant 0 : i32
    %c0_i32_0 = arith.constant 0 : i32
    %c0_i32_1 = arith.constant 0 : i32
    return %c0_i32, %c0_i32_0 : i32, i32
  }
  func.func @transform_5(%arg0: i32) -> (i32, i32) {
    %c0_i32 = arith.constant 0 : i32
    %c0_i32_0 = arith.constant 0 : i32
    return %arg0, %c0_i32 : i32, i32
  }
}

module attributes {stable_mosaic.version = 11 : i64} {
  func.func @_selfattn_pool_kernel(%arg0: i32, %arg1: memref<8x8x32xbf16, #tpu.memory_space<vmem>>, %arg2: memref<32x96xbf16, #tpu.memory_space<vmem>>, %arg3: memref<32x16xbf16, #tpu.memory_space<vmem>>, %arg4: memref<1x16xf32, #tpu.memory_space<vmem>>, %arg5: memref<1x16xf32, #tpu.memory_space<vmem>>, %arg6: memref<8x32xbf16, #tpu.memory_space<vmem>>) attributes {dimension_semantics = [#tpu.dimension_semantics<parallel>], iteration_bounds = array<i64: 2>, scalar_prefetch = 0 : i64, scratch_operands = 0 : i64, tpu.core_type = #tpu.core_type<tc>, window_params = [{transform_indices = @transform_0, window_bounds = array<i64: 8, 8, 32>}, {pipeline_mode = #tpu.pipeline_mode<synchronous>, transform_indices = @transform_1, window_bounds = array<i64: 32, 96>}, {pipeline_mode = #tpu.pipeline_mode<synchronous>, transform_indices = @transform_2, window_bounds = array<i64: 32, 16>}, {pipeline_mode = #tpu.pipeline_mode<synchronous>, transform_indices = @transform_3, window_bounds = array<i64: 1, 16>}, {pipeline_mode = #tpu.pipeline_mode<synchronous>, transform_indices = @transform_4, window_bounds = array<i64: 1, 16>}, {transform_indices = @transform_5, window_bounds = array<i64: 8, 32>}]} {
    %c0 = arith.constant 0 : index
    %c0_0 = arith.constant 0 : index
    %c0_1 = arith.constant 0 : index
    %0 = vector.load %arg1[%c0, %c0_0, %c0_1] : memref<8x8x32xbf16, #tpu.memory_space<vmem>>, vector<8x8x32xbf16>
    %1 = vector.shape_cast %0 : vector<8x8x32xbf16> to vector<64x32xbf16>
    %c0_2 = arith.constant 0 : index
    %c0_3 = arith.constant 0 : index
    %2 = vector.load %arg2[%c0_2, %c0_3] : memref<32x96xbf16, #tpu.memory_space<vmem>>, vector<32x96xbf16>
    %cst = arith.constant dense<0.000000e+00> : vector<64x96xf32>
    %3 = tpu.matmul %1, %2, %cst {dimension_numbers = #tpu.dot_dimension_numbers<[1], [0], [0], [1], [0, 0, 1, 1], [], []>} : vector<64x32xbf16>, vector<32x96xbf16>, vector<64x96xf32> -> vector<64x96xf32>
    %4 = arith.truncf %3 : vector<64x96xf32> to vector<64x96xbf16>
    %5 = vector.extract_strided_slice %4 {offsets = [0, 0], sizes = [64, 16], strides = [1, 1]} : vector<64x96xbf16> to vector<64x16xbf16>
    %6 = vector.shape_cast %5 : vector<64x16xbf16> to vector<8x8x16xbf16>
    %7 = vector.extract_strided_slice %4 {offsets = [0, 32], sizes = [64, 16], strides = [1, 1]} : vector<64x96xbf16> to vector<64x16xbf16>
    %8 = vector.shape_cast %7 : vector<64x16xbf16> to vector<8x8x16xbf16>
    %9 = vector.extract_strided_slice %4 {offsets = [0, 64], sizes = [64, 16], strides = [1, 1]} : vector<64x96xbf16> to vector<64x16xbf16>
    %10 = vector.shape_cast %9 : vector<64x16xbf16> to vector<8x8x16xbf16>
    "tpu.trace_start"() <{level = 10 : i32, message = "itd,isd->its"}> : () -> ()
    %cst_4 = arith.constant dense<0.000000e+00> : vector<8x8x8xf32>
    %11 = tpu.matmul %6, %8, %cst_4 {dimension_numbers = #tpu.dot_dimension_numbers<[2], [2], [1], [1], [0, 0, 0, 1, 1, 1], [0], [0]>} : vector<8x8x16xbf16>, vector<8x8x16xbf16>, vector<8x8x8xf32> -> vector<8x8x8xf32>
    "tpu.trace_stop"() : () -> ()
    %cst_5 = arith.constant 2.500000e-01 : f32
    %12 = vector.broadcast %cst_5 : f32 to vector<8x8x8xf32>
    %13 = arith.mulf %11, %12 : vector<8x8x8xf32>
    %cst_6 = arith.constant dense<0xFF800000> : vector<8x8xf32>
    %14 = vector.multi_reduction <maximumf>, %13, %cst_6 [2] : vector<8x8x8xf32> to vector<8x8xf32>
    %15 = vector.shape_cast %14 : vector<8x8xf32> to vector<8x8x1xf32>
    %16 = vector.broadcast %15 : vector<8x8x1xf32> to vector<8x8x8xf32>
    %17 = arith.subf %13, %16 : vector<8x8x8xf32>
    %18 = math.exp %17 : vector<8x8x8xf32>
    %cst_7 = arith.constant dense<0.000000e+00> : vector<8x8xf32>
    %19 = vector.multi_reduction <add>, %18, %cst_7 [2] : vector<8x8x8xf32> to vector<8x8xf32>
    %20 = vector.shape_cast %19 : vector<8x8xf32> to vector<8x8x1xf32>
    %21 = tpu.reciprocal %20 {approx = true} : vector<8x8x1xf32> -> vector<8x8x1xf32>
    %22 = vector.broadcast %21 : vector<8x8x1xf32> to vector<8x8x8xf32>
    %23 = arith.mulf %18, %22 : vector<8x8x8xf32>
    %24 = arith.truncf %23 : vector<8x8x8xf32> to vector<8x8x8xbf16>
    "tpu.trace_start"() <{level = 10 : i32, message = "its,isd->itd"}> : () -> ()
    %cst_8 = arith.constant dense<0.000000e+00> : vector<8x8x16xf32>
    %25 = tpu.matmul %24, %10, %cst_8 {dimension_numbers = #tpu.dot_dimension_numbers<[2], [1], [1], [2], [0, 0, 0, 1, 1, 2], [0], [0]>} : vector<8x8x8xbf16>, vector<8x8x16xbf16>, vector<8x8x16xf32> -> vector<8x8x16xf32>
    "tpu.trace_stop"() : () -> ()
    %26 = vector.extract_strided_slice %4 {offsets = [0, 16], sizes = [64, 16], strides = [1, 1]} : vector<64x96xbf16> to vector<64x16xbf16>
    %27 = vector.shape_cast %26 : vector<64x16xbf16> to vector<8x8x16xbf16>
    %28 = vector.extract_strided_slice %4 {offsets = [0, 48], sizes = [64, 16], strides = [1, 1]} : vector<64x96xbf16> to vector<64x16xbf16>
    %29 = vector.shape_cast %28 : vector<64x16xbf16> to vector<8x8x16xbf16>
    %30 = vector.extract_strided_slice %4 {offsets = [0, 80], sizes = [64, 16], strides = [1, 1]} : vector<64x96xbf16> to vector<64x16xbf16>
    %31 = vector.shape_cast %30 : vector<64x16xbf16> to vector<8x8x16xbf16>
    "tpu.trace_start"() <{level = 10 : i32, message = "itd,isd->its"}> : () -> ()
    %cst_9 = arith.constant dense<0.000000e+00> : vector<8x8x8xf32>
    %32 = tpu.matmul %27, %29, %cst_9 {dimension_numbers = #tpu.dot_dimension_numbers<[2], [2], [1], [1], [0, 0, 0, 1, 1, 1], [0], [0]>} : vector<8x8x16xbf16>, vector<8x8x16xbf16>, vector<8x8x8xf32> -> vector<8x8x8xf32>
    "tpu.trace_stop"() : () -> ()
    %cst_10 = arith.constant 2.500000e-01 : f32
    %33 = vector.broadcast %cst_10 : f32 to vector<8x8x8xf32>
    %34 = arith.mulf %32, %33 : vector<8x8x8xf32>
    %cst_11 = arith.constant dense<0xFF800000> : vector<8x8xf32>
    %35 = vector.multi_reduction <maximumf>, %34, %cst_11 [2] : vector<8x8x8xf32> to vector<8x8xf32>
    %36 = vector.shape_cast %35 : vector<8x8xf32> to vector<8x8x1xf32>
    %37 = vector.broadcast %36 : vector<8x8x1xf32> to vector<8x8x8xf32>
    %38 = arith.subf %34, %37 : vector<8x8x8xf32>
    %39 = math.exp %38 : vector<8x8x8xf32>
    %cst_12 = arith.constant dense<0.000000e+00> : vector<8x8xf32>
    %40 = vector.multi_reduction <add>, %39, %cst_12 [2] : vector<8x8x8xf32> to vector<8x8xf32>
    %41 = vector.shape_cast %40 : vector<8x8xf32> to vector<8x8x1xf32>
    %42 = tpu.reciprocal %41 {approx = true} : vector<8x8x1xf32> -> vector<8x8x1xf32>
    %43 = vector.broadcast %42 : vector<8x8x1xf32> to vector<8x8x8xf32>
    %44 = arith.mulf %39, %43 : vector<8x8x8xf32>
    %45 = arith.truncf %44 : vector<8x8x8xf32> to vector<8x8x8xbf16>
    "tpu.trace_start"() <{level = 10 : i32, message = "its,isd->itd"}> : () -> ()
    %cst_13 = arith.constant dense<0.000000e+00> : vector<8x8x16xf32>
    %46 = tpu.matmul %45, %31, %cst_13 {dimension_numbers = #tpu.dot_dimension_numbers<[2], [1], [1], [2], [0, 0, 0, 1, 1, 2], [0], [0]>} : vector<8x8x8xbf16>, vector<8x8x16xbf16>, vector<8x8x16xf32> -> vector<8x8x16xf32>
    "tpu.trace_stop"() : () -> ()
    %47 = tpu.concatenate %25, %46 in 2 : vector<8x8x16xf32>, vector<8x8x16xf32> -> vector<8x8x32xf32>
    %48 = vector.shape_cast %47 : vector<8x8x32xf32> to vector<64x32xf32>
    %49 = arith.truncf %48 : vector<64x32xf32> to vector<64x32xbf16>
    %c0_14 = arith.constant 0 : index
    %c0_15 = arith.constant 0 : index
    %50 = vector.load %arg3[%c0_14, %c0_15] : memref<32x16xbf16, #tpu.memory_space<vmem>>, vector<32x16xbf16>
    %cst_16 = arith.constant dense<0.000000e+00> : vector<64x16xf32>
    %51 = tpu.matmul %49, %50, %cst_16 {dimension_numbers = #tpu.dot_dimension_numbers<[1], [0], [0], [1], [0, 0, 1, 1], [], []>} : vector<64x32xbf16>, vector<32x16xbf16>, vector<64x16xf32> -> vector<64x16xf32>
    %c0_17 = arith.constant 0 : index
    %c0_18 = arith.constant 0 : index
    %52 = vector.load %arg4[%c0_17, %c0_18] : memref<1x16xf32, #tpu.memory_space<vmem>>, vector<1x16xf32>
    %53 = vector.broadcast %52 : vector<1x16xf32> to vector<64x16xf32>
    %54 = arith.addf %51, %53 : vector<64x16xf32>
    %55 = math.tanh %54 : vector<64x16xf32>
    %56 = vector.shape_cast %55 : vector<64x16xf32> to vector<8x8x16xf32>
    %c0_19 = arith.constant 0 : index
    %c0_20 = arith.constant 0 : index
    %57 = vector.load %arg5[%c0_19, %c0_20] : memref<1x16xf32, #tpu.memory_space<vmem>>, vector<1x16xf32>
    %58 = vector.shape_cast %57 : vector<1x16xf32> to vector<1x1x16xf32>
    %59 = vector.broadcast %58 : vector<1x1x16xf32> to vector<8x8x16xf32>
    %60 = arith.mulf %56, %59 : vector<8x8x16xf32>
    %cst_21 = arith.constant dense<0.000000e+00> : vector<8x8xf32>
    %61 = vector.multi_reduction <add>, %60, %cst_21 [2] : vector<8x8x16xf32> to vector<8x8xf32>
    %cst_22 = arith.constant dense<0xFF800000> : vector<8xf32>
    %62 = vector.multi_reduction <maximumf>, %61, %cst_22 [1] : vector<8x8xf32> to vector<8xf32>
    %63 = vector.shape_cast %62 : vector<8xf32> to vector<8x1xf32>
    %64 = vector.broadcast %63 : vector<8x1xf32> to vector<8x8xf32>
    %65 = arith.subf %61, %64 : vector<8x8xf32>
    %66 = math.exp %65 : vector<8x8xf32>
    %cst_23 = arith.constant dense<0.000000e+00> : vector<8xf32>
    %67 = vector.multi_reduction <add>, %66, %cst_23 [1] : vector<8x8xf32> to vector<8xf32>
    %68 = vector.shape_cast %67 : vector<8xf32> to vector<8x1xf32>
    %69 = tpu.reciprocal %68 {approx = true} : vector<8x1xf32> -> vector<8x1xf32>
    %70 = vector.broadcast %69 : vector<8x1xf32> to vector<8x8xf32>
    %71 = arith.mulf %66, %70 : vector<8x8xf32>
    %72 = vector.shape_cast %71 : vector<8x8xf32> to vector<8x8x1xf32>
    %73 = vector.broadcast %72 : vector<8x8x1xf32> to vector<8x8x32xf32>
    %74 = arith.mulf %47, %73 : vector<8x8x32xf32>
    %cst_24 = arith.constant dense<0.000000e+00> : vector<8x32xf32>
    %75 = vector.multi_reduction <add>, %74, %cst_24 [1] : vector<8x8x32xf32> to vector<8x32xf32>
    %76 = arith.truncf %75 : vector<8x32xf32> to vector<8x32xbf16>
    %c0_25 = arith.constant 0 : index
    %c0_26 = arith.constant 0 : index
    %77 = vector.load %arg6[%c0_25, %c0_26] : memref<8x32xbf16, #tpu.memory_space<vmem>>, vector<8x32xbf16>
    tpu.vector_store %arg6[%c0_25, %c0_26], %76 {strides = array<i32>} : memref<8x32xbf16, #tpu.memory_space<vmem>>, vector<8x32xbf16>,
    return
  }
  func.func @transform_0(%arg0: i32) -> (i32, i32, i32) {
    %c0_i32 = arith.constant 0 : i32
    %c0_i32_0 = arith.constant 0 : i32
    %c0_i32_1 = arith.constant 0 : i32
    return %arg0, %c0_i32, %c0_i32_0 : i32, i32, i32
  }
  func.func @transform_1(%arg0: i32) -> (i32, i32) {
    %c0_i32 = arith.constant 0 : i32
    %c0_i32_0 = arith.constant 0 : i32
    %c0_i32_1 = arith.constant 0 : i32
    return %c0_i32, %c0_i32_0 : i32, i32
  }
  func.func @transform_2(%arg0: i32) -> (i32, i32) {
    %c0_i32 = arith.constant 0 : i32
    %c0_i32_0 = arith.constant 0 : i32
    %c0_i32_1 = arith.constant 0 : i32
    return %c0_i32, %c0_i32_0 : i32, i32
  }
  func.func @transform_3(%arg0: i32) -> (i32, i32) {
    %c0_i32 = arith.constant 0 : i32
    %c0_i32_0 = arith.constant 0 : i32
    %c0_i32_1 = arith.constant 0 : i32
    return %c0_i32, %c0_i32_0 : i32, i32
  }
  func.func @transform_4(%arg0: i32) -> (i32, i32) {
    %c0_i32 = arith.constant 0 : i32
    %c0_i32_0 = arith.constant 0 : i32
    %c0_i32_1 = arith.constant 0 : i32
    return %c0_i32, %c0_i32_0 : i32, i32
  }
  func.func @transform_5(%arg0: i32) -> (i32, i32) {
    %c0_i32 = arith.constant 0 : i32
    %c0_i32_0 = arith.constant 0 : i32
    return %arg0, %c0_i32 : i32, i32
  }
}

</mosaic_0001>

<bundles_post_ra>
// kernel: tpu_custom_call.1
= control target key start
LH: loop header
LB: loop body
LE: loop exit
PB: predicated region body
PF: predicated region fallthrough
CT: control target
= control target key end

     0   :  { %10 = vsyncpa [#allocation3], 0  ;;  %s4263_s0 = inlined_call_operand.hbm [shape: bf16[16,8,32], index: 0, kind: input, shape index: {}]   ;;  %s4264_s1 = inlined_call_operand.vmem [shape: bf16[32,96], index: 1, kind: input, shape index: {}]   ;;  %s4265_s2 = inlined_call_operand.vmem [shape: bf16[32,16], index: 2, kind: input, shape index: {}]   ;;  %s4266_s3 = inlined_call_operand.vmem [shape: f32[1,16], index: 3, kind: input, shape index: {}]   ;;  %s4267_s4 = inlined_call_operand.vmem [shape: f32[1,16], index: 4, kind: input, shape index: {}]   ;;  %s4268_s5 = inlined_call_operand.hbm [shape: bf16[16,32], index: 5, kind: output, shape index: {}]  }
   0x1   :  { %12 = vsyncpa [#allocation3 + $0x1], 0 }
   0x2   :  { %13 = vsyncpa [#allocation4], 0 }
   0x3   :  { %15 = vsyncpa [#allocation4 + $0x1], 0  ;;  %s3532_s18 = smov 0   ;;  %s3534_s19 = smov 0  }
   0x4   :  { %s3536_s20 = smov 0   ;;  %s3538_s21 = smov 0  }
   0x5 LB: > { %s3553_s22 = sadd.s32 4294967295, %s3487_s21   ;;  %s2834_s23 = sadd.s32 4294967294, %s3487_s21   ;;  %s3487_s21 = sphi %s3538_s21, %s4281_s21   ;;  %s3483_s20 = sphi %s3536_s20, %s4280_s20   ;;  %s3479_s19 = sphi %s3534_s19, %s4279_s19   ;;  %s3475_s18 = sphi %s3532_s18, %s4278_s18  }
   0x6   : > { %s3557_s24 = sadd.s32 1, %s3487_s21   ;;  %s28_s25 = sadd.s32 1, %s3483_s20 }
   0x7   : > { %s25_s26 = ssub.s32 %s3487_s21, %s3557_s24  ;;  %p35_p0 = scmp.ne.s32.totalorder %s3483_s20, %s3479_s19 }
   0x8   : > { %p26_p1 = scmp.eq.s32.totalorder %s25_s26, 0  ;;  %p36_p2 = scmp.eq.s32.totalorder %s3487_s21, 0 }
   0x9   : > { %p41_p3 = scmp.ne.s32.totalorder %s3479_s19, %s3475_s18  ;;  %p42_p4 = scmp.eq.s32.totalorder %s3553_s22, 0 }
   0xa   : > { %s3569_s27 = scalar_select %p26_p1, %s3483_s20, %s28_s25  }
   0xb   : > { %p3571_p5 = por %p36_p2, %p35_p0  ;;  %p3575_p6 = por %p42_p4, %p41_p3 }
   0xc   : > { %p149_p7 = scmp.eq.s32.totalorder %s3553_s22, 1  ;;  %p155_p8 = scmp.eq.s32.totalorder %s2834_s23, 1 }
   0xd   : > { %p3238_p10 = scmp.lt.s32.totalorder %s3487_s21, 2  ;;  %s187_s7 = sand.u32 1, %s3483_s20  }
   0xe   : > { %p3582_p11 = por %p149_p7, %p35_p0  ;;  %p3586_p12 = por %p155_p8, %p41_p3 }
   0xf   : > { %s2913_s8 = sshll.u32 %s3487_s21, 9  ;;  %s2837_s9 = sshll.u32 %s187_s7, 5 }
  0x10   : > { %s4272_s30 = scalar_select %p3582_p11, 1, 0 }
  0x11   : > { %s4273_s6 = scalar_select %p3586_p12, 1, 0 }
  0x12   : > { %s3595_s12 = scalar_lea.hbm %s4263_s0, %s2913_s8  ;;  %s191_s13 = scalar_lea.vmem [#allocation2], %s2837_s9 }
  0x13   : > { %s198_s14 = sshll.u32 %s191_s13, 4  ;;  %p3599_p13 = pnand %p3238_p10, %p3571_p5  ;;  %s3603_s14 = int_to_ptr.vmem [resolvable:$true] %s198_s14 }
  0x14   : > { %s3605_s16 = scalar_lea.sflag [#allocation3], %s187_s7  ;;  %s3391_s17 = scalar_lea.hbm %s3595_s12, 512 }
  0x15   : > { %p3392_p0 = scmp.ne.s32.totalorder %s3595_s12, %s3391_s17  ;;  %p3393_p1 = pneg %p3599_p13 }
  0x16   : > { %s3396_s26 = scalar_lea.hbm %s4263_s0, 1024  ;;  %p3397_p4 = scmp.lt.u32.totalorder %s3595_s12, %s4263_s0 }
  0x17   : > { %p3394_p2 = pnand %p3393_p1, %p3392_p0  ;;  %p3398_p5 = scmp.lt.u32.totalorder %s3396_s26, %s3391_s17 }
  0x18   : > { %p3400_p8 = scmp.lt.u32.totalorder %s3391_s17, %s3595_s12 }
  0x19   : > { %p3395_p3 = pneg %p3394_p2  ;;  %p3399_p7 = por %p3398_p5, %p3397_p4 }
  0x1b   : > { %p3401_p10 = por %p3400_p8, %p3399_p7 }
  0x1d   : > { %p3402_p9 = pnand %p3401_p10, %p3395_p3 }
  0x1f   : > { %3405 = shalt.err (!%p3402_p9)
}
  0x20   : > { %s3406_s7 = scalar_lea.vmem %s3603_s14, 512  ;;  %s3489_s9 = smov [#allocation2]  }
  0x21   : > { %p3407_p0 = scmp.ne.s32.totalorder %s3603_s14, %s3406_s7  ;;  %s3411_s10 = sshll.u32 %s3489_s9, 4  ;;  %s3412_s10 = int_to_ptr.vmem [resolvable:$false] %s3411_s10 }
  0x22   : > { %s3413_s11 = scalar_lea.vmem %s3412_s10, 1024  ;;  %p3414_p11 = scmp.lt.s32.totalorder %s3603_s14, %s3412_s10 }
  0x23   : > { %p3409_p2 = pnand %p3407_p0, %p3393_p1  ;;  %p3415_p4 = scmp.lt.s32.totalorder %s3413_s11, %s3406_s7 }
  0x25   : > { %p3410_p12 = pneg %p3409_p2  ;;  %p3416_p5 = por %p3415_p4, %p3414_p11 }
  0x27   : > { %p3417_p7 = pnand %p3416_p5, %p3410_p12 }
  0x29   : > { %3420 = shalt.err (!%p3417_p7)
}
  0x2a   : > { %s3490_s13 = smov 64   ;;  %s3491_s17 = smov 4  }
  0x2b   : > { %3233 = dma.hbm_to_vmem [thread:$0]  (!%p3599_p13), %s3595_s12, 512, %s3603_s14, %s3605_s16, %s3490_s13, %s3490_s13, %s3491_s17  }
  0x2c   : > { %p2840_p9 = scmp.ge.s32.totalorder %s3487_s21, 1  ;;  %p206_p1 = scmp.lt.s32.totalorder %s3487_s21, 3 }
  0x2e   : > { %p207_p3 = pnand %p2840_p9, %p206_p1 }
  0x2f   : > { %s3636_s23 = sand.u32 (!%p207_p3), 1, %s3479_s19  }
  0x30   : > { %210 = sbr.rel (%p207_p3) target bundleno = 3029 (0xbd5), region = 40  ;;  %s2841_s25 = sshll.u32 (!%p207_p3), %s3636_s23, 5 }
  0x31   : > { %s213_s26 = scalar_lea.sflag (!%p207_p3), [#allocation3], %s3636_s23  ;;  %s216_s28 = scalar_lea.vmem (!%p207_p3), [#allocation2], %s2841_s25 }
  0x37   : > { %3466 = dma.done.wait (%p3575_p6), %s213_s26, 512  }
  0x38   : > { %3468 = vsyncadd (%p3575_p6), %s213_s26, 4294966784  ;;  %v3285_v0 = vld [vmem:[%s4264_s1] sm:$0xff]   ;;  %v3286_v1 = vld [vmem:[%s4264_s1 + $0x8] sm:$0xff]   ;;  %vm289_vm0 = vcmask 261120   ;;  %v3492_v6 = vmov 0.0   ;;  %vm3493_vm1 = vmmov 0  }
  0x39   : > { %3006 = vmatprep.subr.bf16.mxu0 %v3285_v0  ;;  %v3287_v2 = vld [vmem:[%s216_s28] sm:$0xff]   ;;  %3222 = vmatprep.subr.bf16.mxu1 %v3285_v0  ;;  %v3288_v3 = vld [vmem:[%s216_s28 + $0x8] sm:$0xff]   ;;  %v3289_v4 = vld [vmem:[%s216_s28 + $0x10] sm:$0xff]   ;;  %s3494_s29 = smov 96   ;;  %vm393_vm2 = vcmask 130048   ;;  %vm784_vm3 = vcmask 64512  }
  0x3a   : > { %3007 = vmatpush3.bf16.msra.mxu0 %v3285_v0  ;;  %3224 = vmatpush3.bf16.msra.mxu1 %v3285_v0  ;;  %v3290_v5 = vld [vmem:[%s216_s28 + $0x18] sm:$0xff]   ;;  %s3495_s8 = smov 64   ;;  %vm886_vm4 = vcmask 1043456   ;;  %s3496_s7 = smov 80   ;;  %vm2387_vm5 = vcmask 1041409   ;;  %vm2389_vm6 = vcmask 1042434  }
  0x3b   : > { %3008 = vmatprep.subr.bf16.mxu0 %v3286_v1  ;;  %3010 = vmatprep.mubr.msk.bf16.mxu0 %vm289_vm0, %v3287_v2  ;;  %s3497_s9 = smov 112   ;;  %s3498_s10 = smov 48   ;;  %vm2391_vm7 = vcmask 1043459   ;;  %vm2393_vm8 = vcmask 1044484   ;;  %vm2395_vm9 = vcmask 1045509   ;;  %vm2397_vm10 = vcmask 1046534  }
  0x3c   : > { %3223 = vmatprep.subr.bf16.mxu1 %v3286_v1  ;;  %3014 = vmatprep.mubr.msk.bf16.mxu1 %vm289_vm0, %v3289_v4  ;;  %s3499_s17 = smov 16   ;;  %vm2399_vm11 = vcmask 1047559   ;;  %s2842_s16 = sshll.u32 %s3636_s23, 2  ;;  %vm2748_vm12 = vcmask 257024  }
  0x3d   : > { %p4275_p11 = scmp.ne.s32.totalorder %s4272_s30, 0 }
  0x3e   : > { %3009 = vmatpush3.bf16.msra.mxu0 %v3286_v1  ;;  %3225 = vmatpush3.bf16.msra.mxu1 %v3286_v1 }
  0x3f   : > { %3030 = vmatprep.subr.bf16.mxu0 %v3492_v6  ;;  %3018 = vmatprep.subr.bf16.mxu1 %v3492_v6 }
  0x41   : > { %3011 = vmatmul.mubr.msk.bf16.vlgmr.msra.gmra.mrb[0].mxu0 %vm289_vm0, %v3288_v3  ;;  %3015 = vmatmul.mubr.msk.bf16.vlgmr.msra.gmra.mrb[0].mxu1 %vm289_vm0, %v3290_v5 }
  0x42   : > { %3032 = vmatprep.mubr.msk.bf16.mxu0 %vm3493_vm1, %v3492_v6  ;;  %3020 = vmatprep.mubr.msk.bf16.mxu1 %vm3493_vm1, %v3492_v6 }
 0x114   : > { %v3012_v7 = vpop.f32.mrb[0].mxu0  ;;  %v3016_v8 = vpop.f32.mrb[0].mxu1 }
 0x115   : > { %v3660_v9 = vpack.c.bf16 %v3012_v7, %v3012_v7  ;;  %v336_v10 = vpop.f32.mrb[1].mxu0  ;;  %v352_v11 = vpop.f32.mrb[1].mxu1  ;;  %v3679_v22 = vpack.c.bf16 %v3016_v8, %v3016_v8 }
 0x116   : > { %v3662_v12 = vpack.c.bf16 %v336_v10, %v336_v10  ;;  %v3013_v13 = vpop.f32.mrb[2].mxu0  ;;  %v3017_v14 = vpop.f32.mrb[2].mxu1  ;;  %v3674_v20 = vpack.c.bf16 %v352_v11, %v352_v11 }
 0x117   : > { %488 = vrot.lane.b32.xlu1 %v3660_v9, %s3494_s29  ;;  %v339_v15 = vpop.f32.mrb[3].mxu0  ;;  %v355_v16 = vpop.f32.mrb[3].mxu1  ;;  %v3666_v17 = vpack.c.bf16 %v3013_v13, %v3013_v13  ;;  %v3676_v21 = vpack.c.bf16 %v3017_v14, %v3017_v14 }
 0x118   : > { %391 = vrot.lane.b32.xlu0 %v3662_v12, %s3494_s29  ;;  %v3668_v18 = vpack.c.bf16 %v339_v15, %v339_v15  ;;  %v3671_v19 = vpack.c.bf16 %v355_v16, %v355_v16 }
 0x11b   : > { %536 = vrot.lane.b32.xlu1 %v3666_v17, %s3494_s29 }
 0x11c   : > { %440 = vrot.lane.b32.xlu0 %v3668_v18, %s3494_s29 }
 0x11f   : > { %632 = vrot.lane.b32.xlu1 %v3671_v19, %s3494_s29 }
 0x120   : > { %584 = vrot.lane.b32.xlu0 %v3674_v20, %s3494_s29 }
 0x123   : > { %728 = vrot.lane.b32.xlu1 %v3676_v21, %s3494_s29 }
 0x124   : > { %680 = vrot.lane.b32.xlu0 %v3679_v22, %s3494_s29  ;;  %s2910_s29 = sshll.u32 %s3553_s22, 6  ;;  %s2751_s22 = scalar_lea.sflag [#allocation4], %s3636_s23 }
 0x125   : > { %s4219_s11 = scalar_lea.hbm %s4268_s5, %s2910_s29 }
 0x189   : > { %v489_v23 = vpop.permute.xlu1 %488 }
 0x18a   : > { %v494_v24 = vsel %vm393_vm2, %v489_v23, 0  ;;  %v392_v25 = vpop.permute.xlu0 %391 }
 0x18b   : > { %v398_v26 = vsel %vm393_vm2, %v392_v25, 0  ;;  %3031 = vmatpush3.bf16.xpose.msra.mxu0 %v494_v24 }
 0x18c   : > { %3019 = vmatpush3.bf16.xpose.msra.mxu1 %v398_v26  ;;  %3042 = vmatprep.subr.bf16.mxu0 %v3492_v6 }
 0x18d   : > { %3024 = vmatprep.subr.bf16.mxu1 %v3492_v6  ;;  %v537_v32 = vpop.permute.xlu1 %536 }
 0x18e   : > { %v441_v27 = vpop.permute.xlu0 %440  ;;  %v542_v34 = vsel %vm393_vm2, %v537_v32, 0 }
 0x18f   : > { %v446_v29 = vsel %vm393_vm2, %v441_v27, 0 }
 0x191   : > { %v633_v35 = vpop.permute.xlu1 %632 }
 0x192   : > { %3033 = vmatmul.mubr.msk.bf16.vlgmr.msra.gmra.mrb[4].mxu0 %vm393_vm2, %v3660_v9  ;;  %v585_v28 = vpop.permute.xlu0 %584  ;;  %v638_v36 = vsel %vm393_vm2, %v633_v35, 0 }
 0x193   : > { %v590_v30 = vsel %vm393_vm2, %v585_v28, 0  ;;  %3021 = vmatmul.mubr.msk.bf16.vlgmr.msra.gmra.mrb[4].mxu1 %vm393_vm2, %v3662_v12  ;;  %3044 = vmatprep.mubr.msk.bf16.mxu0 %vm3493_vm1, %v3492_v6 }
 0x194   : > { %3025 = vmatpush3.bf16.xpose.msra.mxu1 %v446_v29  ;;  %3043 = vmatpush3.bf16.xpose.msra.mxu0 %v590_v30 }
 0x195   : > { %3026 = vmatprep.mubr.msk.bf16.mxu1 %vm3493_vm1, %v3492_v6  ;;  %3036 = vmatprep.subr.bf16.mxu1 %v3492_v6  ;;  %v729_v37 = vpop.permute.xlu1 %728 }
 0x196   : > { %v681_v31 = vpop.permute.xlu0 %680  ;;  %3054 = vmatprep.subr.bf16.mxu0 %v3492_v6  ;;  %v734_v38 = vsel %vm393_vm2, %v729_v37, 0 }
 0x197   : > { %v686_v33 = vsel %vm393_vm2, %v681_v31, 0 }
 0x19b   : > { %3027 = vmatmul.mubr.msk.bf16.vlgmr.msra.gmra.mrb[8].mxu1 %vm393_vm2, %v3668_v18  ;;  %3045 = vmatmul.mubr.msk.bf16.vlgmr.msra.gmra.mrb[8].mxu0 %vm393_vm2, %v3674_v20 }
 0x19c   : > { %3037 = vmatpush3.bf16.xpose.msra.mxu1 %v542_v34  ;;  %3055 = vmatpush3.bf16.xpose.msra.mxu0 %v686_v33 }
 0x19d   : > { %3038 = vmatprep.mubr.msk.bf16.mxu1 %vm3493_vm1, %v3492_v6  ;;  %3056 = vmatprep.mubr.msk.bf16.mxu0 %vm3493_vm1, %v3492_v6 }
 0x19e   : > { %3048 = vmatprep.subr.bf16.mxu1 %v3492_v6  ;;  %3066 = vmatprep.subr.bf16.mxu0 %v3492_v6 }
 0x1a3   : > { %3039 = vmatmul.mubr.msk.bf16.vlgmr.msra.gmra.mrb[12].mxu1 %vm393_vm2, %v3666_v17  ;;  %3057 = vmatmul.mubr.msk.bf16.vlgmr.msra.gmra.mrb[12].mxu0 %vm393_vm2, %v3679_v22 }
 0x1a4   : > { %3049 = vmatpush3.bf16.xpose.msra.mxu1 %v638_v36  ;;  %3050 = vmatprep.mubr.msk.bf16.mxu1 %vm3493_vm1, %v3492_v6 }
 0x1a5   : > { %3060 = vmatprep.subr.bf16.mxu1 %v3492_v6  ;;  %3068 = vmatprep.mubr.msk.bf16.mxu0 %vm3493_vm1, %v3492_v6 }
 0x1ab   : > { %3051 = vmatmul.mubr.msk.bf16.vlgmr.msra.gmra.mrb[16].mxu1 %vm393_vm2, %v3671_v19 }
 0x1ac   : > { %3061 = vmatpush3.bf16.xpose.msra.mxu1 %v734_v38  ;;  %3062 = vmatprep.mubr.msk.bf16.mxu1 %vm3493_vm1, %v3492_v6 }
 0x1ad   : > { %3072 = vmatprep.subr.bf16.mxu1 %v3492_v6 }
 0x1b3   : > { %3063 = vmatmul.mubr.msk.bf16.vlgmr.msra.gmra.mrb[20].mxu1 %vm393_vm2, %v3676_v21 }
 0x1b4   : > { %3074 = vmatprep.mubr.msk.bf16.mxu1 %vm3493_vm1, %v3492_v6 }
 0x265   : > { %v530_v39 = vpop.f32.mrb[4].mxu0 }
 0x266   : > { %v3732_v40 = vmul.f32 0.25, %v530_v39  ;;  %v434_v41 = vpop.f32.mrb[4].mxu1  ;;  %v3034_v42 = vpop.f32.mrb[5].mxu0 }
 0x267   : > { %v3022_v43 = vpop.f32.mrb[5].mxu1  ;;  %v533_v44 = vpop.f32.mrb[6].mxu0  ;;  %v3734_v45 = vmul.f32 0.25, %v434_v41 }
 0x268   : > { %v437_v46 = vpop.f32.mrb[6].mxu1  ;;  %v3035_v47 = vpop.f32.mrb[7].mxu0  ;;  %v791_v48 = vsel %vm784_vm3, %v3732_v40, -inf }
 0x269   : > { %v3023_v49 = vpop.f32.mrb[7].mxu1  ;;  %792 = vmax.xlane.f32.xlu0 %v791_v48  ;;  %v785_v50 = vsel %vm784_vm3, %v3734_v45, -inf }
 0x26d   : > { %786 = vmax.xlane.f32.xlu0 %v785_v50 }
 0x26e   : > { %v482_v51 = vpop.f32.mrb[8].mxu1  ;;  %v626_v52 = vpop.f32.mrb[8].mxu0 }
 0x26f   : > { %v780_v53 = vmul.f32 0.25, %v626_v52  ;;  %v3028_v54 = vpop.f32.mrb[9].mxu1  ;;  %v3046_v55 = vpop.f32.mrb[9].mxu0  ;;  %v777_v58 = vmul.f32 0.25, %v482_v51 }
 0x270   : > { %v485_v56 = vpop.f32.mrb[10].mxu1  ;;  %v629_v57 = vpop.f32.mrb[10].mxu0 }
 0x271   : > { %v3029_v59 = vpop.f32.mrb[11].mxu1  ;;  %v3047_v60 = vpop.f32.mrb[11].mxu0  ;;  %v797_v61 = vsel %vm784_vm3, %v780_v53, -inf  ;;  %v788_v62 = vsel %vm784_vm3, %v777_v58, -inf }
 0x272   : > { %798 = vmax.xlane.f32.xlu1 %v797_v61 }
 0x276   : > { %v578_v63 = vpop.f32.mrb[12].mxu1  ;;  %789 = vmax.xlane.f32.xlu1 %v788_v62  ;;  %v722_v0 = vpop.f32.mrb[12].mxu0 }
 0x277   : > { %v3040_v1 = vpop.f32.mrb[13].mxu1  ;;  %v3058_v2 = vpop.f32.mrb[13].mxu0  ;;  %v779_v24 = vmul.f32 0.25, %v578_v63  ;;  %v782_v29 = vmul.f32 0.25, %v722_v0 }
 0x278   : > { %v581_v3 = vpop.f32.mrb[14].mxu1  ;;  %v725_v4 = vpop.f32.mrb[14].mxu0 }
 0x279   : > { %v3041_v5 = vpop.f32.mrb[15].mxu1  ;;  %v3059_v7 = vpop.f32.mrb[15].mxu0  ;;  %v794_v26 = vsel %vm784_vm3, %v779_v24, -inf  ;;  %v803_v31 = vsel %vm784_vm3, %v782_v29, -inf }
 0x27e   : > { %v674_v8 = vpop.f32.mrb[16].mxu1 }
 0x27f   : > { %v3052_v10 = vpop.f32.mrb[17].mxu1  ;;  %v781_v25 = vmul.f32 0.25, %v674_v8 }
 0x280   : > { %v677_v11 = vpop.f32.mrb[18].mxu1 }
 0x281   : > { %v3053_v13 = vpop.f32.mrb[19].mxu1  ;;  %v800_v28 = vsel %vm784_vm3, %v781_v25, -inf }
 0x283   : > { %930 = vrot.lane.b32.xlu0 %v3668_v18, %s3495_s8 }
 0x286   : > { %v770_v14 = vpop.f32.mrb[20].mxu1 }
 0x287   : > { %v3064_v15 = vpop.f32.mrb[21].mxu1  ;;  %881 = vrot.lane.b32.xlu1 %v3662_v12, %s3495_s8  ;;  %v3747_v27 = vmul.f32 0.25, %v770_v14 }
 0x288   : > { %v773_v16 = vpop.f32.mrb[22].mxu1 }
 0x289   : > { %v3065_v23 = vpop.f32.mrb[23].mxu1  ;;  %v806_v30 = vsel %vm784_vm3, %v3747_v27, -inf }
 0x2a2   : > { %795 = vmax.xlane.f32.xlu0 %v794_v26 }
 0x2a6   : > { %801 = vmax.xlane.f32.xlu0 %v800_v28 }
 0x2aa   : > { %807 = vmax.xlane.f32.xlu0 %v806_v30 }
 0x2ab   : > { %804 = vmax.xlane.f32.xlu1 %v803_v31 }
 0x2bc   : > { %978 = vrot.lane.b32.xlu1 %v3660_v9, %s3495_s8 }
 0x2c0   : > { %1074 = vrot.lane.b32.xlu0 %v3674_v20, %s3495_s8  ;;  %1026 = vrot.lane.b32.xlu1 %v3666_v17, %s3495_s8 }
 0x2c4   : > { %1122 = vrot.lane.b32.xlu1 %v3671_v19, %s3495_s8 }
 0x2f6   : > { %v793_v32 = vpop.xlane.xlu0 %792 }
 0x2f7   : > { %v811_v33 = vsub.f32 %v3732_v40, %v793_v32 }
 0x2f9   : > { %v821_v34 = vmul.f32 1.442695, %v811_v33 }
 0x2fa   : > { %v787_v35 = vpop.xlane.xlu0 %786 }
 0x2fb   : > { %3293 = vpow2.f32 %v821_v34  ;;  %v809_v36 = vsub.f32 %v3734_v45, %v787_v35 }
 0x2fd   : > { %v817_v37 = vmul.f32 1.442695, %v809_v36 }
 0x2fe   : > { %v931_v38 = vpop.permute.xlu0 %930 }
 0x2ff   : > { %3295 = vpow2.f32 %v817_v37  ;;  %v936_v39 = vsel %vm886_vm4, %v931_v38, 0  ;;  %v799_v41 = vpop.xlane.xlu1 %798 }
 0x300   : > { %v813_v42 = vsub.f32 %v780_v53, %v799_v41  ;;  %3073 = vmatpush3.bf16.msra.mxu1 %v936_v39 }
 0x301   : > { %3084 = vmatprep.subr.bf16.mxu1 %v3492_v6 }
 0x302   : > { %v825_v43 = vmul.f32 1.442695, %v813_v42 }
 0x303   : > { %v790_v44 = vpop.xlane.xlu1 %789 }
 0x304   : > { %3297 = vpow2.f32 %v825_v43  ;;  %v810_v40 = vsub.f32 %v777_v58, %v790_v44 }
 0x305   : > { %v3765_v46 = vpop.eup %3293 }
 0x306   : > { %v819_v47 = vmul.f32 1.442695, %v810_v40  ;;  %v839_v45 = vsel %vm784_vm3, %v3765_v46, 0.0 }
 0x307   : > { %v882_v48 = vpop.permute.xlu1 %881  ;;  %840 = vadd.xlane.f32.xlu1 %v839_v45 }
 0x308   : > { %3299 = vpow2.f32 %v819_v47  ;;  %v888_v49 = vsel %vm886_vm4, %v882_v48, 0 }
 0x309   : > { %v3770_v50 = vpop.eup %3295  ;;  %3067 = vmatpush3.bf16.msra.mxu0 %v888_v49 }
 0x30a   : > { %v833_v51 = vsel %vm784_vm3, %v3770_v50, 0.0  ;;  %3078 = vmatprep.subr.bf16.mxu0 %v3492_v6 }
 0x30b   : > { %834 = vadd.xlane.f32.xlu1 %v833_v51 }
 0x30e   : > { %v3775_v52 = vpop.eup %3297 }
 0x30f   : > { %v845_v53 = vsel %vm784_vm3, %v3775_v52, 0.0 }
 0x310   : > { %846 = vadd.xlane.f32.xlu1 %v845_v53 }
 0x312   : > { %v3779_v54 = vpop.eup %3299 }
 0x313   : > { %v836_v55 = vsel %vm784_vm3, %v3779_v54, 0.0 }
 0x314   : > { %837 = vadd.xlane.f32.xlu0 %v836_v55 }
 0x32f   : > { %v796_v56 = vpop.xlane.xlu0 %795 }
 0x330   : > { %v812_v57 = vsub.f32 %v779_v24, %v796_v56 }
 0x332   : > { %v823_v58 = vmul.f32 1.442695, %v812_v57 }
 0x333   : > { %v802_v59 = vpop.xlane.xlu0 %801 }
 0x334   : > { %3301 = vpow2.f32 %v823_v58  ;;  %v814_v60 = vsub.f32 %v781_v25, %v802_v59 }
 0x336   : > { %v827_v61 = vmul.f32 1.442695, %v814_v60 }
 0x337   : > { %v808_v8 = vpop.xlane.xlu0 %807 }
 0x338   : > { %3303 = vpow2.f32 %v827_v61  ;;  %v805_v62 = vpop.xlane.xlu1 %804  ;;  %v816_v10 = vsub.f32 %v3747_v27, %v808_v8 }
 0x339   : > { %v815_v63 = vsub.f32 %v782_v29, %v805_v62 }
 0x33a   : > { %v831_v11 = vmul.f32 1.442695, %v816_v10 }
 0x33b   : > { %v829_v0 = vmul.f32 1.442695, %v815_v63  ;;  %v1075_v26 = vpop.permute.xlu0 %1074 }
 0x33c   : > { %v979_v15 = vpop.permute.xlu1 %978  ;;  %v1080_v39 = vsel %vm886_vm4, %v1075_v26, 0 }
 0x33d   : > { %3305 = vpow2.f32 %v829_v0  ;;  %v984_v32 = vsel %vm886_vm4, %v979_v15, 0 }
 0x33e   : > { %v3783_v1 = vpop.eup %3301  ;;  %3307 = vpow2.f32 %v831_v11 }
 0x33f   : > { %v842_v2 = vsel %vm784_vm3, %v3783_v1, 0.0 }
 0x340   : > { %843 = vadd.xlane.f32.xlu0 %v842_v2  ;;  %v1027_v16 = vpop.permute.xlu1 %1026 }
 0x341   : > { %v1032_v41 = vsel %vm886_vm4, %v1027_v16, 0 }
 0x342   : > { %v3787_v3 = vpop.eup %3303 }
 0x343   : > { %v848_v4 = vsel %vm784_vm3, %v3787_v3, 0.0 }
 0x344   : > { %849 = vadd.xlane.f32.xlu0 %v848_v4  ;;  %v1123_v23 = vpop.permute.xlu1 %1122 }
 0x347   : > { %v3791_v5 = vpop.eup %3305 }
 0x348   : > { %v851_v7 = vsel %vm784_vm3, %v3791_v5, 0.0  ;;  %v3812_v13 = vpop.eup %3307 }
 0x349   : > { %852 = vadd.xlane.f32.xlu1 %v851_v7  ;;  %v854_v14 = vsel %vm784_vm3, %v3812_v13, 0.0 }
 0x35a   : > { %1218 = vrot.lane.b32.xlu1 %v3676_v21, %s3495_s8  ;;  %1170 = vrot.lane.b32.xlu0 %v3679_v22, %s3495_s8  ;;  %s242_s8 = scalar_lea.vmem [#allocation5], %s2842_s16 }
 0x35e   : > { %1318 = vrot.lane.b32.xlu1 %v3668_v18, %s3496_s7 }
 0x362   : > { %1316 = vrot.lane.b32.xlu1 %v3668_v18, %s3497_s9 }
 0x366   : > { %1418 = vrot.lane.b32.xlu1 %v3666_v17, %s3496_s7 }
 0x36a   : > { %1416 = vrot.lane.b32.xlu1 %v3666_v17, %s3497_s9 }
 0x36e   : > { %1518 = vrot.lane.b32.xlu1 %v3671_v19, %s3496_s7 }
 0x372   : > { %1516 = vrot.lane.b32.xlu1 %v3671_v19, %s3497_s9 }
 0x376   : > { %1618 = vrot.lane.b32.xlu1 %v3676_v21, %s3496_s7 }
 0x379   : > { %855 = vadd.xlane.f32.xlu0 %v854_v14 }
 0x37a   : > { %1616 = vrot.lane.b32.xlu1 %v3676_v21, %s3497_s9 }
 0x37e   : > { %1770 = vrot.lane.b32.xlu1 %v3662_v12, %s3498_s10 }
 0x38f   : > { %1268 = vrot.lane.b32.xlu0 %v3662_v12, %s3496_s7 }
 0x393   : > { %1266 = vrot.lane.b32.xlu0 %v3662_v12, %s3497_s9 }
 0x394   : > { %v841_v24 = vpop.xlane.xlu1 %840 }
 0x397   : > { %1368 = vrot.lane.b32.xlu0 %v3660_v9, %s3496_s7 }
 0x398   : > { %v835_v25 = vpop.xlane.xlu1 %834 }
 0x399   : > { %3309 = vrcp.f32 %v835_v25 }
 0x39a   : > { %3311 = vrcp.f32 %v841_v24 }
 0x39b   : > { %1366 = vrot.lane.b32.xlu0 %v3660_v9, %s3497_s9 }
 0x39d   : > { %v847_v28 = vpop.xlane.xlu1 %846 }
 0x39f   : > { %1468 = vrot.lane.b32.xlu0 %v3674_v20, %s3496_s7 }
 0x3a1   : > { %v838_v27 = vpop.xlane.xlu0 %837 }
 0x3a2   : > { %3313 = vrcp.f32 %v838_v27 }
 0x3a3   : > { %v3310_v29 = vpop.eup %3309  ;;  %1466 = vrot.lane.b32.xlu0 %v3674_v20, %s3497_s9  ;;  %3315 = vrcp.f32 %v847_v28 }
 0x3a4   : > { %v865_v12 = vmul.f32 %v3310_v29, %v3770_v50  ;;  %v3312_v31 = vpop.eup %3311 }
 0x3a5   : > { %v867_v33 = vmul.f32 %v3312_v31, %v3765_v46 }
 0x3a6   : > { %v873_v30 = vpack.c.bf16 %v865_v12, %v865_v12 }
 0x3a7   : > { %1568 = vrot.lane.b32.xlu0 %v3679_v22, %s3496_s7  ;;  %v875_v36 = vpack.c.bf16 %v867_v33, %v867_v33  ;;  %s2764_s7 = sshll.u32 %s242_s8, 4  ;;  %s4221_s7 = int_to_ptr.vmem [resolvable:$true] %s2764_s7 }
 0x3a8   : > { %3069 = vmatmul.mubr.msk.bf16.vlgmr.msra.gmra.mrb[16].mxu0 %vm784_vm3, %v873_v30  ;;  %s3421_s13 = scalar_lea.vmem %s4221_s7, 64 }
 0x3a9   : > { %3079 = vmatpush3.bf16.msra.mxu0 %v984_v32  ;;  %3080 = vmatprep.mubr.msk.bf16.mxu0 %vm3493_vm1, %v3492_v6  ;;  %p3422_p6 = scmp.ne.s32.totalorder %s4221_s7, %s3421_s13 }
 0x3aa   : > { %3090 = vmatprep.subr.bf16.mxu0 %v3492_v6 }
 0x3ab   : > { %1566 = vrot.lane.b32.xlu0 %v3679_v22, %s3497_s9  ;;  %p3423_p12 = pnand %p3422_p6, %p4275_p11 }
 0x3ac   : > { %v3314_v34 = vpop.eup %3313 }
 0x3ad   : > { %v866_v35 = vmul.f32 %v3314_v34, %v3779_v54  ;;  %v3316_v37 = vpop.eup %3315  ;;  %p3424_p13 = pneg %p3423_p12 }
 0x3ae   : > { %v869_v42 = vmul.f32 %v3316_v37, %v3775_v52  ;;  %v1128_v52 = vsel %vm886_vm4, %v1123_v23, 0 }
 0x3af   : > { %v874_v38 = vpack.c.bf16 %v866_v35, %v866_v35 }
 0x3b0   : > { %3081 = vmatmul.mubr.msk.bf16.vlgmr.msra.gmra.mrb[20].mxu0 %vm784_vm3, %v875_v36  ;;  %v877_v43 = vpack.c.bf16 %v869_v42, %v869_v42 }
 0x3b1   : > { %3091 = vmatpush3.bf16.msra.mxu0 %v1080_v39  ;;  %3075 = vmatmul.mubr.msk.bf16.vlgmr.msra.gmra.mrb[24].mxu1 %vm784_vm3, %v874_v38 }
 0x3b2   : > { %3085 = vmatpush3.bf16.msra.mxu1 %v1032_v41  ;;  %3092 = vmatprep.mubr.msk.bf16.mxu0 %vm3493_vm1, %v3492_v6 }
 0x3b3   : > { %3102 = vmatprep.subr.bf16.mxu0 %v3492_v6  ;;  %3086 = vmatprep.mubr.msk.bf16.mxu1 %vm3493_vm1, %v3492_v6 }
 0x3b4   : > { %3096 = vmatprep.subr.bf16.mxu1 %v3492_v6 }
 0x3b8   : > { %3093 = vmatmul.mubr.msk.bf16.vlgmr.msra.gmra.mrb[24].mxu0 %vm784_vm3, %v877_v43 }
 0x3b9   : > { %3104 = vmatprep.mubr.msk.bf16.mxu0 %vm3493_vm1, %v3492_v6 }
 0x3cd   : > { %v844_v44 = vpop.xlane.xlu0 %843 }
 0x3ce   : > { %3317 = vrcp.f32 %v844_v44 }
 0x3d1   : > { %v850_v40 = vpop.xlane.xlu0 %849 }
 0x3d2   : > { %3319 = vrcp.f32 %v850_v40 }
 0x3d5   : > { %v1171_v46 = vpop.permute.xlu0 %1170 }
 0x3d6   : > { %v1176_v47 = vsel %vm886_vm4, %v1171_v46, 0  ;;  %v853_v45 = vpop.xlane.xlu1 %852 }
 0x3d7   : > { %3321 = vrcp.f32 %v853_v45  ;;  %3103 = vmatpush3.bf16.msra.mxu0 %v1176_v47 }
 0x3d8   : > { %v3318_v48 = vpop.eup %3317  ;;  %3114 = vmatprep.subr.bf16.mxu0 %v3492_v6 }
 0x3d9   : > { %v868_v49 = vmul.f32 %v3318_v48, %v3783_v1 }
 0x3da   : > { %v1219_v56 = vpop.permute.xlu1 %1218 }
 0x3db   : > { %v876_v50 = vpack.c.bf16 %v868_v49, %v868_v49  ;;  %v1224_v59 = vsel %vm886_vm4, %v1219_v56, 0 }
 0x3dc   : > { %v3320_v51 = vpop.eup %3319 }
 0x3dd   : > { %3087 = vmatmul.mubr.msk.bf16.vlgmr.msra.gmra.mrb[28].mxu1 %vm784_vm3, %v876_v50  ;;  %v870_v53 = vmul.f32 %v3320_v51, %v3787_v3 }
 0x3de   : > { %3097 = vmatpush3.bf16.msra.mxu1 %v1128_v52  ;;  %3098 = vmatprep.mubr.msk.bf16.mxu1 %vm3493_vm1, %v3492_v6  ;;  %v1319_v60 = vpop.permute.xlu1 %1318 }
 0x3df   : > { %3108 = vmatprep.subr.bf16.mxu1 %v3492_v6  ;;  %v878_v57 = vpack.c.bf16 %v870_v53, %v870_v53  ;;  %v1324_v14 = vsel %vm393_vm2, %v1319_v60, 0 }
 0x3e1   : > { %v3322_v54 = vpop.eup %3321 }
 0x3e2   : > { %v871_v55 = vmul.f32 %v3322_v54, %v3791_v5  ;;  %v1317_v61 = vpop.permute.xlu1 %1316 }
 0x3e4   : > { %v879_v58 = vpack.c.bf16 %v871_v55, %v871_v55 }
 0x3e5   : > { %3099 = vmatmul.mubr.msk.bf16.vlgmr.msra.gmra.mrb[32].mxu1 %vm784_vm3, %v878_v57 }
 0x3e6   : > { %3109 = vmatpush3.bf16.msra.mxu1 %v1224_v59  ;;  %3105 = vmatmul.mubr.msk.bf16.vlgmr.msra.gmra.mrb[28].mxu0 %vm784_vm3, %v879_v58  ;;  %v1419_v62 = vpop.permute.xlu1 %1418 }
 0x3e7   : > { %3116 = vmatprep.mubr.msk.bf16.mxu0 %vm3493_vm1, %v3492_v6  ;;  %3110 = vmatprep.mubr.msk.bf16.mxu1 %vm3493_vm1, %v3492_v6  ;;  %v1424_v25 = vsel %vm393_vm2, %v1419_v62, 0 }
 0x3e8   : > { %3120 = vmatprep.subr.bf16.mxu1 %v3492_v6 }
 0x3ea   : > { %v1417_v0 = vpop.permute.xlu1 %1416 }
 0x3ee   : > { %v1519_v4 = vpop.permute.xlu1 %1518 }
 0x3ef   : > { %v1524_v12 = vsel %vm393_vm2, %v1519_v4, 0 }
 0x3f2   : > { %v1517_v15 = vpop.permute.xlu1 %1516 }
 0x3f6   : > { %v1619_v24 = vpop.permute.xlu1 %1618 }
 0x3f7   : > { %v1624_v33 = vsel %vm393_vm2, %v1619_v24, 0 }
 0x3fa   : > { %v1617_v27 = vpop.permute.xlu1 %1616 }
 0x3fe   : > { %v1771_v30 = vpop.permute.xlu1 %1770 }
 0x3ff   : > { %v1776_v32 = vsel %vm886_vm4, %v1771_v30, 0 }
 0x406   : > { %v856_v63 = vpop.xlane.xlu0 %855 }
 0x407   : > { %3323 = vrcp.f32 %v856_v63 }
 0x40a   : > { %v1269_v1 = vpop.permute.xlu0 %1268 }
 0x40b   : > { %v1274_v2 = vsel %vm393_vm2, %v1269_v1, 0 }
 0x40c   : > { %3115 = vmatpush3.bf16.xpose.msra.mxu0 %v1274_v2 }
 0x40d   : > { %3126 = vmatprep.subr.bf16.mxu0 %v3492_v6 }
 0x40e   : > { %v1267_v3 = vpop.permute.xlu0 %1266 }
 0x411   : > { %v3324_v5 = vpop.eup %3323 }
 0x412   : > { %v872_v7 = vmul.f32 %v3324_v5, %v3812_v13  ;;  %v1369_v8 = vpop.permute.xlu0 %1368 }
 0x413   : > { %v1374_v10 = vsel %vm393_vm2, %v1369_v8, 0  ;;  %3117 = vmatmul.mubr.msk.bf16.vlgmr.msra.gmra.mrb[32].mxu0 %vm393_vm2, %v1267_v3 }
 0x414   : > { %3127 = vmatpush3.bf16.xpose.msra.mxu0 %v1374_v10  ;;  %v880_v11 = vpack.c.bf16 %v872_v7, %v872_v7  ;;  %3128 = vmatprep.mubr.msk.bf16.mxu0 %vm3493_vm1, %v3492_v6 }
 0x415   : > { %3138 = vmatprep.subr.bf16.mxu0 %v3492_v6 }
 0x416   : > { %3111 = vmatmul.mubr.msk.bf16.vlgmr.msra.gmra.mrb[36].mxu1 %vm784_vm3, %v880_v11  ;;  %v1367_v16 = vpop.permute.xlu0 %1366 }
 0x417   : > { %3121 = vmatpush3.bf16.xpose.msra.mxu1 %v1324_v14  ;;  %3122 = vmatprep.mubr.msk.bf16.mxu1 %vm3493_vm1, %v3492_v6 }
 0x418   : > { %3132 = vmatprep.subr.bf16.mxu1 %v3492_v6 }
 0x41a   : > { %v1469_v13 = vpop.permute.xlu0 %1468 }
 0x41b   : > { %v1474_v23 = vsel %vm393_vm2, %v1469_v13, 0  ;;  %3129 = vmatmul.mubr.msk.bf16.vlgmr.msra.gmra.mrb[36].mxu0 %vm393_vm2, %v1367_v16 }
 0x41c   : > { %3139 = vmatpush3.bf16.xpose.msra.mxu0 %v1474_v23  ;;  %3140 = vmatprep.mubr.msk.bf16.mxu0 %vm3493_vm1, %v3492_v6 }
 0x41d   : > { %3150 = vmatprep.subr.bf16.mxu0 %v3492_v6 }
 0x41e   : > { %3123 = vmatmul.mubr.msk.bf16.vlgmr.msra.gmra.mrb[40].mxu1 %vm393_vm2, %v1317_v61  ;;  %v1467_v26 = vpop.permute.xlu0 %1466 }
 0x41f   : > { %3133 = vmatpush3.bf16.xpose.msra.mxu1 %v1424_v25  ;;  %3134 = vmatprep.mubr.msk.bf16.mxu1 %vm3493_vm1, %v3492_v6 }
 0x420   : > { %3144 = vmatprep.subr.bf16.mxu1 %v3492_v6 }
 0x422   : > { %v1569_v28 = vpop.permute.xlu0 %1568 }
 0x423   : > { %v1574_v29 = vsel %vm393_vm2, %v1569_v28, 0  ;;  %3141 = vmatmul.mubr.msk.bf16.vlgmr.msra.gmra.mrb[40].mxu0 %vm393_vm2, %v1467_v26 }
 0x424   : > { %3151 = vmatpush3.bf16.xpose.msra.mxu0 %v1574_v29  ;;  %3152 = vmatprep.mubr.msk.bf16.mxu0 %vm3493_vm1, %v3492_v6 }
 0x425   : > { %3162 = vmatprep.subr.bf16.mxu0 %v3492_v6 }
 0x426   : > { %3135 = vmatmul.mubr.msk.bf16.vlgmr.msra.gmra.mrb[44].mxu1 %vm393_vm2, %v1417_v0  ;;  %v1567_v31 = vpop.permute.xlu0 %1566 }
 0x427   : > { %3145 = vmatpush3.bf16.xpose.msra.mxu1 %v1524_v12  ;;  %3146 = vmatprep.mubr.msk.bf16.mxu1 %vm3493_vm1, %v3492_v6 }
 0x428   : > { %3156 = vmatprep.subr.bf16.mxu1 %v3492_v6 }
 0x42b   : > { %3153 = vmatmul.mubr.msk.bf16.vlgmr.msra.gmra.mrb[44].mxu0 %vm393_vm2, %v1567_v31 }
 0x42c   : > { %3163 = vmatpush3.bf16.msra.mxu0 %v1776_v32  ;;  %3164 = vmatprep.mubr.msk.bf16.mxu0 %vm3493_vm1, %v3492_v6 }
 0x42d   : > { %3174 = vmatprep.subr.bf16.mxu0 %v3492_v6 }
 0x42e   : > { %3147 = vmatmul.mubr.msk.bf16.vlgmr.msra.gmra.mrb[48].mxu1 %vm393_vm2, %v1517_v15 }
 0x42f   : > { %3157 = vmatpush3.bf16.xpose.msra.mxu1 %v1624_v33  ;;  %3158 = vmatprep.mubr.msk.bf16.mxu1 %vm3493_vm1, %v3492_v6 }
 0x430   : > { %3168 = vmatprep.subr.bf16.mxu1 %v3492_v6 }
 0x436   : > { %3159 = vmatmul.mubr.msk.bf16.vlgmr.msra.gmra.mrb[52].mxu1 %vm393_vm2, %v1617_v27 }
 0x437   : > { %3170 = vmatprep.mubr.msk.bf16.mxu1 %vm3493_vm1, %v3492_v6 }
 0x47b   : > { %v3924_v34 = vpop.f32.mrb[16].mxu0 }
 0x47c   : > { %v3070_v35 = vpop.f32.mrb[17].mxu0 }
 0x47d   : > { %v927_v36 = vpop.f32.mrb[18].mxu0 }
 0x47e   : > { %v3071_v37 = vpop.f32.mrb[19].mxu0 }
 0x483   : > { %v3926_v38 = vpop.f32.mrb[20].mxu0 }
 0x484   : > { %v3928_v39 = vpop.f32.mrb[24].mxu1  ;;  %v3082_v41 = vpop.f32.mrb[21].mxu0 }
 0x485   : > { %v3076_v42 = vpop.f32.mrb[25].mxu1  ;;  %v1023_v43 = vpop.f32.mrb[22].mxu0 }
 0x486   : > { %v975_v44 = vpop.f32.mrb[26].mxu1  ;;  %v3083_v40 = vpop.f32.mrb[23].mxu0 }
 0x487   : > { %v3077_v46 = vpop.f32.mrb[27].mxu1 }
 0x48b   : > { %v3930_v47 = vpop.f32.mrb[24].mxu0 }
 0x48c   : > { %v3094_v45 = vpop.f32.mrb[25].mxu0 }
 0x48d   : > { %v1119_v48 = vpop.f32.mrb[26].mxu0 }
 0x48e   : > { %v3095_v49 = vpop.f32.mrb[27].mxu0 }
 0x4b0   : > { %v3932_v50 = vpop.f32.mrb[28].mxu1 }
 0x4b1   : > { %v3088_v51 = vpop.f32.mrb[29].mxu1 }
 0x4b2   : > { %v1071_v52 = vpop.f32.mrb[30].mxu1 }
 0x4b3   : > { %v3089_v53 = vpop.f32.mrb[31].mxu1 }
 0x4b8   : > { %v3934_v54 = vpop.f32.mrb[32].mxu1 }
 0x4b9   : > { %v3100_v55 = vpop.f32.mrb[33].mxu1  ;;  %v3936_v56 = vpop.f32.mrb[28].mxu0 }
 0x4ba   : > { %v1167_v57 = vpop.f32.mrb[34].mxu1  ;;  %v3106_v58 = vpop.f32.mrb[29].mxu0 }
 0x4bb   : > { %v3101_v59 = vpop.f32.mrb[35].mxu1  ;;  %v1215_v60 = vpop.f32.mrb[30].mxu0 }
 0x4bc   : > { %v3107_v61 = vpop.f32.mrb[31].mxu0 }
 0x4e6   : > { %v1310_v62 = vpop.f32.mrb[32].mxu0 }
 0x4e7   : > { %v3938_v63 = vmul.f32 0.25, %v1310_v62  ;;  %v3118_v0 = vpop.f32.mrb[33].mxu0 }
 0x4e8   : > { %v1313_v1 = vpop.f32.mrb[34].mxu0 }
 0x4e9   : > { %v3940_v2 = vpop.f32.mrb[36].mxu1  ;;  %v3119_v3 = vpop.f32.mrb[35].mxu0  ;;  %v1674_v4 = vsel %vm784_vm3, %v3938_v63, -inf }
 0x4ea   : > { %v3112_v5 = vpop.f32.mrb[37].mxu1  ;;  %1675 = vmax.xlane.f32.xlu0 %v1674_v4 }
 0x4eb   : > { %v1263_v7 = vpop.f32.mrb[38].mxu1 }
 0x4ec   : > { %v3113_v8 = vpop.f32.mrb[39].mxu1 }
 0x4ee   : > { %v1410_v10 = vpop.f32.mrb[36].mxu0 }
 0x4ef   : > { %v1668_v11 = vmul.f32 0.25, %v1410_v10  ;;  %v3130_v14 = vpop.f32.mrb[37].mxu0 }
 0x4f0   : > { %v1413_v15 = vpop.f32.mrb[38].mxu0 }
 0x4f1   : > { %v1360_v16 = vpop.f32.mrb[40].mxu1  ;;  %v3131_v13 = vpop.f32.mrb[39].mxu0  ;;  %v1680_v23 = vsel %vm784_vm3, %v1668_v11, -inf }
 0x4f2   : > { %v1667_v24 = vmul.f32 0.25, %v1360_v16  ;;  %v3124_v25 = vpop.f32.mrb[41].mxu1  ;;  %1681 = vmax.xlane.f32.xlu0 %v1680_v23 }
 0x4f3   : > { %v1363_v26 = vpop.f32.mrb[42].mxu1 }
 0x4f4   : > { %v3125_v27 = vpop.f32.mrb[43].mxu1  ;;  %v1677_v28 = vsel %vm784_vm3, %v1667_v24, -inf }
 0x4f5   : > { %1678 = vmax.xlane.f32.xlu1 %v1677_v28 }
 0x4f6   : > { %v1510_v29 = vpop.f32.mrb[40].mxu0 }
 0x4f7   : > { %v3946_v12 = vmul.f32 0.25, %v1510_v29  ;;  %v3142_v30 = vpop.f32.mrb[41].mxu0 }
 0x4f8   : > { %v1513_v31 = vpop.f32.mrb[42].mxu0 }
 0x4f9   : > { %v1460_v32 = vpop.f32.mrb[44].mxu1  ;;  %v3143_v33 = vpop.f32.mrb[43].mxu0  ;;  %v1686_v35 = vsel %vm784_vm3, %v3946_v12, -inf }
 0x4fa   : > { %v1669_v36 = vmul.f32 0.25, %v1460_v32  ;;  %v3136_v37 = vpop.f32.mrb[45].mxu1  ;;  %1687 = vmax.xlane.f32.xlu1 %v1686_v35 }
 0x4fb   : > { %v1463_v41 = vpop.f32.mrb[46].mxu1 }
 0x4fc   : > { %v3137_v42 = vpop.f32.mrb[47].mxu1  ;;  %v1683_v43 = vsel %vm784_vm3, %v1669_v36, -inf }
 0x4fd   : > { %1684 = vmax.xlane.f32.xlu0 %v1683_v43 }
 0x4fe   : > { %v1610_v44 = vpop.f32.mrb[44].mxu0 }
 0x4ff   : > { %v3951_v40 = vmul.f32 0.25, %v1610_v44  ;;  %v3154_v46 = vpop.f32.mrb[45].mxu0 }
 0x500   : > { %v1613_v45 = vpop.f32.mrb[46].mxu0 }
 0x501   : > { %v1560_v48 = vpop.f32.mrb[48].mxu1  ;;  %v3155_v49 = vpop.f32.mrb[47].mxu0  ;;  %v1692_v51 = vsel %vm784_vm3, %v3951_v40, -inf }
 0x502   : > { %v1671_v52 = vmul.f32 0.25, %v1560_v48  ;;  %v3148_v53 = vpop.f32.mrb[49].mxu1  ;;  %1693 = vmax.xlane.f32.xlu1 %v1692_v51 }
 0x503   : > { %v1563_v55 = vpop.f32.mrb[50].mxu1 }
 0x504   : > { %v3149_v57 = vpop.f32.mrb[51].mxu1  ;;  %v1689_v58 = vsel %vm784_vm3, %v1671_v52, -inf }
 0x505   : > { %1690 = vmax.xlane.f32.xlu0 %v1689_v58 }
 0x509   : > { %v1660_v59 = vpop.f32.mrb[52].mxu1 }
 0x50a   : > { %v1673_v60 = vmul.f32 0.25, %v1660_v59  ;;  %v3160_v61 = vpop.f32.mrb[53].mxu1 }
 0x50b   : > { %v1663_v62 = vpop.f32.mrb[54].mxu1 }
 0x50c   : > { %v3161_v0 = vpop.f32.mrb[55].mxu1  ;;  %v1695_v1 = vsel %vm784_vm3, %v1673_v60, -inf }
 0x50d   : > { %1696 = vmax.xlane.f32.xlu0 %v1695_v1 }
 0x513   : > { %1866 = vrot.lane.b32.xlu1 %v3660_v9, %s3498_s10 }
 0x517   : > { %1914 = vrot.lane.b32.xlu1 %v3666_v17, %s3498_s10 }
 0x523   : > { %1818 = vrot.lane.b32.xlu0 %v3668_v18, %s3498_s10 }
 0x577   : > { %v1676_v3 = vpop.xlane.xlu0 %1675 }
 0x578   : > { %v1698_v4 = vsub.f32 %v3938_v63, %v1676_v3 }
 0x57a   : > { %v1706_v5 = vmul.f32 1.442695, %v1698_v4 }
 0x57c   : > { %3325 = vpow2.f32 %v1706_v5 }
 0x57f   : > { %v1682_v7 = vpop.xlane.xlu0 %1681 }
 0x580   : > { %v1700_v8 = vsub.f32 %v1668_v11, %v1682_v7 }
 0x582   : > { %v1710_v10 = vmul.f32 1.442695, %v1700_v8  ;;  %v1679_v14 = vpop.xlane.xlu1 %1678 }
 0x583   : > { %v1699_v15 = vsub.f32 %v1667_v24, %v1679_v14 }
 0x584   : > { %3327 = vpow2.f32 %v1710_v10 }
 0x585   : > { %v1708_v16 = vmul.f32 1.442695, %v1699_v15 }
 0x586   : > { %v3326_v13 = vpop.eup %3325 }
 0x587   : > { %3329 = vpow2.f32 %v1708_v16  ;;  %v1722_v9 = vsel %vm784_vm3, %v3326_v13, 0.0  ;;  %v1688_v32 = vpop.xlane.xlu1 %1687 }
 0x588   : > { %1723 = vadd.xlane.f32.xlu1 %v1722_v9  ;;  %v1702_v33 = vsub.f32 %v3946_v12, %v1688_v32 }
 0x58a   : > { %v1685_v17 = vpop.xlane.xlu0 %1684 }
 0x58b   : > { %v1701_v23 = vsub.f32 %v1669_v36, %v1685_v17  ;;  %v1714_v36 = vmul.f32 1.442695, %v1702_v33 }
 0x58d   : > { %v1712_v18 = vmul.f32 1.442695, %v1701_v23 }
 0x58e   : > { %v3965_v25 = vpop.eup %3327 }
 0x58f   : > { %3331 = vpow2.f32 %v1712_v18  ;;  %v1728_v63 = vsel %vm784_vm3, %v3965_v25, 0.0  ;;  %v1694_v35 = vpop.xlane.xlu1 %1693 }
 0x590   : > { %1729 = vadd.xlane.f32.xlu1 %v1728_v63  ;;  %v1704_v37 = vsub.f32 %v3951_v40, %v1694_v35  ;;  %3333 = vpow2.f32 %v1714_v36 }
 0x591   : > { %v3969_v11 = vpop.eup %3329 }
 0x592   : > { %v1725_v24 = vsel %vm784_vm3, %v3969_v11, 0.0  ;;  %v1691_v26 = vpop.xlane.xlu0 %1690  ;;  %v1718_v41 = vmul.f32 1.442695, %v1704_v37 }
 0x593   : > { %1726 = vadd.xlane.f32.xlu0 %v1725_v24  ;;  %v1703_v42 = vsub.f32 %v1671_v52, %v1691_v26  ;;  %v1867_v52 = vpop.permute.xlu1 %1866 }
 0x594   : > { %3335 = vpow2.f32 %v1718_v41  ;;  %v1872_v62 = vsel %vm886_vm4, %v1867_v52, 0 }
 0x595   : > { %v1716_v43 = vmul.f32 1.442695, %v1703_v42 }
 0x597   : > { %3337 = vpow2.f32 %v1716_v43  ;;  %v1915_v53 = vpop.permute.xlu1 %1914 }
 0x598   : > { %v1920_v10 = vsel %vm886_vm4, %v1915_v53, 0 }
 0x599   : > { %v3973_v27 = vpop.eup %3331 }
 0x59a   : > { %v1697_v28 = vpop.xlane.xlu0 %1696  ;;  %v1731_v29 = vsel %vm784_vm3, %v3973_v27, 0.0  ;;  %v3985_v46 = vpop.eup %3333 }
 0x59b   : > { %1732 = vadd.xlane.f32.xlu0 %v1731_v29  ;;  %v1705_v44 = vsub.f32 %v1673_v60, %v1697_v28  ;;  %v1734_v12 = vsel %vm784_vm3, %v3985_v46, 0.0 }
 0x59e   : > { %v1819_v30 = vpop.permute.xlu0 %1818  ;;  %v3989_v45 = vpop.eup %3335 }
 0x59f   : > { %v1824_v31 = vsel %vm886_vm4, %v1819_v30, 0 }
 0x5a0   : > { %3169 = vmatpush3.bf16.msra.mxu1 %v1824_v31 }
 0x5a1   : > { %2010 = vrot.lane.b32.xlu1 %v3671_v19, %s3498_s10  ;;  %3180 = vmatprep.subr.bf16.mxu1 %v3492_v6  ;;  %v1720_v19 = vmul.f32 1.442695, %v1705_v44  ;;  %v3993_v40 = vpop.eup %3337  ;;  %v3291_v44 = vld [vmem:[%s4265_s2] sm:$0xff]  }
 0x5a2   : > { %v1737_v48 = vsel %vm784_vm3, %v3993_v40, 0.0 }
 0x5a3   : > { %3339 = vpow2.f32 %v1720_v19 }
 0x5ad   : > { %v3997_v49 = vpop.eup %3339 }
 0x5ae   : > { %v1743_v51 = vsel %vm784_vm3, %v3997_v49, 0.0 }
 0x5b1   : > { %1962 = vrot.lane.b32.xlu0 %v3674_v20, %s3498_s10  ;;  %v1740_v20 = vsel %vm784_vm3, %v3989_v45, 0.0 }
 0x5c5   : > { %1735 = vadd.xlane.f32.xlu1 %v1734_v12 }
 0x5c9   : > { %1741 = vadd.xlane.f32.xlu1 %v1740_v20 }
 0x5d0   : > { %1738 = vadd.xlane.f32.xlu0 %v1737_v48 }
 0x5d4   : > { %1744 = vadd.xlane.f32.xlu0 %v1743_v51 }
 0x5da   : > { %2106 = vrot.lane.b32.xlu1 %v3676_v21, %s3498_s10 }
 0x5ea   : > { %2058 = vrot.lane.b32.xlu0 %v3679_v22, %s3498_s10 }
 0x615   : > { %v1724_v55 = vpop.xlane.xlu1 %1723 }
 0x616   : > { %3341 = vrcp.f32 %v1724_v55 }
 0x61d   : > { %v1730_v57 = vpop.xlane.xlu1 %1729 }
 0x61e   : > { %3343 = vrcp.f32 %v1730_v57 }
 0x620   : > { %v3342_v58 = vpop.eup %3341  ;;  %v1727_v59 = vpop.xlane.xlu0 %1726 }
 0x621   : > { %v1754_v60 = vmul.f32 %v3342_v58, %v3326_v13  ;;  %3345 = vrcp.f32 %v1727_v59  ;;  %v2011_v16 = vpop.permute.xlu1 %2010 }
 0x622   : > { %v2016_v9 = vsel %vm886_vm4, %v2011_v16, 0 }
 0x623   : > { %v1762_v61 = vpack.c.bf16 %v1754_v60, %v1754_v60 }
 0x625   : > { %3165 = vmatmul.mubr.msk.bf16.vlgmr.msra.gmra.mrb[48].mxu0 %vm784_vm3, %v1762_v61 }
 0x626   : > { %3175 = vmatpush3.bf16.msra.mxu0 %v1872_v62  ;;  %3176 = vmatprep.mubr.msk.bf16.mxu0 %vm3493_vm1, %v3492_v6 }
 0x627   : > { %3186 = vmatprep.subr.bf16.mxu0 %v3492_v6 }
 0x628   : > { %v3344_v21 = vpop.eup %3343  ;;  %v1733_v22 = vpop.xlane.xlu0 %1732 }
 0x629   : > { %v1756_v0 = vmul.f32 %v3344_v21, %v3965_v25  ;;  %3347 = vrcp.f32 %v1733_v22 }
 0x62b   : > { %v3346_v1 = vpop.eup %3345  ;;  %v1764_v3 = vpack.c.bf16 %v1756_v0, %v1756_v0 }
 0x62c   : > { %v1755_v4 = vmul.f32 %v3346_v1, %v3969_v11  ;;  %v1963_v5 = vpop.permute.xlu0 %1962 }
 0x62d   : > { %v1968_v7 = vsel %vm886_vm4, %v1963_v5, 0  ;;  %3177 = vmatmul.mubr.msk.bf16.vlgmr.msra.gmra.mrb[52].mxu0 %vm784_vm3, %v1764_v3 }
 0x62e   : > { %3187 = vmatpush3.bf16.msra.mxu0 %v1968_v7  ;;  %v1763_v8 = vpack.c.bf16 %v1755_v4, %v1755_v4  ;;  %3188 = vmatprep.mubr.msk.bf16.mxu0 %vm3493_vm1, %v3492_v6 }
 0x62f   : > { %3198 = vmatprep.subr.bf16.mxu0 %v3492_v6 }
 0x630   : > { %3171 = vmatmul.mubr.msk.bf16.vlgmr.msra.gmra.mrb[56].mxu1 %vm784_vm3, %v1763_v8 }
 0x631   : > { %3181 = vmatpush3.bf16.msra.mxu1 %v1920_v10  ;;  %3182 = vmatprep.mubr.msk.bf16.mxu1 %vm3493_vm1, %v3492_v6 }
 0x632   : > { %3192 = vmatprep.subr.bf16.mxu1 %v3492_v6 }
 0x633   : > { %v3348_v14 = vpop.eup %3347 }
 0x634   : > { %v1757_v15 = vmul.f32 %v3348_v14, %v3973_v27 }
 0x636   : > { %v1765_v13 = vpack.c.bf16 %v1757_v15, %v1757_v15 }
 0x638   : > { %3183 = vmatmul.mubr.msk.bf16.vlgmr.msra.gmra.mrb[60].mxu1 %vm784_vm3, %v1765_v13 }
 0x639   : > { %3193 = vmatpush3.bf16.msra.mxu1 %v2016_v9  ;;  %3194 = vmatprep.mubr.msk.bf16.mxu1 %vm3493_vm1, %v3492_v6 }
 0x63a   : > { %3204 = vmatprep.subr.bf16.mxu1 %v3492_v6 }
 0x652   : > { %v1736_v17 = vpop.xlane.xlu1 %1735 }
 0x653   : > { %3349 = vrcp.f32 %v1736_v17 }
 0x656   : > { %v1742_v23 = vpop.xlane.xlu1 %1741 }
 0x657   : > { %3351 = vrcp.f32 %v1742_v23 }
 0x65a   : > { %v2107_v33 = vpop.permute.xlu1 %2106 }
 0x65b   : > { %v2112_v37 = vsel %vm886_vm4, %v2107_v33, 0 }
 0x65d   : > { %v3350_v18 = vpop.eup %3349  ;;  %v1739_v25 = vpop.xlane.xlu0 %1738 }
 0x65e   : > { %v1758_v63 = vmul.f32 %v3350_v18, %v3985_v46  ;;  %3353 = vrcp.f32 %v1739_v25 }
 0x660   : > { %v1766_v11 = vpack.c.bf16 %v1758_v63, %v1758_v63 }
 0x661   : > { %v3352_v24 = vpop.eup %3351  ;;  %v1745_v26 = vpop.xlane.xlu0 %1744 }
 0x662   : > { %3355 = vrcp.f32 %v1745_v26  ;;  %3189 = vmatmul.mubr.msk.bf16.vlgmr.msra.gmra.mrb[56].mxu0 %vm784_vm3, %v1766_v11  ;;  %v1760_v27 = vmul.f32 %v3352_v24, %v3989_v45 }
 0x663   : > { %3200 = vmatprep.mubr.msk.bf16.mxu0 %vm3493_vm1, %v3492_v6 }
 0x664   : > { %v1768_v31 = vpack.c.bf16 %v1760_v27, %v1760_v27 }
 0x665   : > { %v2059_v28 = vpop.permute.xlu0 %2058 }
 0x666   : > { %v2064_v29 = vsel %vm886_vm4, %v2059_v28, 0 }
 0x667   : > { %3199 = vmatpush3.bf16.msra.mxu0 %v2064_v29 }
 0x668   : > { %v3354_v30 = vpop.eup %3353  ;;  %3210 = vmatprep.subr.bf16.mxu0 %v3291_v44 }
 0x669   : > { %v1759_v32 = vmul.f32 %v3354_v30, %v3993_v40 }
 0x66a   : > { %3201 = vmatmul.mubr.msk.bf16.vlgmr.msra.gmra.mrb[60].mxu0 %vm784_vm3, %v1768_v31 }
 0x66b   : > { %v1767_v35 = vpack.c.bf16 %v1759_v32, %v1759_v32  ;;  %3211 = vmatpush3.bf16.msra.mxu0 %v3291_v44 }
 0x66c   : > { %v3356_v36 = vpop.eup %3355 }
 0x66d   : > { %3195 = vmatmul.mubr.msk.bf16.vlgmr.msra.gmra.mrb[64].mxu1 %vm784_vm3, %v1767_v35  ;;  %v1761_v41 = vmul.f32 %v3356_v36, %v3997_v49 }
 0x66e   : > { %3205 = vmatpush3.bf16.msra.mxu1 %v2112_v37  ;;  %3206 = vmatprep.mubr.msk.bf16.mxu1 %vm3493_vm1, %v3492_v6  ;;  %v3292_v6 = vld [vmem:[%s4265_s2 + $0x8] sm:$0xff]  }
 0x66f   : > { %v1769_v42 = vpack.c.bf16 %v1761_v41, %v1761_v41  ;;  %3212 = vmatprep.subr.bf16.mxu0 %v3292_v6 }
 0x670   : > { %3213 = vmatpush3.bf16.msra.mxu0 %v3292_v6 }
 0x675   : > { %3207 = vmatmul.mubr.msk.bf16.vlgmr.msra.gmra.mrb[68].mxu1 %vm784_vm3, %v1769_v42  ;;  %v2900_v42 = vld [vmem:[%s4267_s4] ss:$0 sm:$0xff] }
 0x6f8   : > { %v1812_v43 = vpop.f32.mrb[48].mxu0 }
 0x6f9   : > { %v3166_v46 = vpop.f32.mrb[49].mxu0  ;;  %2162 = vrot.lane.b32.xlu0 %v1812_v43, %s3499_s17 }
 0x6fa   : > { %v1815_v19 = vpop.f32.mrb[50].mxu0 }
 0x6fb   : > { %v3167_v12 = vpop.f32.mrb[51].mxu0 }
 0x700   : > { %v1908_v45 = vpop.f32.mrb[52].mxu0 }
 0x701   : > { %v3178_v20 = vpop.f32.mrb[53].mxu0  ;;  %2166 = vrot.lane.b32.xlu0 %v1908_v45, %s3499_s17 }
 0x702   : > { %v1911_v40 = vpop.f32.mrb[54].mxu0 }
 0x703   : > { %v1860_v48 = vpop.f32.mrb[56].mxu1  ;;  %v3179_v49 = vpop.f32.mrb[55].mxu0 }
 0x704   : > { %2164 = vrot.lane.b32.xlu1 %v1860_v48, %s3499_s17  ;;  %v3172_v51 = vpop.f32.mrb[57].mxu1 }
 0x705   : > { %v1863_v52 = vpop.f32.mrb[58].mxu1 }
 0x706   : > { %v3173_v53 = vpop.f32.mrb[59].mxu1 }
 0x70b   : > { %v1956_v55 = vpop.f32.mrb[60].mxu1 }
 0x70c   : > { %2168 = vrot.lane.b32.xlu1 %v1956_v55, %s3499_s17  ;;  %v3184_v57 = vpop.f32.mrb[61].mxu1 }
 0x70d   : > { %v1959_v58 = vpop.f32.mrb[62].mxu1 }
 0x70e   : > { %v3185_v59 = vpop.f32.mrb[63].mxu1 }
 0x735   : > { %v2004_v60 = vpop.f32.mrb[56].mxu0 }
 0x736   : > { %2170 = vrot.lane.b32.xlu0 %v2004_v60, %s3499_s17  ;;  %v3190_v61 = vpop.f32.mrb[57].mxu0 }
 0x737   : > { %v2007_v62 = vpop.f32.mrb[58].mxu0 }
 0x738   : > { %v3191_v21 = vpop.f32.mrb[59].mxu0 }
 0x73d   : > { %v2100_v22 = vpop.f32.mrb[60].mxu0 }
 0x73e   : > { %2174 = vrot.lane.b32.xlu0 %v2100_v22, %s3499_s17  ;;  %v3202_v0 = vpop.f32.mrb[61].mxu0 }
 0x73f   : > { %v2103_v1 = vpop.f32.mrb[62].mxu0 }
 0x740   : > { %v2052_v3 = vpop.f32.mrb[64].mxu1  ;;  %v3203_v4 = vpop.f32.mrb[63].mxu0 }
 0x741   : > { %2172 = vrot.lane.b32.xlu1 %v2052_v3, %s3499_s17  ;;  %v3196_v5 = vpop.f32.mrb[65].mxu1 }
 0x742   : > { %v2055_v7 = vpop.f32.mrb[66].mxu1 }
 0x743   : > { %v3197_v8 = vpop.f32.mrb[67].mxu1 }
 0x748   : > { %v2148_v10 = vpop.f32.mrb[68].mxu1 }
 0x749   : > { %2176 = vrot.lane.b32.xlu1 %v2148_v10, %s3499_s17  ;;  %v3208_v14 = vpop.f32.mrb[69].mxu1  ;;  %s3501_s17 = smov [#allocation5]  }
 0x74a   : > { %v2151_v15 = vpop.f32.mrb[70].mxu1  ;;  %s3425_s25 = sshll.u32 %s3501_s17, 4  ;;  %s3426_s25 = int_to_ptr.vmem [resolvable:$false] %s3425_s25 }
 0x74b   : > { %v3209_v16 = vpop.f32.mrb[71].mxu1  ;;  %s3427_s26 = scalar_lea.vmem %s3426_s25, 128  ;;  %p3428_p8 = scmp.lt.s32.totalorder %s4221_s7, %s3426_s25 }
 0x74c   : > { %v2353_v16 = vlaneseq  ;;  %p3429_p10 = scmp.lt.s32.totalorder %s3427_s26, %s3421_s13 }
 0x74e   : > { %p3430_p0 = por %p3429_p10, %p3428_p8 }
 0x750   : > { %p3431_p2 = pnand %p3430_p0, %p3424_p13 }
 0x76b   : > { %v2163_v13 = vpop.permute.xlu0 %2162 }
 0x76c   : > { %v4058_v17 = vsel %vm393_vm2, %v3924_v34, %v2163_v13  ;;  %v2354_v13 = vand.u32 127, %v2353_v16 }
 0x773   : > { %v2167_v25 = vpop.permute.xlu0 %2166 }
 0x774   : > { %v4069_v11 = vsel %vm393_vm2, %v3926_v38, %v2167_v25 }
 0x776   : > { %v2165_v9 = vpop.permute.xlu1 %2164 }
 0x777   : > { %v4062_v23 = vsel %vm393_vm2, %v3928_v39, %v2165_v9  ;;  %v4114_v9 = vshrl.u32 %v2353_v16, 7 }
 0x778   : > { %v2194_v18 = vpack.c.bf16 %v4062_v23, %v4058_v17 }
 0x77a   : > { %3214 = vmatprep.mubr.msk.bf16.mxu0 %vm289_vm0, %v2194_v18 }
 0x77e   : > { %v2169_v63 = vpop.permute.xlu1 %2168 }
 0x77f   : > { %v4073_v24 = vsel %vm393_vm2, %v3932_v50, %v2169_v63  ;;  %v4117_v63 = vsub.s32 %v2354_v13, %v4114_v9 }
 0x780   : > { %v2195_v34 = vpack.c.bf16 %v4073_v24, %v4069_v11 }
 0x782   : > { %3215 = vmatmul.mubr.msk.bf16.vlgmr.msra.gmra.mrb[64].mxu0 %vm289_vm0, %v2195_v34 }
 0x7a8   : > { %v2171_v39 = vpop.permute.xlu0 %2170 }
 0x7a9   : > { %v4080_v27 = vsel %vm393_vm2, %v3930_v47, %v2171_v39 }
 0x7b0   : > { %v2175_v50 = vpop.permute.xlu0 %2174 }
 0x7b1   : > { %v4091_v30 = vsel %vm393_vm2, %v3936_v56, %v2175_v50 }
 0x7b3   : > { %v2173_v26 = vpop.permute.xlu1 %2172 }
 0x7b4   : > { %v4084_v28 = vsel %vm393_vm2, %v3934_v54, %v2173_v26  ;;  %v2893_v54 = vld [vmem:[%s4266_s3] ss:$0 sm:$0xff] }
 0x7b5   : > { %v2196_v38 = vpack.c.bf16 %v4084_v28, %v4080_v27 }
 0x7b7   : > { %3218 = vmatprep.mubr.msk.bf16.mxu0 %vm289_vm0, %v2196_v38 }
 0x7bb   : > { %v2177_v29 = vpop.permute.xlu1 %2176 }
 0x7bc   : > { %v4095_v31 = vsel %vm393_vm2, %v3940_v2, %v2177_v29 }
 0x7bd   : > { %v2197_v47 = vpack.c.bf16 %v4095_v31, %v4091_v30 }
 0x7bf   : > { %3219 = vmatmul.mubr.msk.bf16.gmra.mrb[68].mxu0 %vm289_vm0, %v2197_v47 }
 0x855   : > { %v3216_v32 = vpop.f32.mrb[64].mxu0 }
 0x856   : > { %v2276_v33 = vadd.f32 %v3216_v32, %v2893_v54  ;;  %v2267_v35 = vpop.f32.mrb[65].mxu0 }
 0x857   : > { %v2268_v36 = vadd.f32 %v2893_v54, %v2267_v35  ;;  %v3217_v37 = vpop.f32.mrb[66].mxu0 }
 0x858   : > { %3357 = vtanh.f32 %v2276_v33  ;;  %v2279_v56 = vadd.f32 %v3217_v37, %v2893_v54  ;;  %v2270_v41 = vpop.f32.mrb[67].mxu0 }
 0x859   : > { %3359 = vtanh.f32 %v2268_v36  ;;  %v2271_v2 = vadd.f32 %v2893_v54, %v2270_v41 }
 0x85b   : > { %3361 = vtanh.f32 %v2271_v2 }
 0x85c   : > { %3363 = vtanh.f32 %v2279_v56 }
 0x862   : > { %v3358_v43 = vpop.eup %3357 }
 0x863   : > { %v3360_v44 = vpop.eup %3359  ;;  %v2315_v46 = vmul.f32 %v3358_v43, %v2900_v42 }
 0x864   : > { %v2313_v6 = vmul.f32 %v3360_v44, %v2900_v42 }
 0x865   : > { %v3362_v19 = vpop.eup %3361  ;;  %v2327_v12 = vsel %vm393_vm2, %v2315_v46, 0.0 }
 0x866   : > { %v3364_v45 = vpop.eup %3363  ;;  %2328 = vadd.xlane.f32.xlu0 %v2327_v12  ;;  %v2314_v20 = vmul.f32 %v3362_v19, %v2900_v42  ;;  %v2321_v48 = vsel %vm393_vm2, %v2313_v6, 0.0  ;;  %v3500_v12 = vmov 0   ;;  %v2408_v6 = vsub.s32 0, %v4114_v9 }
 0x867   : > { %v2316_v49 = vmul.f32 %v3364_v45, %v2900_v42  ;;  %3284 = vset.pattern.permute.xlu1 %v3500_v12  ;;  %3283 = vset.pattern.permute.xlu0 %v3500_v12  ;;  %v2412_v45 = vsub.s32 1, %v4114_v9 }
 0x868   : > { %v2324_v40 = vsel %vm393_vm2, %v2314_v20, 0.0  ;;  %v2416_v20 = vsub.s32 2, %v4114_v9 }
 0x869   : > { %2325 = vadd.xlane.f32.xlu1 %v2324_v40  ;;  %v2330_v51 = vsel %vm393_vm2, %v2316_v49, 0.0  ;;  %v2420_v40 = vsub.s32 3, %v4114_v9 }
 0x86a   : > { %2322 = vadd.xlane.f32.xlu0 %v2321_v48 }
 0x86e   : > { %2331 = vadd.xlane.f32.xlu0 %v2330_v51 }
 0x892   : > { %v3220_v52 = vpop.f32.mrb[68].mxu0 }
 0x893   : > { %v2292_v53 = vadd.f32 %v3220_v52, %v2893_v54  ;;  %v2283_v55 = vpop.f32.mrb[69].mxu0 }
 0x894   : > { %v2284_v57 = vadd.f32 %v2893_v54, %v2283_v55  ;;  %v3221_v58 = vpop.f32.mrb[70].mxu0 }
 0x895   : > { %3365 = vtanh.f32 %v2292_v53  ;;  %v2295_v59 = vadd.f32 %v3221_v58, %v2893_v54  ;;  %v2286_v60 = vpop.f32.mrb[71].mxu0 }
 0x896   : > { %3367 = vtanh.f32 %v2284_v57  ;;  %v2287_v61 = vadd.f32 %v2893_v54, %v2286_v60  ;;  %v2424_v57 = vsub.s32 4, %v4114_v9 }
 0x897   : > { %3369 = vtanh.f32 %v2295_v59 }
 0x898   : > { %3371 = vtanh.f32 %v2287_v61 }
 0x89f   : > { %v3366_v62 = vpop.eup %3365 }
 0x8a0   : > { %v3368_v21 = vpop.eup %3367  ;;  %v2319_v22 = vmul.f32 %v3366_v62, %v2900_v42  ;;  %v2428_v62 = vsub.s32 5, %v4114_v9 }
 0x8a1   : > { %v3370_v0 = vpop.eup %3369  ;;  %v2317_v1 = vmul.f32 %v3368_v21, %v2900_v42 }
 0x8a2   : > { %v3372_v3 = vpop.eup %3371  ;;  %v2320_v4 = vmul.f32 %v3370_v0, %v2900_v42  ;;  %v2339_v10 = vsel %vm393_vm2, %v2319_v22, 0.0 }
 0x8a3   : > { %v2333_v5 = vsel %vm393_vm2, %v2317_v1, 0.0  ;;  %v2318_v7 = vmul.f32 %v3372_v3, %v2900_v42  ;;  %v2432_v1 = vsub.s32 6, %v4114_v9 }
 0x8a4   : > { %2334 = vadd.xlane.f32.xlu1 %v2333_v5  ;;  %v2342_v14 = vsel %vm393_vm2, %v2320_v4, 0.0 }
 0x8a5   : > { %v2336_v8 = vsel %vm393_vm2, %v2318_v7, 0.0  ;;  %v2436_v7 = vsub.s32 7, %v4114_v9 }
 0x8a6   : > { %2337 = vadd.xlane.f32.xlu0 %v2336_v8 }
 0x8a8   : > { %2340 = vadd.xlane.f32.xlu1 %v2339_v10 }
 0x8aa   : > { %2343 = vadd.xlane.f32.xlu0 %v2342_v14 }
 0x8f3   : > { %v2329_v15 = vpop.xlane.xlu0 %2328 }
 0x8f4   : > { %v2366_v29 = vrot.slane %v2329_v15, %v4117_v63 }
 0x8f6   : > { %v2326_v25 = vpop.xlane.xlu1 %2325 }
 0x8f7   : > { %v2323_v18 = vpop.xlane.xlu0 %2322  ;;  %v2362_v34 = vrot.slane %v2326_v25, %v4117_v63 }
 0x8f8   : > { %v2358_v39 = vrot.slane %v2323_v18, %v4117_v63 }
 0x8fa   : > { %v2388_v38 = vsel %vm2387_vm5, %v2362_v34, %v2358_v39 }
 0x8fb   : > { %v2332_v26 = vpop.xlane.xlu0 %2331  ;;  %v2390_v54 = vsel %vm2389_vm6, %v2366_v29, %v2388_v38 }
 0x8fc   : > { %v2370_v50 = vrot.slane %v2332_v26, %v4117_v63 }
 0x8fe   : > { %v2392_v33 = vsel %vm2391_vm7, %v2370_v50, %v2390_v54 }
 0x931   : > { %v2335_v47 = vpop.xlane.xlu1 %2334 }
 0x932   : > { %v2374_v32 = vrot.slane %v2335_v47, %v4117_v63 }
 0x933   : > { %v2338_v35 = vpop.xlane.xlu0 %2337 }
 0x934   : > { %v2394_v36 = vsel %vm2393_vm8, %v2374_v32, %v2392_v33  ;;  %v2378_v37 = vrot.slane %v2338_v35, %v4117_v63 }
 0x935   : > { %v2341_v56 = vpop.xlane.xlu1 %2340 }
 0x936   : > { %v2382_v41 = vrot.slane %v2341_v56, %v4117_v63  ;;  %v2396_v2 = vsel %vm2395_vm9, %v2378_v37, %v2394_v36 }
 0x937   : > { %v2344_v42 = vpop.xlane.xlu0 %2343 }
 0x938   : > { %v2386_v43 = vrot.slane %v2344_v42, %v4117_v63  ;;  %v2398_v44 = vsel %vm2397_vm10, %v2382_v41, %v2396_v2 }
 0x93a   : > { %v2400_v46 = vsel %vm2399_vm11, %v2386_v43, %v2398_v44 }
 0x93b   : > { %v2402_v19 = vsel %vm784_vm3, %v2400_v46, -inf }
 0x93c   : > { %2403 = vmax.xlane.f32.xlu1 %v2402_v19 }
 0x9c9   : > { %v2404_v48 = vpop.xlane.xlu1 %2403 }
 0x9ca   : > { %v2409_v49 = vrot.slane %v2404_v48, %v2408_v6  ;;  %v2413_v51 = vrot.slane %v2404_v48, %v2412_v45  ;;  %v2417_v52 = vrot.slane %v2404_v48, %v2416_v20  ;;  %v2421_v58 = vrot.slane %v2404_v48, %v2420_v40 }
 0x9cb   : > { %v2425_v21 = vrot.slane %v2404_v48, %v2424_v57  ;;  %v2429_v3 = vrot.slane %v2404_v48, %v2428_v62  ;;  %v2433_v8 = vrot.slane %v2404_v48, %v2432_v1  ;;  %v2437_v13 = vrot.slane %v2404_v48, %v2436_v7 }
 0x9cc   : > { %v2446_v53 = vsub.f32 %v2323_v18, %v2409_v49  ;;  %v2447_v55 = vsub.f32 %v2326_v25, %v2413_v51  ;;  %v2448_v59 = vsub.f32 %v2329_v15, %v2417_v52  ;;  %v2449_v22 = vsub.f32 %v2332_v26, %v2421_v58 }
 0x9cd   : > { %v2450_v4 = vsub.f32 %v2335_v47, %v2425_v21  ;;  %v2451_v10 = vsub.f32 %v2338_v35, %v2429_v3  ;;  %v2452_v18 = vsub.f32 %v2341_v56, %v2433_v8  ;;  %v2453_v39 = vsub.f32 %v2344_v42, %v2437_v13 }
 0x9ce   : > { %v2454_v60 = vmul.f32 1.442695, %v2446_v53  ;;  %v2456_v61 = vmul.f32 1.442695, %v2447_v55  ;;  %v2458_v0 = vmul.f32 1.442695, %v2448_v59 }
 0x9cf   : > { %v2460_v5 = vmul.f32 1.442695, %v2449_v22  ;;  %v2462_v14 = vmul.f32 1.442695, %v2450_v4  ;;  %v2464_v25 = vmul.f32 1.442695, %v2451_v10 }
 0x9d0   : > { %3373 = vpow2.f32 %v2454_v60  ;;  %v2466_v26 = vmul.f32 1.442695, %v2452_v18  ;;  %v2468_v50 = vmul.f32 1.442695, %v2453_v39 }
 0x9d1   : > { %3375 = vpow2.f32 %v2456_v61 }
 0x9d2   : > { %3377 = vpow2.f32 %v2458_v0 }
 0x9d3   : > { %3379 = vpow2.f32 %v2460_v5 }
 0x9d4   : > { %3381 = vpow2.f32 %v2462_v14 }
 0x9d5   : > { %3383 = vpow2.f32 %v2464_v25 }
 0x9d6   : > { %3385 = vpow2.f32 %v2466_v26 }
 0x9d7   : > { %3387 = vpow2.f32 %v2468_v50 }
 0x9da   : > { %v3374_v15 = vpop.eup %3373 }
 0x9db   : > { %v3376_v16 = vpop.eup %3375  ;;  %2479 = vperm.xlu0 %3283, %v3374_v15  }
 0x9dc   : > { %2482 = vperm.xlu1 %3284, %v3376_v16   ;;  %v3378_v34 = vpop.eup %3377 }
 0x9dd   : > { %v3380_v38 = vpop.eup %3379 }
 0x9de   : > { %v3382_v29 = vpop.eup %3381 }
 0x9df   : > { %v3384_v47 = vpop.eup %3383 }
 0x9e0   : > { %2485 = vperm.xlu1 %3284, %v3378_v34   ;;  %v3386_v54 = vpop.eup %3385 }
 0x9e1   : > { %v3388_v32 = vpop.eup %3387 }
 0x9e4   : > { %2488 = vperm.xlu1 %3284, %v3380_v38  }
 0x9e8   : > { %2491 = vperm.xlu1 %3284, %v3382_v29  }
 0x9ec   : > { %2494 = vperm.xlu1 %3284, %v3384_v47  }
 0x9f0   : > { %2497 = vperm.xlu1 %3284, %v3386_v54  }
 0x9f4   : > { %2500 = vperm.xlu1 %3284, %v3388_v32  }
 0xa5a   : > { %v2480_v56 = vpop.permute.xlu0 %2479 }
 0xa5b   : > { %v2483_v33 = vpop.permute.xlu1 %2482  ;;  %v2505_v42 = vrot.slane %v2480_v56, %v4117_v63 }
 0xa5c   : > { %v2509_v2 = vrot.slane %v2483_v33, %v4117_v63 }
 0xa5e   : > { %v2534_v12 = vsel %vm2387_vm5, %v2509_v2, %v2505_v42 }
 0xa5f   : > { %v2486_v35 = vpop.permute.xlu1 %2485 }
 0xa60   : > { %v2513_v43 = vrot.slane %v2486_v35, %v4117_v63 }
 0xa62   : > { %v2535_v49 = vsel %vm2389_vm6, %v2513_v43, %v2534_v12 }
 0xa63   : > { %v2489_v36 = vpop.permute.xlu1 %2488 }
 0xa64   : > { %v2517_v44 = vrot.slane %v2489_v36, %v4117_v63 }
 0xa66   : > { %v2536_v52 = vsel %vm2391_vm7, %v2517_v44, %v2535_v49 }
 0xa67   : > { %v2492_v37 = vpop.permute.xlu1 %2491 }
 0xa68   : > { %v2521_v46 = vrot.slane %v2492_v37, %v4117_v63 }
 0xa6a   : > { %v2537_v53 = vsel %vm2393_vm8, %v2521_v46, %v2536_v52 }
 0xa6b   : > { %v2495_v41 = vpop.permute.xlu1 %2494 }
 0xa6c   : > { %v2525_v48 = vrot.slane %v2495_v41, %v4117_v63 }
 0xa6e   : > { %v2538_v58 = vsel %vm2395_vm9, %v2525_v48, %v2537_v53 }
 0xa6f   : > { %v2498_v19 = vpop.permute.xlu1 %2497 }
 0xa70   : > { %v2529_v51 = vrot.slane %v2498_v19, %v4117_v63 }
 0xa72   : > { %v2539_v60 = vsel %vm2397_vm10, %v2529_v51, %v2538_v58 }
 0xa73   : > { %v2501_v55 = vpop.permute.xlu1 %2500 }
 0xa74   : > { %v2533_v59 = vrot.slane %v2501_v55, %v4117_v63 }
 0xa76   : > { %v2540_v61 = vsel %vm2399_vm11, %v2533_v59, %v2539_v60 }
 0xa77   : > { %v2542_v21 = vsel %vm784_vm3, %v2540_v61, 0.0 }
 0xa78   : > { %2543 = vadd.xlane.f32.xlu1 %v2542_v21 }
 0xb05   : > { %v2544_v22 = vpop.xlane.xlu1 %2543 }
 0xb06   : > { %3389 = vrcp.f32 %v2544_v22 }
 0xb10   : > { %v3390_v0 = vpop.eup %3389 }
 0xb11   : > { %v2550_v3 = vrot.slane %v3390_v0, %v2408_v6  ;;  %v2554_v5 = vrot.slane %v3390_v0, %v2412_v45  ;;  %v2558_v63 = vrot.slane %v3390_v0, %v2416_v20  ;;  %v2562_v14 = vrot.slane %v3390_v0, %v2420_v40 }
 0xb12   : > { %v2566_v18 = vrot.slane %v3390_v0, %v2424_v57  ;;  %v2570_v45 = vrot.slane %v3390_v0, %v2428_v62  ;;  %v2574_v20 = vrot.slane %v3390_v0, %v2432_v1  ;;  %v2578_v40 = vrot.slane %v3390_v0, %v2436_v7 }
 0xb13   : > { %v2587_v4 = vmul.f32 %v3374_v15, %v2550_v3  ;;  %v2588_v8 = vmul.f32 %v3376_v16, %v2554_v5  ;;  %v2589_v10 = vmul.f32 %v3378_v34, %v2558_v63  ;;  %v2590_v13 = vmul.f32 %v3380_v38, %v2562_v14 }
 0xb14   : > { %v2591_v6 = vmul.f32 %v3382_v29, %v2566_v18  ;;  %v2592_v15 = vmul.f32 %v3384_v47, %v2570_v45  ;;  %v2593_v16 = vmul.f32 %v3386_v54, %v2574_v20  ;;  %v2594_v25 = vmul.f32 %v3388_v32, %v2578_v40 }
 0xb15   : > { %2597 = vperm.xlu0 %3283, %v2587_v4  }
 0xb19   : > { %2602 = vperm.xlu0 %3283, %v2588_v8  }
 0xb1d   : > { %2607 = vperm.xlu0 %3283, %v2589_v10  }
 0xb21   : > { %2612 = vperm.xlu0 %3283, %v2590_v13  }
 0xb25   : > { %2617 = vperm.xlu0 %3283, %v2591_v6  }
 0xb29   : > { %2622 = vperm.xlu0 %3283, %v2592_v15  }
 0xb2d   : > { %2627 = vperm.xlu0 %3283, %v2593_v16  }
 0xb31   : > { %2632 = vperm.xlu0 %3283, %v2594_v25  }
 0xb94   : > { %v2598_v34 = vpop.permute.xlu0 %2597 }
 0xb95   : > { %v2635_v39 = vmul.f32 %v2598_v34, %v4058_v17 }
 0xb97   : > { %v2643_v50 = vsel %vm289_vm0, %v2635_v39, 0.0 }
 0xb98   : > { %v2603_v57 = vpop.permute.xlu0 %2602  ;;  %v2644_v7 = vrot.slane %v2643_v50, 4 }
 0xb99   : > { %v2636_v26 = vmul.f32 %v2603_v57, %v4062_v23 }
 0xb9a   : > { %v2645_v23 = vadd.f32 %v2644_v7, %v2643_v50 }
 0xb9b   : > { %v2650_v62 = vsel %vm289_vm0, %v2636_v26, 0.0 }
 0xb9c   : > { %v2608_v38 = vpop.permute.xlu0 %2607  ;;  %v2651_v29 = vrot.slane %v2650_v62, 4  ;;  %v2646_v43 = vrot.slane %v2645_v23, 2 }
 0xb9d   : > { %v2637_v1 = vmul.f32 %v2608_v38, %v4069_v11 }
 0xb9e   : > { %v2652_v33 = vadd.f32 %v2651_v29, %v2650_v62  ;;  %v2647_v52 = vadd.f32 %v2646_v43, %v2645_v23 }
 0xb9f   : > { %v2657_v9 = vsel %vm289_vm0, %v2637_v1, 0.0 }
 0xba0   : > { %v2658_v47 = vrot.slane %v2657_v9, 4  ;;  %v2613_v54 = vpop.permute.xlu0 %2612  ;;  %v2653_v41 = vrot.slane %v2652_v33, 2  ;;  %v2648_v3 = vrot.slane %v2647_v52, 1 }
 0xba1   : > { %v2638_v32 = vmul.f32 %v2613_v54, %v4073_v24 }
 0xba2   : > { %v2659_v35 = vadd.f32 %v2658_v47, %v2657_v9  ;;  %v2654_v12 = vadd.f32 %v2653_v41, %v2652_v33  ;;  %v2649_v45 = vadd.f32 %v2648_v3, %v2647_v52 }
 0xba3   : > { %v2664_v17 = vsel %vm289_vm0, %v2638_v32, 0.0 }
 0xba4   : > { %v2665_v36 = vrot.slane %v2664_v17, 4  ;;  %v2618_v37 = vpop.permute.xlu0 %2617  ;;  %v2660_v11 = vrot.slane %v2659_v35, 2  ;;  %v2655_v60 = vrot.slane %v2654_v12, 1  ;;  %v2922_v38 = vpack.c.bf16 %v2649_v45, %v2649_v45 }
 0xba5   : > { %v2639_v56 = vmul.f32 %v2618_v37, %v4080_v27 }
 0xba6   : > { %v2666_v2 = vadd.f32 %v2665_v36, %v2664_v17  ;;  %v2661_v49 = vadd.f32 %v2660_v11, %v2659_v35  ;;  %v2656_v14 = vadd.f32 %v2655_v60, %v2654_v12  ;;  %v2731_v33 = vunpack.c.l.b16 %v2922_v38 }
 0xba7   : > { %v2671_v42 = vsel %vm289_vm0, %v2639_v56, 0.0 }
 0xba8   : > { %v2667_v44 = vrot.slane %v2666_v2, 2  ;;  %v2672_v46 = vrot.slane %v2671_v42, 4  ;;  %v2623_v19 = vpop.permute.xlu0 %2622  ;;  %v2662_v21 = vrot.slane %v2661_v49, 1  ;;  %v2923_v34 = vpack.c.bf16 %v2656_v14, %v2656_v14 }
 0xba9   : > { %v2640_v24 = vmul.f32 %v2623_v19, %v4084_v28 }
 0xbaa   : > { %v2673_v48 = vadd.f32 %v2672_v46, %v2671_v42  ;;  %v2668_v53 = vadd.f32 %v2667_v44, %v2666_v2  ;;  %v2663_v18 = vadd.f32 %v2662_v21, %v2661_v49  ;;  %v2732_v9 = vunpack.c.l.b16 %v2923_v34 }
 0xbab   : > { %v2678_v51 = vsel %vm289_vm0, %v2640_v24, 0.0 }
 0xbac   : > { %v2674_v55 = vrot.slane %v2673_v48, 2  ;;  %v2628_v27 = vpop.permute.xlu0 %2627  ;;  %v2679_v58 = vrot.slane %v2678_v51, 4  ;;  %v2669_v28 = vrot.slane %v2668_v53, 1  ;;  %v2924_v26 = vpack.c.bf16 %v2663_v18, %v2663_v18 }
 0xbad   : > { %v2641_v59 = vmul.f32 %v2628_v27, %v4091_v30  ;;  %v2739_v37 = vsel %vm2387_vm5, %v2732_v9, %v2731_v33 }
 0xbae   : > { %v2675_v61 = vadd.f32 %v2674_v55, %v2673_v48  ;;  %v2680_v22 = vadd.f32 %v2679_v58, %v2678_v51  ;;  %v2670_v15 = vadd.f32 %v2669_v28, %v2668_v53  ;;  %v2733_v32 = vunpack.c.l.b16 %v2924_v26 }
 0xbaf   : > { %v2685_v0 = vsel %vm289_vm0, %v2641_v59, 0.0 }
 0xbb0   : > { %v2686_v4 = vrot.slane %v2685_v0, 4  ;;  %v2633_v5 = vpop.permute.xlu0 %2632  ;;  %v2676_v8 = vrot.slane %v2675_v61, 1  ;;  %v2681_v63 = vrot.slane %v2680_v22, 2  ;;  %v2740_v2 = vsel %vm2389_vm6, %v2733_v32, %v2739_v37 }
 0xbb1   : > { %v2642_v10 = vmul.f32 %v2633_v5, %v4095_v31  ;;  %v2925_v31 = vpack.c.bf16 %v2670_v15, %v2670_v15 }
 0xbb2   : > { %v2687_v13 = vadd.f32 %v2686_v4, %v2685_v0  ;;  %v2682_v6 = vadd.f32 %v2681_v63, %v2680_v22  ;;  %v2677_v40 = vadd.f32 %v2676_v8, %v2675_v61 }
 0xbb3   : > { %v2692_v30 = vsel %vm289_vm0, %v2642_v10, 0.0  ;;  %v2734_v35 = vunpack.c.l.b16 %v2925_v31 }
 0xbb4   : > { %v2688_v20 = vrot.slane %v2687_v13, 2  ;;  %v2693_v16 = vrot.slane %v2692_v30, 4  ;;  %v2683_v25 = vrot.slane %v2682_v6, 1  ;;  %v2926_v29 = vpack.c.bf16 %v2677_v40, %v2677_v40 }
 0xbb5   : > { %v2741_v42 = vsel %vm2391_vm7, %v2734_v35, %v2740_v2 }
 0xbb6   : > { %v2689_v57 = vadd.f32 %v2688_v20, %v2687_v13  ;;  %v2694_v39 = vadd.f32 %v2693_v16, %v2692_v30  ;;  %v2684_v62 = vadd.f32 %v2683_v25, %v2682_v6  ;;  %v2735_v36 = vunpack.c.l.b16 %v2926_v29 }
 0xbb8   : > { %v2690_v50 = vrot.slane %v2689_v57, 1  ;;  %v2695_v1 = vrot.slane %v2694_v39, 2  ;;  %v2927_v7 = vpack.c.bf16 %v2684_v62, %v2684_v62  ;;  %v2742_v44 = vsel %vm2393_vm8, %v2735_v36, %v2741_v42 }
 0xbba   : > { %v2691_v47 = vadd.f32 %v2690_v50, %v2689_v57  ;;  %v2696_v54 = vadd.f32 %v2695_v1, %v2694_v39  ;;  %v2736_v56 = vunpack.c.l.b16 %v2927_v7 }
 0xbbc   : > { %v2928_v17 = vpack.c.bf16 %v2691_v47, %v2691_v47  ;;  %v2697_v23 = vrot.slane %v2696_v54, 1  ;;  %v2743_v46 = vsel %vm2395_vm9, %v2736_v56, %v2742_v44 }
 0xbbe   : > { %v2698_v41 = vadd.f32 %v2697_v23, %v2696_v54  ;;  %v2737_v11 = vunpack.c.l.b16 %v2928_v17 }
 0xbc0   : > { %v2929_v43 = vpack.c.bf16 %v2698_v41, %v2698_v41  ;;  %v2744_v24 = vsel %vm2397_vm10, %v2737_v11, %v2743_v46 }
 0xbc2   : > { %v2738_v19 = vunpack.c.l.b16 %v2929_v43 }
 0xbc4   : > { %v2745_v12 = vsel %vm2399_vm11, %v2738_v19, %v2744_v24 }
 0xbc5   : > { %v2746_v48 = vpack.c.b16 %v2745_v12, %v2745_v12 }
 0xbc7   : > { %2749 = vst.msk [vmem:[%s242_s8] sm:$0xf] %vm2748_vm12, %v2746_v48 }
 0xbc8   : > { %3434 = shalt.err (!%p3431_p2)
}
 0xbc9   : > { %s3435_s23 = scalar_lea.hbm %s4219_s11, 64  ;;  %s3439_s12 = scalar_lea.hbm %s4268_s5, 128 }
 0xbca   : > { %p3436_p4 = scmp.ne.s32.totalorder %s4219_s11, %s3435_s23  ;;  %p3440_p9 = scmp.lt.u32.totalorder %s4219_s11, %s4268_s5 }
 0xbcb   : > { %p3441_p1 = scmp.lt.u32.totalorder %s3439_s12, %s3435_s23  ;;  %p3443_p6 = scmp.lt.u32.totalorder %s3435_s23, %s4219_s11 }
 0xbcc   : > { %p3437_p5 = pnand %p3436_p4, %p4275_p11 }
 0xbcd   : > { %p3442_p3 = por %p3441_p1, %p3440_p9 }
 0xbce   : > { %p3438_p7 = pneg %p3437_p5 }
 0xbcf   : > { %p3444_p12 = por %p3443_p6, %p3442_p3 }
 0xbd1   : > { %p3445_p13 = pnand %p3444_p12, %p3438_p7 }
 0xbd3   : > { %3448 = shalt.err (!%p3445_p13)
}
 0xbd4   : > { %3228 = dma.vmem_to_hbm [thread:$0]  (%p4275_p11), %s4221_s7, 64, %s4219_s11, %s2751_s22  }
 0xbd5 PF: > { %s2776_s29 = sand.u32 1, %s3475_s18   ;;  %p4276_p8 = scmp.ne.s32.totalorder %s4273_s6, 0 }
 0xbd6   : > { %p4277_p10 = scmp.ge.s32.totalorder %s3487_s21, 2  ;;  %s2777_s8 = scalar_lea.sflag [#allocation4], %s2776_s29 }
 0xbd8   : > { %p3235_p0 = pnand %p4277_p10, %p4276_p8 }
 0xbda   : > { %3470 = dma.done.wait (!%p3235_p0), %s2777_s8, 64  }
 0xbdb   : > { %3472 = vsyncadd (!%p3235_p0), %s2777_s8, 4294967232  ;;  %p18_p2 = scmp.ge.s32.totalorder %s3557_s24, 4   ;;  %s4278_s18 = smov %s3479_s19 }
 0xbdc   : > { %s4279_s19 = smov %s3483_s20  ;;  %s4280_s20 = smov %s3569_s27 }
 0xbdd   : > { %s4281_s21 = smov %s3557_s24  ;;  %20 = sbr.rel (!%p18_p2) target bundleno = 5 (0x5), region = 85 }
 0xbe4   :  { %2782 = vsyncpa [#allocation3], 1 }
 0xbe5   :  { %2784 = vsyncpa [#allocation3 + $0x1], 1 }
 0xbe6   :  { %2785 = vsyncpa [#allocation4], 1 }
 0xbe7   :  { %2787 = vsyncpa [#allocation4 + $0x1], 1 }

// kernel: tpu_custom_call.1
= control target key start
LH: loop header
LB: loop body
LE: loop exit
PB: predicated region body
PF: predicated region fallthrough
CT: control target
= control target key end

     0   :  { %10 = vsyncpa [#allocation3], 0  ;;  %s4263_s0 = inlined_call_operand.hbm [shape: bf16[16,8,32], index: 0, kind: input, shape index: {}]   ;;  %s4264_s1 = inlined_call_operand.vmem [shape: bf16[32,96], index: 1, kind: input, shape index: {}]   ;;  %s4265_s2 = inlined_call_operand.vmem [shape: bf16[32,16], index: 2, kind: input, shape index: {}]   ;;  %s4266_s3 = inlined_call_operand.vmem [shape: f32[1,16], index: 3, kind: input, shape index: {}]   ;;  %s4267_s4 = inlined_call_operand.vmem [shape: f32[1,16], index: 4, kind: input, shape index: {}]   ;;  %s4268_s5 = inlined_call_operand.hbm [shape: bf16[16,32], index: 5, kind: output, shape index: {}]  }
   0x1   :  { %12 = vsyncpa [#allocation3 + $0x1], 0 }
   0x2   :  { %13 = vsyncpa [#allocation4], 0 }
   0x3   :  { %15 = vsyncpa [#allocation4 + $0x1], 0  ;;  %s3532_s18 = smov 0   ;;  %s3534_s19 = smov 0  }
   0x4   :  { %s3536_s20 = smov 0   ;;  %s3538_s21 = smov 0  }
   0x5 LB: > { %s3553_s22 = sadd.s32 4294967295, %s3487_s21   ;;  %s2834_s23 = sadd.s32 4294967294, %s3487_s21   ;;  %s3487_s21 = sphi %s3538_s21, %s4281_s21   ;;  %s3483_s20 = sphi %s3536_s20, %s4280_s20   ;;  %s3479_s19 = sphi %s3534_s19, %s4279_s19   ;;  %s3475_s18 = sphi %s3532_s18, %s4278_s18  }
   0x6   : > { %s3557_s24 = sadd.s32 1, %s3487_s21   ;;  %s28_s25 = sadd.s32 1, %s3483_s20 }
   0x7   : > { %s25_s26 = ssub.s32 %s3487_s21, %s3557_s24  ;;  %p35_p0 = scmp.ne.s32.totalorder %s3483_s20, %s3479_s19 }
   0x8   : > { %p26_p1 = scmp.eq.s32.totalorder %s25_s26, 0  ;;  %p36_p2 = scmp.eq.s32.totalorder %s3487_s21, 0 }
   0x9   : > { %p41_p3 = scmp.ne.s32.totalorder %s3479_s19, %s3475_s18  ;;  %p42_p4 = scmp.eq.s32.totalorder %s3553_s22, 0 }
   0xa   : > { %s3569_s27 = scalar_select %p26_p1, %s3483_s20, %s28_s25  }
   0xb   : > { %p3571_p5 = por %p36_p2, %p35_p0  ;;  %p3575_p6 = por %p42_p4, %p41_p3 }
   0xc   : > { %p149_p7 = scmp.eq.s32.totalorder %s3553_s22, 1  ;;  %p155_p8 = scmp.eq.s32.totalorder %s2834_s23, 1 }
   0xd   : > { %p3238_p10 = scmp.lt.s32.totalorder %s3487_s21, 2  ;;  %s187_s7 = sand.u32 1, %s3483_s20  }
   0xe   : > { %p3582_p11 = por %p149_p7, %p35_p0  ;;  %p3586_p12 = por %p155_p8, %p41_p3 }
   0xf   : > { %s2913_s8 = sshll.u32 %s3487_s21, 9  ;;  %s2837_s9 = sshll.u32 %s187_s7, 5 }
  0x10   : > { %s4272_s30 = scalar_select %p3582_p11, 1, 0 }
  0x11   : > { %s4273_s6 = scalar_select %p3586_p12, 1, 0 }
  0x12   : > { %s3595_s12 = scalar_lea.hbm %s4263_s0, %s2913_s8  ;;  %s191_s13 = scalar_lea.vmem [#allocation2], %s2837_s9 }
  0x13   : > { %s198_s14 = sshll.u32 %s191_s13, 4  ;;  %p3599_p13 = pnand %p3238_p10, %p3571_p5  ;;  %s3603_s14 = int_to_ptr.vmem [resolvable:$true] %s198_s14 }
  0x14   : > { %s3605_s16 = scalar_lea.sflag [#allocation3], %s187_s7  ;;  %s3391_s17 = scalar_lea.hbm %s3595_s12, 512 }
  0x15   : > { %p3392_p0 = scmp.ne.s32.totalorder %s3595_s12, %s3391_s17  ;;  %p3393_p1 = pneg %p3599_p13 }
  0x16   : > { %s3396_s26 = scalar_lea.hbm %s4263_s0, 1024  ;;  %p3397_p4 = scmp.lt.u32.totalorder %s3595_s12, %s4263_s0 }
  0x17   : > { %p3394_p2 = pnand %p3393_p1, %p3392_p0  ;;  %p3398_p5 = scmp.lt.u32.totalorder %s3396_s26, %s3391_s17 }
  0x18   : > { %p3400_p8 = scmp.lt.u32.totalorder %s3391_s17, %s3595_s12 }
  0x19   : > { %p3395_p3 = pneg %p3394_p2  ;;  %p3399_p7 = por %p3398_p5, %p3397_p4 }
  0x1b   : > { %p3401_p10 = por %p3400_p8, %p3399_p7 }
  0x1d   : > { %p3402_p9 = pnand %p3401_p10, %p3395_p3 }
  0x1f   : > { %3405 = shalt.err (!%p3402_p9)
}
  0x20   : > { %s3406_s7 = scalar_lea.vmem %s3603_s14, 512  ;;  %s3489_s9 = smov [#allocation2]  }
  0x21   : > { %p3407_p0 = scmp.ne.s32.totalorder %s3603_s14, %s3406_s7  ;;  %s3411_s10 = sshll.u32 %s3489_s9, 4  ;;  %s3412_s10 = int_to_ptr.vmem [resolvable:$false] %s3411_s10 }
  0x22   : > { %s3413_s11 = scalar_lea.vmem %s3412_s10, 1024  ;;  %p3414_p11 = scmp.lt.s32.totalorder %s3603_s14, %s3412_s10 }
  0x23   : > { %p3409_p2 = pnand %p3407_p0, %p3393_p1  ;;  %p3415_p4 = scmp.lt.s32.totalorder %s3413_s11, %s3406_s7 }
  0x25   : > { %p3410_p12 = pneg %p3409_p2  ;;  %p3416_p5 = por %p3415_p4, %p3414_p11 }
  0x27   : > { %p3417_p7 = pnand %p3416_p5, %p3410_p12 }
  0x29   : > { %3420 = shalt.err (!%p3417_p7)
}
  0x2a   : > { %s3490_s13 = smov 64   ;;  %s3491_s17 = smov 4  }
  0x2b   : > { %3233 = dma.hbm_to_vmem [thread:$0]  (!%p3599_p13), %s3595_s12, 512, %s3603_s14, %s3605_s16, %s3490_s13, %s3490_s13, %s3491_s17  }
  0x2c   : > { %p2840_p9 = scmp.ge.s32.totalorder %s3487_s21, 1  ;;  %p206_p1 = scmp.lt.s32.totalorder %s3487_s21, 3 }
  0x2e   : > { %p207_p3 = pnand %p2840_p9, %p206_p1 }
  0x2f   : > { %s3636_s23 = sand.u32 (!%p207_p3), 1, %s3479_s19  }
  0x30   : > { %210 = sbr.rel (%p207_p3) target bundleno = 3029 (0xbd5), region = 40  ;;  %s2841_s25 = sshll.u32 (!%p207_p3), %s3636_s23, 5 }
  0x31   : > { %s213_s26 = scalar_lea.sflag (!%p207_p3), [#allocation3], %s3636_s23  ;;  %s216_s28 = scalar_lea.vmem (!%p207_p3), [#allocation2], %s2841_s25 }
  0x37   : > { %3466 = dma.done.wait (%p3575_p6), %s213_s26, 512  }
  0x38   : > { %3468 = vsyncadd (%p3575_p6), %s213_s26, 4294966784  ;;  %v3285_v0 = vld [vmem:[%s4264_s1] sm:$0xff]   ;;  %v3286_v1 = vld [vmem:[%s4264_s1 + $0x8] sm:$0xff]   ;;  %vm289_vm0 = vcmask 261120   ;;  %v3492_v6 = vmov 0.0   ;;  %vm3493_vm1 = vmmov 0  }
  0x39   : > { %3006 = vmatprep.subr.bf16.mxu0 %v3285_v0  ;;  %v3287_v2 = vld [vmem:[%s216_s28] sm:$0xff]   ;;  %3222 = vmatprep.subr.bf16.mxu1 %v3285_v0  ;;  %v3288_v3 = vld [vmem:[%s216_s28 + $0x8] sm:$0xff]   ;;  %v3289_v4 = vld [vmem:[%s216_s28 + $0x10] sm:$0xff]   ;;  %s3494_s29 = smov 96   ;;  %vm393_vm2 = vcmask 130048   ;;  %vm784_vm3 = vcmask 64512  }
  0x3a   : > { %3007 = vmatpush3.bf16.msra.mxu0 %v3285_v0  ;;  %3224 = vmatpush3.bf16.msra.mxu1 %v3285_v0  ;;  %v3290_v5 = vld [vmem:[%s216_s28 + $0x18] sm:$0xff]   ;;  %s3495_s8 = smov 64   ;;  %vm886_vm4 = vcmask 1043456   ;;  %s3496_s7 = smov 80   ;;  %vm2387_vm5 = vcmask 1041409   ;;  %vm2389_vm6 = vcmask 1042434  }
  0x3b   : > { %3008 = vmatprep.subr.bf16.mxu0 %v3286_v1  ;;  %3010 = vmatprep.mubr.msk.bf16.mxu0 %vm289_vm0, %v3287_v2  ;;  %s3497_s9 = smov 112   ;;  %s3498_s10 = smov 48   ;;  %vm2391_vm7 = vcmask 1043459   ;;  %vm2393_vm8 = vcmask 1044484   ;;  %vm2395_vm9 = vcmask 1045509   ;;  %vm2397_vm10 = vcmask 1046534  }
  0x3c   : > { %3223 = vmatprep.subr.bf16.mxu1 %v3286_v1  ;;  %3014 = vmatprep.mubr.msk.bf16.mxu1 %vm289_vm0, %v3289_v4  ;;  %s3499_s17 = smov 16   ;;  %vm2399_vm11 = vcmask 1047559   ;;  %s2842_s16 = sshll.u32 %s3636_s23, 2  ;;  %vm2748_vm12 = vcmask 257024  }
  0x3d   : > { %p4275_p11 = scmp.ne.s32.totalorder %s4272_s30, 0 }
  0x3e   : > { %3009 = vmatpush3.bf16.msra.mxu0 %v3286_v1  ;;  %3225 = vmatpush3.bf16.msra.mxu1 %v3286_v1 }
  0x3f   : > { %3030 = vmatprep.subr.bf16.mxu0 %v3492_v6  ;;  %3018 = vmatprep.subr.bf16.mxu1 %v3492_v6 }
  0x41   : > { %3011 = vmatmul.mubr.msk.bf16.vlgmr.msra.gmra.mrb[0].mxu0 %vm289_vm0, %v3288_v3  ;;  %3015 = vmatmul.mubr.msk.bf16.vlgmr.msra.gmra.mrb[0].mxu1 %vm289_vm0, %v3290_v5 }
  0x42   : > { %3032 = vmatprep.mubr.msk.bf16.mxu0 %vm3493_vm1, %v3492_v6  ;;  %3020 = vmatprep.mubr.msk.bf16.mxu1 %vm3493_vm1, %v3492_v6 }
 0x114   : > { %v3012_v7 = vpop.f32.mrb[0].mxu0  ;;  %v3016_v8 = vpop.f32.mrb[0].mxu1 }
 0x115   : > { %v3660_v9 = vpack.c.bf16 %v3012_v7, %v3012_v7  ;;  %v336_v10 = vpop.f32.mrb[1].mxu0  ;;  %v352_v11 = vpop.f32.mrb[1].mxu1  ;;  %v3679_v22 = vpack.c.bf16 %v3016_v8, %v3016_v8 }
 0x116   : > { %v3662_v12 = vpack.c.bf16 %v336_v10, %v336_v10  ;;  %v3013_v13 = vpop.f32.mrb[2].mxu0  ;;  %v3017_v14 = vpop.f32.mrb[2].mxu1  ;;  %v3674_v20 = vpack.c.bf16 %v352_v11, %v352_v11 }
 0x117   : > { %488 = vrot.lane.b32.xlu1 %v3660_v9, %s3494_s29  ;;  %v339_v15 = vpop.f32.mrb[3].mxu0  ;;  %v355_v16 = vpop.f32.mrb[3].mxu1  ;;  %v3666_v17 = vpack.c.bf16 %v3013_v13, %v3013_v13  ;;  %v3676_v21 = vpack.c.bf16 %v3017_v14, %v3017_v14 }
 0x118   : > { %391 = vrot.lane.b32.xlu0 %v3662_v12, %s3494_s29  ;;  %v3668_v18 = vpack.c.bf16 %v339_v15, %v339_v15  ;;  %v3671_v19 = vpack.c.bf16 %v355_v16, %v355_v16 }
 0x11b   : > { %536 = vrot.lane.b32.xlu1 %v3666_v17, %s3494_s29 }
 0x11c   : > { %440 = vrot.lane.b32.xlu0 %v3668_v18, %s3494_s29 }
 0x11f   : > { %632 = vrot.lane.b32.xlu1 %v3671_v19, %s3494_s29 }
 0x120   : > { %584 = vrot.lane.b32.xlu0 %v3674_v20, %s3494_s29 }
 0x123   : > { %728 = vrot.lane.b32.xlu1 %v3676_v21, %s3494_s29 }
 0x124   : > { %680 = vrot.lane.b32.xlu0 %v3679_v22, %s3494_s29  ;;  %s2910_s29 = sshll.u32 %s3553_s22, 6  ;;  %s2751_s22 = scalar_lea.sflag [#allocation4], %s3636_s23 }
 0x125   : > { %s4219_s11 = scalar_lea.hbm %s4268_s5, %s2910_s29 }
 0x189   : > { %v489_v23 = vpop.permute.xlu1 %488 }
 0x18a   : > { %v494_v24 = vsel %vm393_vm2, %v489_v23, 0  ;;  %v392_v25 = vpop.permute.xlu0 %391 }
 0x18b   : > { %v398_v26 = vsel %vm393_vm2, %v392_v25, 0  ;;  %3031 = vmatpush3.bf16.xpose.msra.mxu0 %v494_v24 }
 0x18c   : > { %3019 = vmatpush3.bf16.xpose.msra.mxu1 %v398_v26  ;;  %3042 = vmatprep.subr.bf16.mxu0 %v3492_v6 }
 0x18d   : > { %3024 = vmatprep.subr.bf16.mxu1 %v3492_v6  ;;  %v537_v32 = vpop.permute.xlu1 %536 }
 0x18e   : > { %v441_v27 = vpop.permute.xlu0 %440  ;;  %v542_v34 = vsel %vm393_vm2, %v537_v32, 0 }
 0x18f   : > { %v446_v29 = vsel %vm393_vm2, %v441_v27, 0 }
 0x191   : > { %v633_v35 = vpop.permute.xlu1 %632 }
 0x192   : > { %3033 = vmatmul.mubr.msk.bf16.vlgmr.msra.gmra.mrb[4].mxu0 %vm393_vm2, %v3660_v9  ;;  %v585_v28 = vpop.permute.xlu0 %584  ;;  %v638_v36 = vsel %vm393_vm2, %v633_v35, 0 }
 0x193   : > { %v590_v30 = vsel %vm393_vm2, %v585_v28, 0  ;;  %3021 = vmatmul.mubr.msk.bf16.vlgmr.msra.gmra.mrb[4].mxu1 %vm393_vm2, %v3662_v12  ;;  %3044 = vmatprep.mubr.msk.bf16.mxu0 %vm3493_vm1, %v3492_v6 }
 0x194   : > { %3025 = vmatpush3.bf16.xpose.msra.mxu1 %v446_v29  ;;  %3043 = vmatpush3.bf16.xpose.msra.mxu0 %v590_v30 }
 0x195   : > { %3026 = vmatprep.mubr.msk.bf16.mxu1 %vm3493_vm1, %v3492_v6  ;;  %3036 = vmatprep.subr.bf16.mxu1 %v3492_v6  ;;  %v729_v37 = vpop.permute.xlu1 %728 }
 0x196   : > { %v681_v31 = vpop.permute.xlu0 %680  ;;  %3054 = vmatprep.subr.bf16.mxu0 %v3492_v6  ;;  %v734_v38 = vsel %vm393_vm2, %v729_v37, 0 }
 0x197   : > { %v686_v33 = vsel %vm393_vm2, %v681_v31, 0 }
 0x19b   : > { %3027 = vmatmul.mubr.msk.bf16.vlgmr.msra.gmra.mrb[8].mxu1 %vm393_vm2, %v3668_v18  ;;  %3045 = vmatmul.mubr.msk.bf16.vlgmr.msra.gmra.mrb[8].mxu0 %vm393_vm2, %v3674_v20 }
 0x19c   : > { %3037 = vmatpush3.bf16.xpose.msra.mxu1 %v542_v34  ;;  %3055 = vmatpush3.bf16.xpose.msra.mxu0 %v686_v33 }
 0x19d   : > { %3038 = vmatprep.mubr.msk.bf16.mxu1 %vm3493_vm1, %v3492_v6  ;;  %3056 = vmatprep.mubr.msk.bf16.mxu0 %vm3493_vm1, %v3492_v6 }
 0x19e   : > { %3048 = vmatprep.subr.bf16.mxu1 %v3492_v6  ;;  %3066 = vmatprep.subr.bf16.mxu0 %v3492_v6 }
 0x1a3   : > { %3039 = vmatmul.mubr.msk.bf16.vlgmr.msra.gmra.mrb[12].mxu1 %vm393_vm2, %v3666_v17  ;;  %3057 = vmatmul.mubr.msk.bf16.vlgmr.msra.gmra.mrb[12].mxu0 %vm393_vm2, %v3679_v22 }
 0x1a4   : > { %3049 = vmatpush3.bf16.xpose.msra.mxu1 %v638_v36  ;;  %3050 = vmatprep.mubr.msk.bf16.mxu1 %vm3493_vm1, %v3492_v6 }
 0x1a5   : > { %3060 = vmatprep.subr.bf16.mxu1 %v3492_v6  ;;  %3068 = vmatprep.mubr.msk.bf16.mxu0 %vm3493_vm1, %v3492_v6 }
 0x1ab   : > { %3051 = vmatmul.mubr.msk.bf16.vlgmr.msra.gmra.mrb[16].mxu1 %vm393_vm2, %v3671_v19 }
 0x1ac   : > { %3061 = vmatpush3.bf16.xpose.msra.mxu1 %v734_v38  ;;  %3062 = vmatprep.mubr.msk.bf16.mxu1 %vm3493_vm1, %v3492_v6 }
 0x1ad   : > { %3072 = vmatprep.subr.bf16.mxu1 %v3492_v6 }
 0x1b3   : > { %3063 = vmatmul.mubr.msk.bf16.vlgmr.msra.gmra.mrb[20].mxu1 %vm393_vm2, %v3676_v21 }
 0x1b4   : > { %3074 = vmatprep.mubr.msk.bf16.mxu1 %vm3493_vm1, %v3492_v6 }
 0x265   : > { %v530_v39 = vpop.f32.mrb[4].mxu0 }
 0x266   : > { %v3732_v40 = vmul.f32 0.25, %v530_v39  ;;  %v434_v41 = vpop.f32.mrb[4].mxu1  ;;  %v3034_v42 = vpop.f32.mrb[5].mxu0 }
 0x267   : > { %v3022_v43 = vpop.f32.mrb[5].mxu1  ;;  %v533_v44 = vpop.f32.mrb[6].mxu0  ;;  %v3734_v45 = vmul.f32 0.25, %v434_v41 }
 0x268   : > { %v437_v46 = vpop.f32.mrb[6].mxu1  ;;  %v3035_v47 = vpop.f32.mrb[7].mxu0  ;;  %v791_v48 = vsel %vm784_vm3, %v3732_v40, -inf }
 0x269   : > { %v3023_v49 = vpop.f32.mrb[7].mxu1  ;;  %792 = vmax.xlane.f32.xlu0 %v791_v48  ;;  %v785_v50 = vsel %vm784_vm3, %v3734_v45, -inf }
 0x26d   : > { %786 = vmax.xlane.f32.xlu0 %v785_v50 }
 0x26e   : > { %v482_v51 = vpop.f32.mrb[8].mxu1  ;;  %v626_v52 = vpop.f32.mrb[8].mxu0 }
 0x26f   : > { %v780_v53 = vmul.f32 0.25, %v626_v52  ;;  %v3028_v54 = vpop.f32.mrb[9].mxu1  ;;  %v3046_v55 = vpop.f32.mrb[9].mxu0  ;;  %v777_v58 = vmul.f32 0.25, %v482_v51 }
 0x270   : > { %v485_v56 = vpop.f32.mrb[10].mxu1  ;;  %v629_v57 = vpop.f32.mrb[10].mxu0 }
 0x271   : > { %v3029_v59 = vpop.f32.mrb[11].mxu1  ;;  %v3047_v60 = vpop.f32.mrb[11].mxu0  ;;  %v797_v61 = vsel %vm784_vm3, %v780_v53, -inf  ;;  %v788_v62 = vsel %vm784_vm3, %v777_v58, -inf }
 0x272   : > { %798 = vmax.xlane.f32.xlu1 %v797_v61 }
 0x276   : > { %v578_v63 = vpop.f32.mrb[12].mxu1  ;;  %789 = vmax.xlane.f32.xlu1 %v788_v62  ;;  %v722_v0 = vpop.f32.mrb[12].mxu0 }
 0x277   : > { %v3040_v1 = vpop.f32.mrb[13].mxu1  ;;  %v3058_v2 = vpop.f32.mrb[13].mxu0  ;;  %v779_v24 = vmul.f32 0.25, %v578_v63  ;;  %v782_v29 = vmul.f32 0.25, %v722_v0 }
 0x278   : > { %v581_v3 = vpop.f32.mrb[14].mxu1  ;;  %v725_v4 = vpop.f32.mrb[14].mxu0 }
 0x279   : > { %v3041_v5 = vpop.f32.mrb[15].mxu1  ;;  %v3059_v7 = vpop.f32.mrb[15].mxu0  ;;  %v794_v26 = vsel %vm784_vm3, %v779_v24, -inf  ;;  %v803_v31 = vsel %vm784_vm3, %v782_v29, -inf }
 0x27e   : > { %v674_v8 = vpop.f32.mrb[16].mxu1 }
 0x27f   : > { %v3052_v10 = vpop.f32.mrb[17].mxu1  ;;  %v781_v25 = vmul.f32 0.25, %v674_v8 }
 0x280   : > { %v677_v11 = vpop.f32.mrb[18].mxu1 }
 0x281   : > { %v3053_v13 = vpop.f32.mrb[19].mxu1  ;;  %v800_v28 = vsel %vm784_vm3, %v781_v25, -inf }
 0x283   : > { %930 = vrot.lane.b32.xlu0 %v3668_v18, %s3495_s8 }
 0x286   : > { %v770_v14 = vpop.f32.mrb[20].mxu1 }
 0x287   : > { %v3064_v15 = vpop.f32.mrb[21].mxu1  ;;  %881 = vrot.lane.b32.xlu1 %v3662_v12, %s3495_s8  ;;  %v3747_v27 = vmul.f32 0.25, %v770_v14 }
 0x288   : > { %v773_v16 = vpop.f32.mrb[22].mxu1 }
 0x289   : > { %v3065_v23 = vpop.f32.mrb[23].mxu1  ;;  %v806_v30 = vsel %vm784_vm3, %v3747_v27, -inf }
 0x2a2   : > { %795 = vmax.xlane.f32.xlu0 %v794_v26 }
 0x2a6   : > { %801 = vmax.xlane.f32.xlu0 %v800_v28 }
 0x2aa   : > { %807 = vmax.xlane.f32.xlu0 %v806_v30 }
 0x2ab   : > { %804 = vmax.xlane.f32.xlu1 %v803_v31 }
 0x2bc   : > { %978 = vrot.lane.b32.xlu1 %v3660_v9, %s3495_s8 }
 0x2c0   : > { %1074 = vrot.lane.b32.xlu0 %v3674_v20, %s3495_s8  ;;  %1026 = vrot.lane.b32.xlu1 %v3666_v17, %s3495_s8 }
 0x2c4   : > { %1122 = vrot.lane.b32.xlu1 %v3671_v19, %s3495_s8 }
 0x2f6   : > { %v793_v32 = vpop.xlane.xlu0 %792 }
 0x2f7   : > { %v811_v33 = vsub.f32 %v3732_v40, %v793_v32 }
 0x2f9   : > { %v821_v34 = vmul.f32 1.442695, %v811_v33 }
 0x2fa   : > { %v787_v35 = vpop.xlane.xlu0 %786 }
 0x2fb   : > { %3293 = vpow2.f32 %v821_v34  ;;  %v809_v36 = vsub.f32 %v3734_v45, %v787_v35 }
 0x2fd   : > { %v817_v37 = vmul.f32 1.442695, %v809_v36 }
 0x2fe   : > { %v931_v38 = vpop.permute.xlu0 %930 }
 0x2ff   : > { %3295 = vpow2.f32 %v817_v37  ;;  %v936_v39 = vsel %vm886_vm4, %v931_v38, 0  ;;  %v799_v41 = vpop.xlane.xlu1 %798 }
 0x300   : > { %v813_v42 = vsub.f32 %v780_v53, %v799_v41  ;;  %3073 = vmatpush3.bf16.msra.mxu1 %v936_v39 }
 0x301   : > { %3084 = vmatprep.subr.bf16.mxu1 %v3492_v6 }
 0x302   : > { %v825_v43 = vmul.f32 1.442695, %v813_v42 }
 0x303   : > { %v790_v44 = vpop.xlane.xlu1 %789 }
 0x304   : > { %3297 = vpow2.f32 %v825_v43  ;;  %v810_v40 = vsub.f32 %v777_v58, %v790_v44 }
 0x305   : > { %v3765_v46 = vpop.eup %3293 }
 0x306   : > { %v819_v47 = vmul.f32 1.442695, %v810_v40  ;;  %v839_v45 = vsel %vm784_vm3, %v3765_v46, 0.0 }
 0x307   : > { %v882_v48 = vpop.permute.xlu1 %881  ;;  %840 = vadd.xlane.f32.xlu1 %v839_v45 }
 0x308   : > { %3299 = vpow2.f32 %v819_v47  ;;  %v888_v49 = vsel %vm886_vm4, %v882_v48, 0 }
 0x309   : > { %v3770_v50 = vpop.eup %3295  ;;  %3067 = vmatpush3.bf16.msra.mxu0 %v888_v49 }
 0x30a   : > { %v833_v51 = vsel %vm784_vm3, %v3770_v50, 0.0  ;;  %3078 = vmatprep.subr.bf16.mxu0 %v3492_v6 }
 0x30b   : > { %834 = vadd.xlane.f32.xlu1 %v833_v51 }
 0x30e   : > { %v3775_v52 = vpop.eup %3297 }
 0x30f   : > { %v845_v53 = vsel %vm784_vm3, %v3775_v52, 0.0 }
 0x310   : > { %846 = vadd.xlane.f32.xlu1 %v845_v53 }
 0x312   : > { %v3779_v54 = vpop.eup %3299 }
 0x313   : > { %v836_v55 = vsel %vm784_vm3, %v3779_v54, 0.0 }
 0x314   : > { %837 = vadd.xlane.f32.xlu0 %v836_v55 }
 0x32f   : > { %v796_v56 = vpop.xlane.xlu0 %795 }
 0x330   : > { %v812_v57 = vsub.f32 %v779_v24, %v796_v56 }
 0x332   : > { %v823_v58 = vmul.f32 1.442695, %v812_v57 }
 0x333   : > { %v802_v59 = vpop.xlane.xlu0 %801 }
 0x334   : > { %3301 = vpow2.f32 %v823_v58  ;;  %v814_v60 = vsub.f32 %v781_v25, %v802_v59 }
 0x336   : > { %v827_v61 = vmul.f32 1.442695, %v814_v60 }
 0x337   : > { %v808_v8 = vpop.xlane.xlu0 %807 }
 0x338   : > { %3303 = vpow2.f32 %v827_v61  ;;  %v805_v62 = vpop.xlane.xlu1 %804  ;;  %v816_v10 = vsub.f32 %v3747_v27, %v808_v8 }
 0x339   : > { %v815_v63 = vsub.f32 %v782_v29, %v805_v62 }
 0x33a   : > { %v831_v11 = vmul.f32 1.442695, %v816_v10 }
 0x33b   : > { %v829_v0 = vmul.f32 1.442695, %v815_v63  ;;  %v1075_v26 = vpop.permute.xlu0 %1074 }
 0x33c   : > { %v979_v15 = vpop.permute.xlu1 %978  ;;  %v1080_v39 = vsel %vm886_vm4, %v1075_v26, 0 }
 0x33d   : > { %3305 = vpow2.f32 %v829_v0  ;;  %v984_v32 = vsel %vm886_vm4, %v979_v15, 0 }
 0x33e   : > { %v3783_v1 = vpop.eup %3301  ;;  %3307 = vpow2.f32 %v831_v11 }
 0x33f   : > { %v842_v2 = vsel %vm784_vm3, %v3783_v1, 0.0 }
 0x340   : > { %843 = vadd.xlane.f32.xlu0 %v842_v2  ;;  %v1027_v16 = vpop.permute.xlu1 %1026 }
 0x341   : > { %v1032_v41 = vsel %vm886_vm4, %v1027_v16, 0 }
 0x342   : > { %v3787_v3 = vpop.eup %3303 }
 0x343   : > { %v848_v4 = vsel %vm784_vm3, %v3787_v3, 0.0 }
 0x344   : > { %849 = vadd.xlane.f32.xlu0 %v848_v4  ;;  %v1123_v23 = vpop.permute.xlu1 %1122 }
 0x347   : > { %v3791_v5 = vpop.eup %3305 }
 0x348   : > { %v851_v7 = vsel %vm784_vm3, %v3791_v5, 0.0  ;;  %v3812_v13 = vpop.eup %3307 }
 0x349   : > { %852 = vadd.xlane.f32.xlu1 %v851_v7  ;;  %v854_v14 = vsel %vm784_vm3, %v3812_v13, 0.0 }
 0x35a   : > { %1218 = vrot.lane.b32.xlu1 %v3676_v21, %s3495_s8  ;;  %1170 = vrot.lane.b32.xlu0 %v3679_v22, %s3495_s8  ;;  %s242_s8 = scalar_lea.vmem [#allocation5], %s2842_s16 }
 0x35e   : > { %1318 = vrot.lane.b32.xlu1 %v3668_v18, %s3496_s7 }
 0x362   : > { %1316 = vrot.lane.b32.xlu1 %v3668_v18, %s3497_s9 }
 0x366   : > { %1418 = vrot.lane.b32.xlu1 %v3666_v17, %s3496_s7 }
 0x36a   : > { %1416 = vrot.lane.b32.xlu1 %v3666_v17, %s3497_s9 }
 0x36e   : > { %1518 = vrot.lane.b32.xlu1 %v3671_v19, %s3496_s7 }
 0x372   : > { %1516 = vrot.lane.b32.xlu1 %v3671_v19, %s3497_s9 }
 0x376   : > { %1618 = vrot.lane.b32.xlu1 %v3676_v21, %s3496_s7 }
 0x379   : > { %855 = vadd.xlane.f32.xlu0 %v854_v14 }
 0x37a   : > { %1616 = vrot.lane.b32.xlu1 %v3676_v21, %s3497_s9 }
 0x37e   : > { %1770 = vrot.lane.b32.xlu1 %v3662_v12, %s3498_s10 }
 0x38f   : > { %1268 = vrot.lane.b32.xlu0 %v3662_v12, %s3496_s7 }
 0x393   : > { %1266 = vrot.lane.b32.xlu0 %v3662_v12, %s3497_s9 }
 0x394   : > { %v841_v24 = vpop.xlane.xlu1 %840 }
 0x397   : > { %1368 = vrot.lane.b32.xlu0 %v3660_v9, %s3496_s7 }
 0x398   : > { %v835_v25 = vpop.xlane.xlu1 %834 }
 0x399   : > { %3309 = vrcp.f32 %v835_v25 }
 0x39a   : > { %3311 = vrcp.f32 %v841_v24 }
 0x39b   : > { %1366 = vrot.lane.b32.xlu0 %v3660_v9, %s3497_s9 }
 0x39d   : > { %v847_v28 = vpop.xlane.xlu1 %846 }
 0x39f   : > { %1468 = vrot.lane.b32.xlu0 %v3674_v20, %s3496_s7 }
 0x3a1   : > { %v838_v27 = vpop.xlane.xlu0 %837 }
 0x3a2   : > { %3313 = vrcp.f32 %v838_v27 }
 0x3a3   : > { %v3310_v29 = vpop.eup %3309  ;;  %1466 = vrot.lane.b32.xlu0 %v3674_v20, %s3497_s9  ;;  %3315 = vrcp.f32 %v847_v28 }
 0x3a4   : > { %v865_v12 = vmul.f32 %v3310_v29, %v3770_v50  ;;  %v3312_v31 = vpop.eup %3311 }
 0x3a5   : > { %v867_v33 = vmul.f32 %v3312_v31, %v3765_v46 }
 0x3a6   : > { %v873_v30 = vpack.c.bf16 %v865_v12, %v865_v12 }
 0x3a7   : > { %1568 = vrot.lane.b32.xlu0 %v3679_v22, %s3496_s7  ;;  %v875_v36 = vpack.c.bf16 %v867_v33, %v867_v33  ;;  %s2764_s7 = sshll.u32 %s242_s8, 4  ;;  %s4221_s7 = int_to_ptr.vmem [resolvable:$true] %s2764_s7 }
 0x3a8   : > { %3069 = vmatmul.mubr.msk.bf16.vlgmr.msra.gmra.mrb[16].mxu0 %vm784_vm3, %v873_v30  ;;  %s3421_s13 = scalar_lea.vmem %s4221_s7, 64 }
 0x3a9   : > { %3079 = vmatpush3.bf16.msra.mxu0 %v984_v32  ;;  %3080 = vmatprep.mubr.msk.bf16.mxu0 %vm3493_vm1, %v3492_v6  ;;  %p3422_p6 = scmp.ne.s32.totalorder %s4221_s7, %s3421_s13 }
 0x3aa   : > { %3090 = vmatprep.subr.bf16.mxu0 %v3492_v6 }
 0x3ab   : > { %1566 = vrot.lane.b32.xlu0 %v3679_v22, %s3497_s9  ;;  %p3423_p12 = pnand %p3422_p6, %p4275_p11 }
 0x3ac   : > { %v3314_v34 = vpop.eup %3313 }
 0x3ad   : > { %v866_v35 = vmul.f32 %v3314_v34, %v3779_v54  ;;  %v3316_v37 = vpop.eup %3315  ;;  %p3424_p13 = pneg %p3423_p12 }
 0x3ae   : > { %v869_v42 = vmul.f32 %v3316_v37, %v3775_v52  ;;  %v1128_v52 = vsel %vm886_vm4, %v1123_v23, 0 }
 0x3af   : > { %v874_v38 = vpack.c.bf16 %v866_v35, %v866_v35 }
 0x3b0   : > { %3081 = vmatmul.mubr.msk.bf16.vlgmr.msra.gmra.mrb[20].mxu0 %vm784_vm3, %v875_v36  ;;  %v877_v43 = vpack.c.bf16 %v869_v42, %v869_v42 }
 0x3b1   : > { %3091 = vmatpush3.bf16.msra.mxu0 %v1080_v39  ;;  %3075 = vmatmul.mubr.msk.bf16.vlgmr.msra.gmra.mrb[24].mxu1 %vm784_vm3, %v874_v38 }
 0x3b2   : > { %3085 = vmatpush3.bf16.msra.mxu1 %v1032_v41  ;;  %3092 = vmatprep.mubr.msk.bf16.mxu0 %vm3493_vm1, %v3492_v6 }
 0x3b3   : > { %3102 = vmatprep.subr.bf16.mxu0 %v3492_v6  ;;  %3086 = vmatprep.mubr.msk.bf16.mxu1 %vm3493_vm1, %v3492_v6 }
 0x3b4   : > { %3096 = vmatprep.subr.bf16.mxu1 %v3492_v6 }
 0x3b8   : > { %3093 = vmatmul.mubr.msk.bf16.vlgmr.msra.gmra.mrb[24].mxu0 %vm784_vm3, %v877_v43 }
 0x3b9   : > { %3104 = vmatprep.mubr.msk.bf16.mxu0 %vm3493_vm1, %v3492_v6 }
 0x3cd   : > { %v844_v44 = vpop.xlane.xlu0 %843 }
 0x3ce   : > { %3317 = vrcp.f32 %v844_v44 }
 0x3d1   : > { %v850_v40 = vpop.xlane.xlu0 %849 }
 0x3d2   : > { %3319 = vrcp.f32 %v850_v40 }
 0x3d5   : > { %v1171_v46 = vpop.permute.xlu0 %1170 }
 0x3d6   : > { %v1176_v47 = vsel %vm886_vm4, %v1171_v46, 0  ;;  %v853_v45 = vpop.xlane.xlu1 %852 }
 0x3d7   : > { %3321 = vrcp.f32 %v853_v45  ;;  %3103 = vmatpush3.bf16.msra.mxu0 %v1176_v47 }
 0x3d8   : > { %v3318_v48 = vpop.eup %3317  ;;  %3114 = vmatprep.subr.bf16.mxu0 %v3492_v6 }
 0x3d9   : > { %v868_v49 = vmul.f32 %v3318_v48, %v3783_v1 }
 0x3da   : > { %v1219_v56 = vpop.permute.xlu1 %1218 }
 0x3db   : > { %v876_v50 = vpack.c.bf16 %v868_v49, %v868_v49  ;;  %v1224_v59 = vsel %vm886_vm4, %v1219_v56, 0 }
 0x3dc   : > { %v3320_v51 = vpop.eup %3319 }
 0x3dd   : > { %3087 = vmatmul.mubr.msk.bf16.vlgmr.msra.gmra.mrb[28].mxu1 %vm784_vm3, %v876_v50  ;;  %v870_v53 = vmul.f32 %v3320_v51, %v3787_v3 }
 0x3de   : > { %3097 = vmatpush3.bf16.msra.mxu1 %v1128_v52  ;;  %3098 = vmatprep.mubr.msk.bf16.mxu1 %vm3493_vm1, %v3492_v6  ;;  %v1319_v60 = vpop.permute.xlu1 %1318 }
 0x3df   : > { %3108 = vmatprep.subr.bf16.mxu1 %v3492_v6  ;;  %v878_v57 = vpack.c.bf16 %v870_v53, %v870_v53  ;;  %v1324_v14 = vsel %vm393_vm2, %v1319_v60, 0 }
 0x3e1   : > { %v3322_v54 = vpop.eup %3321 }
 0x3e2   : > { %v871_v55 = vmul.f32 %v3322_v54, %v3791_v5  ;;  %v1317_v61 = vpop.permute.xlu1 %1316 }
 0x3e4   : > { %v879_v58 = vpack.c.bf16 %v871_v55, %v871_v55 }
 0x3e5   : > { %3099 = vmatmul.mubr.msk.bf16.vlgmr.msra.gmra.mrb[32].mxu1 %vm784_vm3, %v878_v57 }
 0x3e6   : > { %3109 = vmatpush3.bf16.msra.mxu1 %v1224_v59  ;;  %3105 = vmatmul.mubr.msk.bf16.vlgmr.msra.gmra.mrb[28].mxu0 %vm784_vm3, %v879_v58  ;;  %v1419_v62 = vpop.permute.xlu1 %1418 }
 0x3e7   : > { %3116 = vmatprep.mubr.msk.bf16.mxu0 %vm3493_vm1, %v3492_v6  ;;  %3110 = vmatprep.mubr.msk.bf16.mxu1 %vm3493_vm1, %v3492_v6  ;;  %v1424_v25 = vsel %vm393_vm2, %v1419_v62, 0 }
 0x3e8   : > { %3120 = vmatprep.subr.bf16.mxu1 %v3492_v6 }
 0x3ea   : > { %v1417_v0 = vpop.permute.xlu1 %1416 }
 0x3ee   : > { %v1519_v4 = vpop.permute.xlu1 %1518 }
 0x3ef   : > { %v1524_v12 = vsel %vm393_vm2, %v1519_v4, 0 }
 0x3f2   : > { %v1517_v15 = vpop.permute.xlu1 %1516 }
 0x3f6   : > { %v1619_v24 = vpop.permute.xlu1 %1618 }
 0x3f7   : > { %v1624_v33 = vsel %vm393_vm2, %v1619_v24, 0 }
 0x3fa   : > { %v1617_v27 = vpop.permute.xlu1 %1616 }
 0x3fe   : > { %v1771_v30 = vpop.permute.xlu1 %1770 }
 0x3ff   : > { %v1776_v32 = vsel %vm886_vm4, %v1771_v30, 0 }
 0x406   : > { %v856_v63 = vpop.xlane.xlu0 %855 }
 0x407   : > { %3323 = vrcp.f32 %v856_v63 }
 0x40a   : > { %v1269_v1 = vpop.permute.xlu0 %1268 }
 0x40b   : > { %v1274_v2 = vsel %vm393_vm2, %v1269_v1, 0 }
 0x40c   : > { %3115 = vmatpush3.bf16.xpose.msra.mxu0 %v1274_v2 }
 0x40d   : > { %3126 = vmatprep.subr.bf16.mxu0 %v3492_v6 }
 0x40e   : > { %v1267_v3 = vpop.permute.xlu0 %1266 }
 0x411   : > { %v3324_v5 = vpop.eup %3323 }
 0x412   : > { %v872_v7 = vmul.f32 %v3324_v5, %v3812_v13  ;;  %v1369_v8 = vpop.permute.xlu0 %1368 }
 0x413   : > { %v1374_v10 = vsel %vm393_vm2, %v1369_v8, 0  ;;  %3117 = vmatmul.mubr.msk.bf16.vlgmr.msra.gmra.mrb[32].mxu0 %vm393_vm2, %v1267_v3 }
 0x414   : > { %3127 = vmatpush3.bf16.xpose.msra.mxu0 %v1374_v10  ;;  %v880_v11 = vpack.c.bf16 %v872_v7, %v872_v7  ;;  %3128 = vmatprep.mubr.msk.bf16.mxu0 %vm3493_vm1, %v3492_v6 }
 0x415   : > { %3138 = vmatprep.subr.bf16.mxu0 %v3492_v6 }
 0x416   : > { %3111 = vmatmul.mubr.msk.bf16.vlgmr.msra.gmra.mrb[36].mxu1 %vm784_vm3, %v880_v11  ;;  %v1367_v16 = vpop.permute.xlu0 %1366 }
 0x417   : > { %3121 = vmatpush3.bf16.xpose.msra.mxu1 %v1324_v14  ;;  %3122 = vmatprep.mubr.msk.bf16.mxu1 %vm3493_vm1, %v3492_v6 }
 0x418   : > { %3132 = vmatprep.subr.bf16.mxu1 %v3492_v6 }
 0x41a   : > { %v1469_v13 = vpop.permute.xlu0 %1468 }
 0x41b   : > { %v1474_v23 = vsel %vm393_vm2, %v1469_v13, 0  ;;  %3129 = vmatmul.mubr.msk.bf16.vlgmr.msra.gmra.mrb[36].mxu0 %vm393_vm2, %v1367_v16 }
 0x41c   : > { %3139 = vmatpush3.bf16.xpose.msra.mxu0 %v1474_v23  ;;  %3140 = vmatprep.mubr.msk.bf16.mxu0 %vm3493_vm1, %v3492_v6 }
 0x41d   : > { %3150 = vmatprep.subr.bf16.mxu0 %v3492_v6 }
 0x41e   : > { %3123 = vmatmul.mubr.msk.bf16.vlgmr.msra.gmra.mrb[40].mxu1 %vm393_vm2, %v1317_v61  ;;  %v1467_v26 = vpop.permute.xlu0 %1466 }
 0x41f   : > { %3133 = vmatpush3.bf16.xpose.msra.mxu1 %v1424_v25  ;;  %3134 = vmatprep.mubr.msk.bf16.mxu1 %vm3493_vm1, %v3492_v6 }
 0x420   : > { %3144 = vmatprep.subr.bf16.mxu1 %v3492_v6 }
 0x422   : > { %v1569_v28 = vpop.permute.xlu0 %1568 }
 0x423   : > { %v1574_v29 = vsel %vm393_vm2, %v1569_v28, 0  ;;  %3141 = vmatmul.mubr.msk.bf16.vlgmr.msra.gmra.mrb[40].mxu0 %vm393_vm2, %v1467_v26 }
 0x424   : > { %3151 = vmatpush3.bf16.xpose.msra.mxu0 %v1574_v29  ;;  %3152 = vmatprep.mubr.msk.bf16.mxu0 %vm3493_vm1, %v3492_v6 }
 0x425   : > { %3162 = vmatprep.subr.bf16.mxu0 %v3492_v6 }
 0x426   : > { %3135 = vmatmul.mubr.msk.bf16.vlgmr.msra.gmra.mrb[44].mxu1 %vm393_vm2, %v1417_v0  ;;  %v1567_v31 = vpop.permute.xlu0 %1566 }
 0x427   : > { %3145 = vmatpush3.bf16.xpose.msra.mxu1 %v1524_v12  ;;  %3146 = vmatprep.mubr.msk.bf16.mxu1 %vm3493_vm1, %v3492_v6 }
 0x428   : > { %3156 = vmatprep.subr.bf16.mxu1 %v3492_v6 }
 0x42b   : > { %3153 = vmatmul.mubr.msk.bf16.vlgmr.msra.gmra.mrb[44].mxu0 %vm393_vm2, %v1567_v31 }
 0x42c   : > { %3163 = vmatpush3.bf16.msra.mxu0 %v1776_v32  ;;  %3164 = vmatprep.mubr.msk.bf16.mxu0 %vm3493_vm1, %v3492_v6 }
 0x42d   : > { %3174 = vmatprep.subr.bf16.mxu0 %v3492_v6 }
 0x42e   : > { %3147 = vmatmul.mubr.msk.bf16.vlgmr.msra.gmra.mrb[48].mxu1 %vm393_vm2, %v1517_v15 }
 0x42f   : > { %3157 = vmatpush3.bf16.xpose.msra.mxu1 %v1624_v33  ;;  %3158 = vmatprep.mubr.msk.bf16.mxu1 %vm3493_vm1, %v3492_v6 }
 0x430   : > { %3168 = vmatprep.subr.bf16.mxu1 %v3492_v6 }
 0x436   : > { %3159 = vmatmul.mubr.msk.bf16.vlgmr.msra.gmra.mrb[52].mxu1 %vm393_vm2, %v1617_v27 }
 0x437   : > { %3170 = vmatprep.mubr.msk.bf16.mxu1 %vm3493_vm1, %v3492_v6 }
 0x47b   : > { %v3924_v34 = vpop.f32.mrb[16].mxu0 }
 0x47c   : > { %v3070_v35 = vpop.f32.mrb[17].mxu0 }
 0x47d   : > { %v927_v36 = vpop.f32.mrb[18].mxu0 }
 0x47e   : > { %v3071_v37 = vpop.f32.mrb[19].mxu0 }
 0x483   : > { %v3926_v38 = vpop.f32.mrb[20].mxu0 }
 0x484   : > { %v3928_v39 = vpop.f32.mrb[24].mxu1  ;;  %v3082_v41 = vpop.f32.mrb[21].mxu0 }
 0x485   : > { %v3076_v42 = vpop.f32.mrb[25].mxu1  ;;  %v1023_v43 = vpop.f32.mrb[22].mxu0 }
 0x486   : > { %v975_v44 = vpop.f32.mrb[26].mxu1  ;;  %v3083_v40 = vpop.f32.mrb[23].mxu0 }
 0x487   : > { %v3077_v46 = vpop.f32.mrb[27].mxu1 }
 0x48b   : > { %v3930_v47 = vpop.f32.mrb[24].mxu0 }
 0x48c   : > { %v3094_v45 = vpop.f32.mrb[25].mxu0 }
 0x48d   : > { %v1119_v48 = vpop.f32.mrb[26].mxu0 }
 0x48e   : > { %v3095_v49 = vpop.f32.mrb[27].mxu0 }
 0x4b0   : > { %v3932_v50 = vpop.f32.mrb[28].mxu1 }
 0x4b1   : > { %v3088_v51 = vpop.f32.mrb[29].mxu1 }
 0x4b2   : > { %v1071_v52 = vpop.f32.mrb[30].mxu1 }
 0x4b3   : > { %v3089_v53 = vpop.f32.mrb[31].mxu1 }
 0x4b8   : > { %v3934_v54 = vpop.f32.mrb[32].mxu1 }
 0x4b9   : > { %v3100_v55 = vpop.f32.mrb[33].mxu1  ;;  %v3936_v56 = vpop.f32.mrb[28].mxu0 }
 0x4ba   : > { %v1167_v57 = vpop.f32.mrb[34].mxu1  ;;  %v3106_v58 = vpop.f32.mrb[29].mxu0 }
 0x4bb   : > { %v3101_v59 = vpop.f32.mrb[35].mxu1  ;;  %v1215_v60 = vpop.f32.mrb[30].mxu0 }
 0x4bc   : > { %v3107_v61 = vpop.f32.mrb[31].mxu0 }
 0x4e6   : > { %v1310_v62 = vpop.f32.mrb[32].mxu0 }
 0x4e7   : > { %v3938_v63 = vmul.f32 0.25, %v1310_v62  ;;  %v3118_v0 = vpop.f32.mrb[33].mxu0 }
 0x4e8   : > { %v1313_v1 = vpop.f32.mrb[34].mxu0 }
 0x4e9   : > { %v3940_v2 = vpop.f32.mrb[36].mxu1  ;;  %v3119_v3 = vpop.f32.mrb[35].mxu0  ;;  %v1674_v4 = vsel %vm784_vm3, %v3938_v63, -inf }
 0x4ea   : > { %v3112_v5 = vpop.f32.mrb[37].mxu1  ;;  %1675 = vmax.xlane.f32.xlu0 %v1674_v4 }
 0x4eb   : > { %v1263_v7 = vpop.f32.mrb[38].mxu1 }
 0x4ec   : > { %v3113_v8 = vpop.f32.mrb[39].mxu1 }
 0x4ee   : > { %v1410_v10 = vpop.f32.mrb[36].mxu0 }
 0x4ef   : > { %v1668_v11 = vmul.f32 0.25, %v1410_v10  ;;  %v3130_v14 = vpop.f32.mrb[37].mxu0 }
 0x4f0   : > { %v1413_v15 = vpop.f32.mrb[38].mxu0 }
 0x4f1   : > { %v1360_v16 = vpop.f32.mrb[40].mxu1  ;;  %v3131_v13 = vpop.f32.mrb[39].mxu0  ;;  %v1680_v23 = vsel %vm784_vm3, %v1668_v11, -inf }
 0x4f2   : > { %v1667_v24 = vmul.f32 0.25, %v1360_v16  ;;  %v3124_v25 = vpop.f32.mrb[41].mxu1  ;;  %1681 = vmax.xlane.f32.xlu0 %v1680_v23 }
 0x4f3   : > { %v1363_v26 = vpop.f32.mrb[42].mxu1 }
 0x4f4   : > { %v3125_v27 = vpop.f32.mrb[43].mxu1  ;;  %v1677_v28 = vsel %vm784_vm3, %v1667_v24, -inf }
 0x4f5   : > { %1678 = vmax.xlane.f32.xlu1 %v1677_v28 }
 0x4f6   : > { %v1510_v29 = vpop.f32.mrb[40].mxu0 }
 0x4f7   : > { %v3946_v12 = vmul.f32 0.25, %v1510_v29  ;;  %v3142_v30 = vpop.f32.mrb[41].mxu0 }
 0x4f8   : > { %v1513_v31 = vpop.f32.mrb[42].mxu0 }
 0x4f9   : > { %v1460_v32 = vpop.f32.mrb[44].mxu1  ;;  %v3143_v33 = vpop.f32.mrb[43].mxu0  ;;  %v1686_v35 = vsel %vm784_vm3, %v3946_v12, -inf }
 0x4fa   : > { %v1669_v36 = vmul.f32 0.25, %v1460_v32  ;;  %v3136_v37 = vpop.f32.mrb[45].mxu1  ;;  %1687 = vmax.xlane.f32.xlu1 %v1686_v35 }
 0x4fb   : > { %v1463_v41 = vpop.f32.mrb[46].mxu1 }
 0x4fc   : > { %v3137_v42 = vpop.f32.mrb[47].mxu1  ;;  %v1683_v43 = vsel %vm784_vm3, %v1669_v36, -inf }
 0x4fd   : > { %1684 = vmax.xlane.f32.xlu0 %v1683_v43 }
 0x4fe   : > { %v1610_v44 = vpop.f32.mrb[44].mxu0 }
 0x4ff   : > { %v3951_v40 = vmul.f32 0.25, %v1610_v44  ;;  %v3154_v46 = vpop.f32.mrb[45].mxu0 }
 0x500   : > { %v1613_v45 = vpop.f32.mrb[46].mxu0 }
 0x501   : > { %v1560_v48 = vpop.f32.mrb[48].mxu1  ;;  %v3155_v49 = vpop.f32.mrb[47].mxu0  ;;  %v1692_v51 = vsel %vm784_vm3, %v3951_v40, -inf }
 0x502   : > { %v1671_v52 = vmul.f32 0.25, %v1560_v48  ;;  %v3148_v53 = vpop.f32.mrb[49].mxu1  ;;  %1693 = vmax.xlane.f32.xlu1 %v1692_v51 }
 0x503   : > { %v1563_v55 = vpop.f32.mrb[50].mxu1 }
 0x504   : > { %v3149_v57 = vpop.f32.mrb[51].mxu1  ;;  %v1689_v58 = vsel %vm784_vm3, %v1671_v52, -inf }
 0x505   : > { %1690 = vmax.xlane.f32.xlu0 %v1689_v58 }
 0x509   : > { %v1660_v59 = vpop.f32.mrb[52].mxu1 }
 0x50a   : > { %v1673_v60 = vmul.f32 0.25, %v1660_v59  ;;  %v3160_v61 = vpop.f32.mrb[53].mxu1 }
 0x50b   : > { %v1663_v62 = vpop.f32.mrb[54].mxu1 }
 0x50c   : > { %v3161_v0 = vpop.f32.mrb[55].mxu1  ;;  %v1695_v1 = vsel %vm784_vm3, %v1673_v60, -inf }
 0x50d   : > { %1696 = vmax.xlane.f32.xlu0 %v1695_v1 }
 0x513   : > { %1866 = vrot.lane.b32.xlu1 %v3660_v9, %s3498_s10 }
 0x517   : > { %1914 = vrot.lane.b32.xlu1 %v3666_v17, %s3498_s10 }
 0x523   : > { %1818 = vrot.lane.b32.xlu0 %v3668_v18, %s3498_s10 }
 0x577   : > { %v1676_v3 = vpop.xlane.xlu0 %1675 }
 0x578   : > { %v1698_v4 = vsub.f32 %v3938_v63, %v1676_v3 }
 0x57a   : > { %v1706_v5 = vmul.f32 1.442695, %v1698_v4 }
 0x57c   : > { %3325 = vpow2.f32 %v1706_v5 }
 0x57f   : > { %v1682_v7 = vpop.xlane.xlu0 %1681 }
 0x580   : > { %v1700_v8 = vsub.f32 %v1668_v11, %v1682_v7 }
 0x582   : > { %v1710_v10 = vmul.f32 1.442695, %v1700_v8  ;;  %v1679_v14 = vpop.xlane.xlu1 %1678 }
 0x583   : > { %v1699_v15 = vsub.f32 %v1667_v24, %v1679_v14 }
 0x584   : > { %3327 = vpow2.f32 %v1710_v10 }
 0x585   : > { %v1708_v16 = vmul.f32 1.442695, %v1699_v15 }
 0x586   : > { %v3326_v13 = vpop.eup %3325 }
 0x587   : > { %3329 = vpow2.f32 %v1708_v16  ;;  %v1722_v9 = vsel %vm784_vm3, %v3326_v13, 0.0  ;;  %v1688_v32 = vpop.xlane.xlu1 %1687 }
 0x588   : > { %1723 = vadd.xlane.f32.xlu1 %v1722_v9  ;;  %v1702_v33 = vsub.f32 %v3946_v12, %v1688_v32 }
 0x58a   : > { %v1685_v17 = vpop.xlane.xlu0 %1684 }
 0x58b   : > { %v1701_v23 = vsub.f32 %v1669_v36, %v1685_v17  ;;  %v1714_v36 = vmul.f32 1.442695, %v1702_v33 }
 0x58d   : > { %v1712_v18 = vmul.f32 1.442695, %v1701_v23 }
 0x58e   : > { %v3965_v25 = vpop.eup %3327 }
 0x58f   : > { %3331 = vpow2.f32 %v1712_v18  ;;  %v1728_v63 = vsel %vm784_vm3, %v3965_v25, 0.0  ;;  %v1694_v35 = vpop.xlane.xlu1 %1693 }
 0x590   : > { %1729 = vadd.xlane.f32.xlu1 %v1728_v63  ;;  %v1704_v37 = vsub.f32 %v3951_v40, %v1694_v35  ;;  %3333 = vpow2.f32 %v1714_v36 }
 0x591   : > { %v3969_v11 = vpop.eup %3329 }
 0x592   : > { %v1725_v24 = vsel %vm784_vm3, %v3969_v11, 0.0  ;;  %v1691_v26 = vpop.xlane.xlu0 %1690  ;;  %v1718_v41 = vmul.f32 1.442695, %v1704_v37 }
 0x593   : > { %1726 = vadd.xlane.f32.xlu0 %v1725_v24  ;;  %v1703_v42 = vsub.f32 %v1671_v52, %v1691_v26  ;;  %v1867_v52 = vpop.permute.xlu1 %1866 }
 0x594   : > { %3335 = vpow2.f32 %v1718_v41  ;;  %v1872_v62 = vsel %vm886_vm4, %v1867_v52, 0 }
 0x595   : > { %v1716_v43 = vmul.f32 1.442695, %v1703_v42 }
 0x597   : > { %3337 = vpow2.f32 %v1716_v43  ;;  %v1915_v53 = vpop.permute.xlu1 %1914 }
 0x598   : > { %v1920_v10 = vsel %vm886_vm4, %v1915_v53, 0 }
 0x599   : > { %v3973_v27 = vpop.eup %3331 }
 0x59a   : > { %v1697_v28 = vpop.xlane.xlu0 %1696  ;;  %v1731_v29 = vsel %vm784_vm3, %v3973_v27, 0.0  ;;  %v3985_v46 = vpop.eup %3333 }
 0x59b   : > { %1732 = vadd.xlane.f32.xlu0 %v1731_v29  ;;  %v1705_v44 = vsub.f32 %v1673_v60, %v1697_v28  ;;  %v1734_v12 = vsel %vm784_vm3, %v3985_v46, 0.0 }
 0x59e   : > { %v1819_v30 = vpop.permute.xlu0 %1818  ;;  %v3989_v45 = vpop.eup %3335 }
 0x59f   : > { %v1824_v31 = vsel %vm886_vm4, %v1819_v30, 0 }
 0x5a0   : > { %3169 = vmatpush3.bf16.msra.mxu1 %v1824_v31 }
 0x5a1   : > { %2010 = vrot.lane.b32.xlu1 %v3671_v19, %s3498_s10  ;;  %3180 = vmatprep.subr.bf16.mxu1 %v3492_v6  ;;  %v1720_v19 = vmul.f32 1.442695, %v1705_v44  ;;  %v3993_v40 = vpop.eup %3337  ;;  %v3291_v44 = vld [vmem:[%s4265_s2] sm:$0xff]  }
 0x5a2   : > { %v1737_v48 = vsel %vm784_vm3, %v3993_v40, 0.0 }
 0x5a3   : > { %3339 = vpow2.f32 %v1720_v19 }
 0x5ad   : > { %v3997_v49 = vpop.eup %3339 }
 0x5ae   : > { %v1743_v51 = vsel %vm784_vm3, %v3997_v49, 0.0 }
 0x5b1   : > { %1962 = vrot.lane.b32.xlu0 %v3674_v20, %s3498_s10  ;;  %v1740_v20 = vsel %vm784_vm3, %v3989_v45, 0.0 }
 0x5c5   : > { %1735 = vadd.xlane.f32.xlu1 %v1734_v12 }
 0x5c9   : > { %1741 = vadd.xlane.f32.xlu1 %v1740_v20 }
 0x5d0   : > { %1738 = vadd.xlane.f32.xlu0 %v1737_v48 }
 0x5d4   : > { %1744 = vadd.xlane.f32.xlu0 %v1743_v51 }
 0x5da   : > { %2106 = vrot.lane.b32.xlu1 %v3676_v21, %s3498_s10 }
 0x5ea   : > { %2058 = vrot.lane.b32.xlu0 %v3679_v22, %s3498_s10 }
 0x615   : > { %v1724_v55 = vpop.xlane.xlu1 %1723 }
 0x616   : > { %3341 = vrcp.f32 %v1724_v55 }
 0x61d   : > { %v1730_v57 = vpop.xlane.xlu1 %1729 }
 0x61e   : > { %3343 = vrcp.f32 %v1730_v57 }
 0x620   : > { %v3342_v58 = vpop.eup %3341  ;;  %v1727_v59 = vpop.xlane.xlu0 %1726 }
 0x621   : > { %v1754_v60 = vmul.f32 %v3342_v58, %v3326_v13  ;;  %3345 = vrcp.f32 %v1727_v59  ;;  %v2011_v16 = vpop.permute.xlu1 %2010 }
 0x622   : > { %v2016_v9 = vsel %vm886_vm4, %v2011_v16, 0 }
 0x623   : > { %v1762_v61 = vpack.c.bf16 %v1754_v60, %v1754_v60 }
 0x625   : > { %3165 = vmatmul.mubr.msk.bf16.vlgmr.msra.gmra.mrb[48].mxu0 %vm784_vm3, %v1762_v61 }
 0x626   : > { %3175 = vmatpush3.bf16.msra.mxu0 %v1872_v62  ;;  %3176 = vmatprep.mubr.msk.bf16.mxu0 %vm3493_vm1, %v3492_v6 }
 0x627   : > { %3186 = vmatprep.subr.bf16.mxu0 %v3492_v6 }
 0x628   : > { %v3344_v21 = vpop.eup %3343  ;;  %v1733_v22 = vpop.xlane.xlu0 %1732 }
 0x629   : > { %v1756_v0 = vmul.f32 %v3344_v21, %v3965_v25  ;;  %3347 = vrcp.f32 %v1733_v22 }
 0x62b   : > { %v3346_v1 = vpop.eup %3345  ;;  %v1764_v3 = vpack.c.bf16 %v1756_v0, %v1756_v0 }
 0x62c   : > { %v1755_v4 = vmul.f32 %v3346_v1, %v3969_v11  ;;  %v1963_v5 = vpop.permute.xlu0 %1962 }
 0x62d   : > { %v1968_v7 = vsel %vm886_vm4, %v1963_v5, 0  ;;  %3177 = vmatmul.mubr.msk.bf16.vlgmr.msra.gmra.mrb[52].mxu0 %vm784_vm3, %v1764_v3 }
 0x62e   : > { %3187 = vmatpush3.bf16.msra.mxu0 %v1968_v7  ;;  %v1763_v8 = vpack.c.bf16 %v1755_v4, %v1755_v4  ;;  %3188 = vmatprep.mubr.msk.bf16.mxu0 %vm3493_vm1, %v3492_v6 }
 0x62f   : > { %3198 = vmatprep.subr.bf16.mxu0 %v3492_v6 }
 0x630   : > { %3171 = vmatmul.mubr.msk.bf16.vlgmr.msra.gmra.mrb[56].mxu1 %vm784_vm3, %v1763_v8 }
 0x631   : > { %3181 = vmatpush3.bf16.msra.mxu1 %v1920_v10  ;;  %3182 = vmatprep.mubr.msk.bf16.mxu1 %vm3493_vm1, %v3492_v6 }
 0x632   : > { %3192 = vmatprep.subr.bf16.mxu1 %v3492_v6 }
 0x633   : > { %v3348_v14 = vpop.eup %3347 }
 0x634   : > { %v1757_v15 = vmul.f32 %v3348_v14, %v3973_v27 }
 0x636   : > { %v1765_v13 = vpack.c.bf16 %v1757_v15, %v1757_v15 }
 0x638   : > { %3183 = vmatmul.mubr.msk.bf16.vlgmr.msra.gmra.mrb[60].mxu1 %vm784_vm3, %v1765_v13 }
 0x639   : > { %3193 = vmatpush3.bf16.msra.mxu1 %v2016_v9  ;;  %3194 = vmatprep.mubr.msk.bf16.mxu1 %vm3493_vm1, %v3492_v6 }
 0x63a   : > { %3204 = vmatprep.subr.bf16.mxu1 %v3492_v6 }
 0x652   : > { %v1736_v17 = vpop.xlane.xlu1 %1735 }
 0x653   : > { %3349 = vrcp.f32 %v1736_v17 }
 0x656   : > { %v1742_v23 = vpop.xlane.xlu1 %1741 }
 0x657   : > { %3351 = vrcp.f32 %v1742_v23 }
 0x65a   : > { %v2107_v33 = vpop.permute.xlu1 %2106 }
 0x65b   : > { %v2112_v37 = vsel %vm886_vm4, %v2107_v33, 0 }
 0x65d   : > { %v3350_v18 = vpop.eup %3349  ;;  %v1739_v25 = vpop.xlane.xlu0 %1738 }
 0x65e   : > { %v1758_v63 = vmul.f32 %v3350_v18, %v3985_v46  ;;  %3353 = vrcp.f32 %v1739_v25 }
 0x660   : > { %v1766_v11 = vpack.c.bf16 %v1758_v63, %v1758_v63 }
 0x661   : > { %v3352_v24 = vpop.eup %3351  ;;  %v1745_v26 = vpop.xlane.xlu0 %1744 }
 0x662   : > { %3355 = vrcp.f32 %v1745_v26  ;;  %3189 = vmatmul.mubr.msk.bf16.vlgmr.msra.gmra.mrb[56].mxu0 %vm784_vm3, %v1766_v11  ;;  %v1760_v27 = vmul.f32 %v3352_v24, %v3989_v45 }
 0x663   : > { %3200 = vmatprep.mubr.msk.bf16.mxu0 %vm3493_vm1, %v3492_v6 }
 0x664   : > { %v1768_v31 = vpack.c.bf16 %v1760_v27, %v1760_v27 }
 0x665   : > { %v2059_v28 = vpop.permute.xlu0 %2058 }
 0x666   : > { %v2064_v29 = vsel %vm886_vm4, %v2059_v28, 0 }
 0x667   : > { %3199 = vmatpush3.bf16.msra.mxu0 %v2064_v29 }
 0x668   : > { %v3354_v30 = vpop.eup %3353  ;;  %3210 = vmatprep.subr.bf16.mxu0 %v3291_v44 }
 0x669   : > { %v1759_v32 = vmul.f32 %v3354_v30, %v3993_v40 }
 0x66a   : > { %3201 = vmatmul.mubr.msk.bf16.vlgmr.msra.gmra.mrb[60].mxu0 %vm784_vm3, %v1768_v31 }
 0x66b   : > { %v1767_v35 = vpack.c.bf16 %v1759_v32, %v1759_v32  ;;  %3211 = vmatpush3.bf16.msra.mxu0 %v3291_v44 }
 0x66c   : > { %v3356_v36 = vpop.eup %3355 }
 0x66d   : > { %3195 = vmatmul.mubr.msk.bf16.vlgmr.msra.gmra.mrb[64].mxu1 %vm784_vm3, %v1767_v35  ;;  %v1761_v41 = vmul.f32 %v3356_v36, %v3997_v49 }
 0x66e   : > { %3205 = vmatpush3.bf16.msra.mxu1 %v2112_v37  ;;  %3206 = vmatprep.mubr.msk.bf16.mxu1 %vm3493_vm1, %v3492_v6  ;;  %v3292_v6 = vld [vmem:[%s4265_s2 + $0x8] sm:$0xff]  }
 0x66f   : > { %v1769_v42 = vpack.c.bf16 %v1761_v41, %v1761_v41  ;;  %3212 = vmatprep.subr.bf16.mxu0 %v3292_v6 }
 0x670   : > { %3213 = vmatpush3.bf16.msra.mxu0 %v3292_v6 }
 0x675   : > { %3207 = vmatmul.mubr.msk.bf16.vlgmr.msra.gmra.mrb[68].mxu1 %vm784_vm3, %v1769_v42  ;;  %v2900_v42 = vld [vmem:[%s4267_s4] ss:$0 sm:$0xff] }
 0x6f8   : > { %v1812_v43 = vpop.f32.mrb[48].mxu0 }
 0x6f9   : > { %v3166_v46 = vpop.f32.mrb[49].mxu0  ;;  %2162 = vrot.lane.b32.xlu0 %v1812_v43, %s3499_s17 }
 0x6fa   : > { %v1815_v19 = vpop.f32.mrb[50].mxu0 }
 0x6fb   : > { %v3167_v12 = vpop.f32.mrb[51].mxu0 }
 0x700   : > { %v1908_v45 = vpop.f32.mrb[52].mxu0 }
 0x701   : > { %v3178_v20 = vpop.f32.mrb[53].mxu0  ;;  %2166 = vrot.lane.b32.xlu0 %v1908_v45, %s3499_s17 }
 0x702   : > { %v1911_v40 = vpop.f32.mrb[54].mxu0 }
 0x703   : > { %v1860_v48 = vpop.f32.mrb[56].mxu1  ;;  %v3179_v49 = vpop.f32.mrb[55].mxu0 }
 0x704   : > { %2164 = vrot.lane.b32.xlu1 %v1860_v48, %s3499_s17  ;;  %v3172_v51 = vpop.f32.mrb[57].mxu1 }
 0x705   : > { %v1863_v52 = vpop.f32.mrb[58].mxu1 }
 0x706   : > { %v3173_v53 = vpop.f32.mrb[59].mxu1 }
 0x70b   : > { %v1956_v55 = vpop.f32.mrb[60].mxu1 }
 0x70c   : > { %2168 = vrot.lane.b32.xlu1 %v1956_v55, %s3499_s17  ;;  %v3184_v57 = vpop.f32.mrb[61].mxu1 }
 0x70d   : > { %v1959_v58 = vpop.f32.mrb[62].mxu1 }
 0x70e   : > { %v3185_v59 = vpop.f32.mrb[63].mxu1 }
 0x735   : > { %v2004_v60 = vpop.f32.mrb[56].mxu0 }
 0x736   : > { %2170 = vrot.lane.b32.xlu0 %v2004_v60, %s3499_s17  ;;  %v3190_v61 = vpop.f32.mrb[57].mxu0 }
 0x737   : > { %v2007_v62 = vpop.f32.mrb[58].mxu0 }
 0x738   : > { %v3191_v21 = vpop.f32.mrb[59].mxu0 }
 0x73d   : > { %v2100_v22 = vpop.f32.mrb[60].mxu0 }
 0x73e   : > { %2174 = vrot.lane.b32.xlu0 %v2100_v22, %s3499_s17  ;;  %v3202_v0 = vpop.f32.mrb[61].mxu0 }
 0x73f   : > { %v2103_v1 = vpop.f32.mrb[62].mxu0 }
 0x740   : > { %v2052_v3 = vpop.f32.mrb[64].mxu1  ;;  %v3203_v4 = vpop.f32.mrb[63].mxu0 }
 0x741   : > { %2172 = vrot.lane.b32.xlu1 %v2052_v3, %s3499_s17  ;;  %v3196_v5 = vpop.f32.mrb[65].mxu1 }
 0x742   : > { %v2055_v7 = vpop.f32.mrb[66].mxu1 }
 0x743   : > { %v3197_v8 = vpop.f32.mrb[67].mxu1 }
 0x748   : > { %v2148_v10 = vpop.f32.mrb[68].mxu1 }
 0x749   : > { %2176 = vrot.lane.b32.xlu1 %v2148_v10, %s3499_s17  ;;  %v3208_v14 = vpop.f32.mrb[69].mxu1  ;;  %s3501_s17 = smov [#allocation5]  }
 0x74a   : > { %v2151_v15 = vpop.f32.mrb[70].mxu1  ;;  %s3425_s25 = sshll.u32 %s3501_s17, 4  ;;  %s3426_s25 = int_to_ptr.vmem [resolvable:$false] %s3425_s25 }
 0x74b   : > { %v3209_v16 = vpop.f32.mrb[71].mxu1  ;;  %s3427_s26 = scalar_lea.vmem %s3426_s25, 128  ;;  %p3428_p8 = scmp.lt.s32.totalorder %s4221_s7, %s3426_s25 }
 0x74c   : > { %v2353_v16 = vlaneseq  ;;  %p3429_p10 = scmp.lt.s32.totalorder %s3427_s26, %s3421_s13 }
 0x74e   : > { %p3430_p0 = por %p3429_p10, %p3428_p8 }
 0x750   : > { %p3431_p2 = pnand %p3430_p0, %p3424_p13 }
 0x76b   : > { %v2163_v13 = vpop.permute.xlu0 %2162 }
 0x76c   : > { %v4058_v17 = vsel %vm393_vm2, %v3924_v34, %v2163_v13  ;;  %v2354_v13 = vand.u32 127, %v2353_v16 }
 0x773   : > { %v2167_v25 = vpop.permute.xlu0 %2166 }
 0x774   : > { %v4069_v11 = vsel %vm393_vm2, %v3926_v38, %v2167_v25 }
 0x776   : > { %v2165_v9 = vpop.permute.xlu1 %2164 }
 0x777   : > { %v4062_v23 = vsel %vm393_vm2, %v3928_v39, %v2165_v9  ;;  %v4114_v9 = vshrl.u32 %v2353_v16, 7 }
 0x778   : > { %v2194_v18 = vpack.c.bf16 %v4062_v23, %v4058_v17 }
 0x77a   : > { %3214 = vmatprep.mubr.msk.bf16.mxu0 %vm289_vm0, %v2194_v18 }
 0x77e   : > { %v2169_v63 = vpop.permute.xlu1 %2168 }
 0x77f   : > { %v4073_v24 = vsel %vm393_vm2, %v3932_v50, %v2169_v63  ;;  %v4117_v63 = vsub.s32 %v2354_v13, %v4114_v9 }
 0x780   : > { %v2195_v34 = vpack.c.bf16 %v4073_v24, %v4069_v11 }
 0x782   : > { %3215 = vmatmul.mubr.msk.bf16.vlgmr.msra.gmra.mrb[64].mxu0 %vm289_vm0, %v2195_v34 }
 0x7a8   : > { %v2171_v39 = vpop.permute.xlu0 %2170 }
 0x7a9   : > { %v4080_v27 = vsel %vm393_vm2, %v3930_v47, %v2171_v39 }
 0x7b0   : > { %v2175_v50 = vpop.permute.xlu0 %2174 }
 0x7b1   : > { %v4091_v30 = vsel %vm393_vm2, %v3936_v56, %v2175_v50 }
 0x7b3   : > { %v2173_v26 = vpop.permute.xlu1 %2172 }
 0x7b4   : > { %v4084_v28 = vsel %vm393_vm2, %v3934_v54, %v2173_v26  ;;  %v2893_v54 = vld [vmem:[%s4266_s3] ss:$0 sm:$0xff] }
 0x7b5   : > { %v2196_v38 = vpack.c.bf16 %v4084_v28, %v4080_v27 }
 0x7b7   : > { %3218 = vmatprep.mubr.msk.bf16.mxu0 %vm289_vm0, %v2196_v38 }
 0x7bb   : > { %v2177_v29 = vpop.permute.xlu1 %2176 }
 0x7bc   : > { %v4095_v31 = vsel %vm393_vm2, %v3940_v2, %v2177_v29 }
 0x7bd   : > { %v2197_v47 = vpack.c.bf16 %v4095_v31, %v4091_v30 }
 0x7bf   : > { %3219 = vmatmul.mubr.msk.bf16.gmra.mrb[68].mxu0 %vm289_vm0, %v2197_v47 }
 0x855   : > { %v3216_v32 = vpop.f32.mrb[64].mxu0 }
 0x856   : > { %v2276_v33 = vadd.f32 %v3216_v32, %v2893_v54  ;;  %v2267_v35 = vpop.f32.mrb[65].mxu0 }
 0x857   : > { %v2268_v36 = vadd.f32 %v2893_v54, %v2267_v35  ;;  %v3217_v37 = vpop.f32.mrb[66].mxu0 }
 0x858   : > { %3357 = vtanh.f32 %v2276_v33  ;;  %v2279_v56 = vadd.f32 %v3217_v37, %v2893_v54  ;;  %v2270_v41 = vpop.f32.mrb[67].mxu0 }
 0x859   : > { %3359 = vtanh.f32 %v2268_v36  ;;  %v2271_v2 = vadd.f32 %v2893_v54, %v2270_v41 }
 0x85b   : > { %3361 = vtanh.f32 %v2271_v2 }
 0x85c   : > { %3363 = vtanh.f32 %v2279_v56 }
 0x862   : > { %v3358_v43 = vpop.eup %3357 }
 0x863   : > { %v3360_v44 = vpop.eup %3359  ;;  %v2315_v46 = vmul.f32 %v3358_v43, %v2900_v42 }
 0x864   : > { %v2313_v6 = vmul.f32 %v3360_v44, %v2900_v42 }
 0x865   : > { %v3362_v19 = vpop.eup %3361  ;;  %v2327_v12 = vsel %vm393_vm2, %v2315_v46, 0.0 }
 0x866   : > { %v3364_v45 = vpop.eup %3363  ;;  %2328 = vadd.xlane.f32.xlu0 %v2327_v12  ;;  %v2314_v20 = vmul.f32 %v3362_v19, %v2900_v42  ;;  %v2321_v48 = vsel %vm393_vm2, %v2313_v6, 0.0  ;;  %v3500_v12 = vmov 0   ;;  %v2408_v6 = vsub.s32 0, %v4114_v9 }
 0x867   : > { %v2316_v49 = vmul.f32 %v3364_v45, %v2900_v42  ;;  %3284 = vset.pattern.permute.xlu1 %v3500_v12  ;;  %3283 = vset.pattern.permute.xlu0 %v3500_v12  ;;  %v2412_v45 = vsub.s32 1, %v4114_v9 }
 0x868   : > { %v2324_v40 = vsel %vm393_vm2, %v2314_v20, 0.0  ;;  %v2416_v20 = vsub.s32 2, %v4114_v9 }
 0x869   : > { %2325 = vadd.xlane.f32.xlu1 %v2324_v40  ;;  %v2330_v51 = vsel %vm393_vm2, %v2316_v49, 0.0  ;;  %v2420_v40 = vsub.s32 3, %v4114_v9 }
 0x86a   : > { %2322 = vadd.xlane.f32.xlu0 %v2321_v48 }
 0x86e   : > { %2331 = vadd.xlane.f32.xlu0 %v2330_v51 }
 0x892   : > { %v3220_v52 = vpop.f32.mrb[68].mxu0 }
 0x893   : > { %v2292_v53 = vadd.f32 %v3220_v52, %v2893_v54  ;;  %v2283_v55 = vpop.f32.mrb[69].mxu0 }
 0x894   : > { %v2284_v57 = vadd.f32 %v2893_v54, %v2283_v55  ;;  %v3221_v58 = vpop.f32.mrb[70].mxu0 }
 0x895   : > { %3365 = vtanh.f32 %v2292_v53  ;;  %v2295_v59 = vadd.f32 %v3221_v58, %v2893_v54  ;;  %v2286_v60 = vpop.f32.mrb[71].mxu0 }
 0x896   : > { %3367 = vtanh.f32 %v2284_v57  ;;  %v2287_v61 = vadd.f32 %v2893_v54, %v2286_v60  ;;  %v2424_v57 = vsub.s32 4, %v4114_v9 }
 0x897   : > { %3369 = vtanh.f32 %v2295_v59 }
 0x898   : > { %3371 = vtanh.f32 %v2287_v61 }
 0x89f   : > { %v3366_v62 = vpop.eup %3365 }
 0x8a0   : > { %v3368_v21 = vpop.eup %3367  ;;  %v2319_v22 = vmul.f32 %v3366_v62, %v2900_v42  ;;  %v2428_v62 = vsub.s32 5, %v4114_v9 }
 0x8a1   : > { %v3370_v0 = vpop.eup %3369  ;;  %v2317_v1 = vmul.f32 %v3368_v21, %v2900_v42 }
 0x8a2   : > { %v3372_v3 = vpop.eup %3371  ;;  %v2320_v4 = vmul.f32 %v3370_v0, %v2900_v42  ;;  %v2339_v10 = vsel %vm393_vm2, %v2319_v22, 0.0 }
 0x8a3   : > { %v2333_v5 = vsel %vm393_vm2, %v2317_v1, 0.0  ;;  %v2318_v7 = vmul.f32 %v3372_v3, %v2900_v42  ;;  %v2432_v1 = vsub.s32 6, %v4114_v9 }
 0x8a4   : > { %2334 = vadd.xlane.f32.xlu1 %v2333_v5  ;;  %v2342_v14 = vsel %vm393_vm2, %v2320_v4, 0.0 }
 0x8a5   : > { %v2336_v8 = vsel %vm393_vm2, %v2318_v7, 0.0  ;;  %v2436_v7 = vsub.s32 7, %v4114_v9 }
 0x8a6   : > { %2337 = vadd.xlane.f32.xlu0 %v2336_v8 }
 0x8a8   : > { %2340 = vadd.xlane.f32.xlu1 %v2339_v10 }
 0x8aa   : > { %2343 = vadd.xlane.f32.xlu0 %v2342_v14 }
 0x8f3   : > { %v2329_v15 = vpop.xlane.xlu0 %2328 }
 0x8f4   : > { %v2366_v29 = vrot.slane %v2329_v15, %v4117_v63 }
 0x8f6   : > { %v2326_v25 = vpop.xlane.xlu1 %2325 }
 0x8f7   : > { %v2323_v18 = vpop.xlane.xlu0 %2322  ;;  %v2362_v34 = vrot.slane %v2326_v25, %v4117_v63 }
 0x8f8   : > { %v2358_v39 = vrot.slane %v2323_v18, %v4117_v63 }
 0x8fa   : > { %v2388_v38 = vsel %vm2387_vm5, %v2362_v34, %v2358_v39 }
 0x8fb   : > { %v2332_v26 = vpop.xlane.xlu0 %2331  ;;  %v2390_v54 = vsel %vm2389_vm6, %v2366_v29, %v2388_v38 }
 0x8fc   : > { %v2370_v50 = vrot.slane %v2332_v26, %v4117_v63 }
 0x8fe   : > { %v2392_v33 = vsel %vm2391_vm7, %v2370_v50, %v2390_v54 }
 0x931   : > { %v2335_v47 = vpop.xlane.xlu1 %2334 }
 0x932   : > { %v2374_v32 = vrot.slane %v2335_v47, %v4117_v63 }
 0x933   : > { %v2338_v35 = vpop.xlane.xlu0 %2337 }
 0x934   : > { %v2394_v36 = vsel %vm2393_vm8, %v2374_v32, %v2392_v33  ;;  %v2378_v37 = vrot.slane %v2338_v35, %v4117_v63 }
 0x935   : > { %v2341_v56 = vpop.xlane.xlu1 %2340 }
 0x936   : > { %v2382_v41 = vrot.slane %v2341_v56, %v4117_v63  ;;  %v2396_v2 = vsel %vm2395_vm9, %v2378_v37, %v2394_v36 }
 0x937   : > { %v2344_v42 = vpop.xlane.xlu0 %2343 }
 0x938   : > { %v2386_v43 = vrot.slane %v2344_v42, %v4117_v63  ;;  %v2398_v44 = vsel %vm2397_vm10, %v2382_v41, %v2396_v2 }
 0x93a   : > { %v2400_v46 = vsel %vm2399_vm11, %v2386_v43, %v2398_v44 }
 0x93b   : > { %v2402_v19 = vsel %vm784_vm3, %v2400_v46, -inf }
 0x93c   : > { %2403 = vmax.xlane.f32.xlu1 %v2402_v19 }
 0x9c9   : > { %v2404_v48 = vpop.xlane.xlu1 %2403 }
 0x9ca   : > { %v2409_v49 = vrot.slane %v2404_v48, %v2408_v6  ;;  %v2413_v51 = vrot.slane %v2404_v48, %v2412_v45  ;;  %v2417_v52 = vrot.slane %v2404_v48, %v2416_v20  ;;  %v2421_v58 = vrot.slane %v2404_v48, %v2420_v40 }
 0x9cb   : > { %v2425_v21 = vrot.slane %v2404_v48, %v2424_v57  ;;  %v2429_v3 = vrot.slane %v2404_v48, %v2428_v62  ;;  %v2433_v8 = vrot.slane %v2404_v48, %v2432_v1  ;;  %v2437_v13 = vrot.slane %v2404_v48, %v2436_v7 }
 0x9cc   : > { %v2446_v53 = vsub.f32 %v2323_v18, %v2409_v49  ;;  %v2447_v55 = vsub.f32 %v2326_v25, %v2413_v51  ;;  %v2448_v59 = vsub.f32 %v2329_v15, %v2417_v52  ;;  %v2449_v22 = vsub.f32 %v2332_v26, %v2421_v58 }
 0x9cd   : > { %v2450_v4 = vsub.f32 %v2335_v47, %v2425_v21  ;;  %v2451_v10 = vsub.f32 %v2338_v35, %v2429_v3  ;;  %v2452_v18 = vsub.f32 %v2341_v56, %v2433_v8  ;;  %v2453_v39 = vsub.f32 %v2344_v42, %v2437_v13 }
 0x9ce   : > { %v2454_v60 = vmul.f32 1.442695, %v2446_v53  ;;  %v2456_v61 = vmul.f32 1.442695, %v2447_v55  ;;  %v2458_v0 = vmul.f32 1.442695, %v2448_v59 }
 0x9cf   : > { %v2460_v5 = vmul.f32 1.442695, %v2449_v22  ;;  %v2462_v14 = vmul.f32 1.442695, %v2450_v4  ;;  %v2464_v25 = vmul.f32 1.442695, %v2451_v10 }
 0x9d0   : > { %3373 = vpow2.f32 %v2454_v60  ;;  %v2466_v26 = vmul.f32 1.442695, %v2452_v18  ;;  %v2468_v50 = vmul.f32 1.442695, %v2453_v39 }
 0x9d1   : > { %3375 = vpow2.f32 %v2456_v61 }
 0x9d2   : > { %3377 = vpow2.f32 %v2458_v0 }
 0x9d3   : > { %3379 = vpow2.f32 %v2460_v5 }
 0x9d4   : > { %3381 = vpow2.f32 %v2462_v14 }
 0x9d5   : > { %3383 = vpow2.f32 %v2464_v25 }
 0x9d6   : > { %3385 = vpow2.f32 %v2466_v26 }
 0x9d7   : > { %3387 = vpow2.f32 %v2468_v50 }
 0x9da   : > { %v3374_v15 = vpop.eup %3373 }
 0x9db   : > { %v3376_v16 = vpop.eup %3375  ;;  %2479 = vperm.xlu0 %3283, %v3374_v15  }
 0x9dc   : > { %2482 = vperm.xlu1 %3284, %v3376_v16   ;;  %v3378_v34 = vpop.eup %3377 }
 0x9dd   : > { %v3380_v38 = vpop.eup %3379 }
 0x9de   : > { %v3382_v29 = vpop.eup %3381 }
 0x9df   : > { %v3384_v47 = vpop.eup %3383 }
 0x9e0   : > { %2485 = vperm.xlu1 %3284, %v3378_v34   ;;  %v3386_v54 = vpop.eup %3385 }
 0x9e1   : > { %v3388_v32 = vpop.eup %3387 }
 0x9e4   : > { %2488 = vperm.xlu1 %3284, %v3380_v38  }
 0x9e8   : > { %2491 = vperm.xlu1 %3284, %v3382_v29  }
 0x9ec   : > { %2494 = vperm.xlu1 %3284, %v3384_v47  }
 0x9f0   : > { %2497 = vperm.xlu1 %3284, %v3386_v54  }
 0x9f4   : > { %2500 = vperm.xlu1 %3284, %v3388_v32  }
 0xa5a   : > { %v2480_v56 = vpop.permute.xlu0 %2479 }
 0xa5b   : > { %v2483_v33 = vpop.permute.xlu1 %2482  ;;  %v2505_v42 = vrot.slane %v2480_v56, %v4117_v63 }
 0xa5c   : > { %v2509_v2 = vrot.slane %v2483_v33, %v4117_v63 }
 0xa5e   : > { %v2534_v12 = vsel %vm2387_vm5, %v2509_v2, %v2505_v42 }
 0xa5f   : > { %v2486_v35 = vpop.permute.xlu1 %2485 }
 0xa60   : > { %v2513_v43 = vrot.slane %v2486_v35, %v4117_v63 }
 0xa62   : > { %v2535_v49 = vsel %vm2389_vm6, %v2513_v43, %v2534_v12 }
 0xa63   : > { %v2489_v36 = vpop.permute.xlu1 %2488 }
 0xa64   : > { %v2517_v44 = vrot.slane %v2489_v36, %v4117_v63 }
 0xa66   : > { %v2536_v52 = vsel %vm2391_vm7, %v2517_v44, %v2535_v49 }
 0xa67   : > { %v2492_v37 = vpop.permute.xlu1 %2491 }
 0xa68   : > { %v2521_v46 = vrot.slane %v2492_v37, %v4117_v63 }
 0xa6a   : > { %v2537_v53 = vsel %vm2393_vm8, %v2521_v46, %v2536_v52 }
 0xa6b   : > { %v2495_v41 = vpop.permute.xlu1 %2494 }
 0xa6c   : > { %v2525_v48 = vrot.slane %v2495_v41, %v4117_v63 }
 0xa6e   : > { %v2538_v58 = vsel %vm2395_vm9, %v2525_v48, %v2537_v53 }
 0xa6f   : > { %v2498_v19 = vpop.permute.xlu1 %2497 }
 0xa70   : > { %v2529_v51 = vrot.slane %v2498_v19, %v4117_v63 }
 0xa72   : > { %v2539_v60 = vsel %vm2397_vm10, %v2529_v51, %v2538_v58 }
 0xa73   : > { %v2501_v55 = vpop.permute.xlu1 %2500 }
 0xa74   : > { %v2533_v59 = vrot.slane %v2501_v55, %v4117_v63 }
 0xa76   : > { %v2540_v61 = vsel %vm2399_vm11, %v2533_v59, %v2539_v60 }
 0xa77   : > { %v2542_v21 = vsel %vm784_vm3, %v2540_v61, 0.0 }
 0xa78   : > { %2543 = vadd.xlane.f32.xlu1 %v2542_v21 }
 0xb05   : > { %v2544_v22 = vpop.xlane.xlu1 %2543 }
 0xb06   : > { %3389 = vrcp.f32 %v2544_v22 }
 0xb10   : > { %v3390_v0 = vpop.eup %3389 }
 0xb11   : > { %v2550_v3 = vrot.slane %v3390_v0, %v2408_v6  ;;  %v2554_v5 = vrot.slane %v3390_v0, %v2412_v45  ;;  %v2558_v63 = vrot.slane %v3390_v0, %v2416_v20  ;;  %v2562_v14 = vrot.slane %v3390_v0, %v2420_v40 }
 0xb12   : > { %v2566_v18 = vrot.slane %v3390_v0, %v2424_v57  ;;  %v2570_v45 = vrot.slane %v3390_v0, %v2428_v62  ;;  %v2574_v20 = vrot.slane %v3390_v0, %v2432_v1  ;;  %v2578_v40 = vrot.slane %v3390_v0, %v2436_v7 }
 0xb13   : > { %v2587_v4 = vmul.f32 %v3374_v15, %v2550_v3  ;;  %v2588_v8 = vmul.f32 %v3376_v16, %v2554_v5  ;;  %v2589_v10 = vmul.f32 %v3378_v34, %v2558_v63  ;;  %v2590_v13 = vmul.f32 %v3380_v38, %v2562_v14 }
 0xb14   : > { %v2591_v6 = vmul.f32 %v3382_v29, %v2566_v18  ;;  %v2592_v15 = vmul.f32 %v3384_v47, %v2570_v45  ;;  %v2593_v16 = vmul.f32 %v3386_v54, %v2574_v20  ;;  %v2594_v25 = vmul.f32 %v3388_v32, %v2578_v40 }
 0xb15   : > { %2597 = vperm.xlu0 %3283, %v2587_v4  }
 0xb19   : > { %2602 = vperm.xlu0 %3283, %v2588_v8  }
 0xb1d   : > { %2607 = vperm.xlu0 %3283, %v2589_v10  }
 0xb21   : > { %2612 = vperm.xlu0 %3283, %v2590_v13  }
 0xb25   : > { %2617 = vperm.xlu0 %3283, %v2591_v6  }
 0xb29   : > { %2622 = vperm.xlu0 %3283, %v2592_v15  }
 0xb2d   : > { %2627 = vperm.xlu0 %3283, %v2593_v16  }
 0xb31   : > { %2632 = vperm.xlu0 %3283, %v2594_v25  }
 0xb94   : > { %v2598_v34 = vpop.permute.xlu0 %2597 }
 0xb95   : > { %v2635_v39 = vmul.f32 %v2598_v34, %v4058_v17 }
 0xb97   : > { %v2643_v50 = vsel %vm289_vm0, %v2635_v39, 0.0 }
 0xb98   : > { %v2603_v57 = vpop.permute.xlu0 %2602  ;;  %v2644_v7 = vrot.slane %v2643_v50, 4 }
 0xb99   : > { %v2636_v26 = vmul.f32 %v2603_v57, %v4062_v23 }
 0xb9a   : > { %v2645_v23 = vadd.f32 %v2644_v7, %v2643_v50 }
 0xb9b   : > { %v2650_v62 = vsel %vm289_vm0, %v2636_v26, 0.0 }
 0xb9c   : > { %v2608_v38 = vpop.permute.xlu0 %2607  ;;  %v2651_v29 = vrot.slane %v2650_v62, 4  ;;  %v2646_v43 = vrot.slane %v2645_v23, 2 }
 0xb9d   : > { %v2637_v1 = vmul.f32 %v2608_v38, %v4069_v11 }
 0xb9e   : > { %v2652_v33 = vadd.f32 %v2651_v29, %v2650_v62  ;;  %v2647_v52 = vadd.f32 %v2646_v43, %v2645_v23 }
 0xb9f   : > { %v2657_v9 = vsel %vm289_vm0, %v2637_v1, 0.0 }
 0xba0   : > { %v2658_v47 = vrot.slane %v2657_v9, 4  ;;  %v2613_v54 = vpop.permute.xlu0 %2612  ;;  %v2653_v41 = vrot.slane %v2652_v33, 2  ;;  %v2648_v3 = vrot.slane %v2647_v52, 1 }
 0xba1   : > { %v2638_v32 = vmul.f32 %v2613_v54, %v4073_v24 }
 0xba2   : > { %v2659_v35 = vadd.f32 %v2658_v47, %v2657_v9  ;;  %v2654_v12 = vadd.f32 %v2653_v41, %v2652_v33  ;;  %v2649_v45 = vadd.f32 %v2648_v3, %v2647_v52 }
 0xba3   : > { %v2664_v17 = vsel %vm289_vm0, %v2638_v32, 0.0 }
 0xba4   : > { %v2665_v36 = vrot.slane %v2664_v17, 4  ;;  %v2618_v37 = vpop.permute.xlu0 %2617  ;;  %v2660_v11 = vrot.slane %v2659_v35, 2  ;;  %v2655_v60 = vrot.slane %v2654_v12, 1  ;;  %v2922_v38 = vpack.c.bf16 %v2649_v45, %v2649_v45 }
 0xba5   : > { %v2639_v56 = vmul.f32 %v2618_v37, %v4080_v27 }
 0xba6   : > { %v2666_v2 = vadd.f32 %v2665_v36, %v2664_v17  ;;  %v2661_v49 = vadd.f32 %v2660_v11, %v2659_v35  ;;  %v2656_v14 = vadd.f32 %v2655_v60, %v2654_v12  ;;  %v2731_v33 = vunpack.c.l.b16 %v2922_v38 }
 0xba7   : > { %v2671_v42 = vsel %vm289_vm0, %v2639_v56, 0.0 }
 0xba8   : > { %v2667_v44 = vrot.slane %v2666_v2, 2  ;;  %v2672_v46 = vrot.slane %v2671_v42, 4  ;;  %v2623_v19 = vpop.permute.xlu0 %2622  ;;  %v2662_v21 = vrot.slane %v2661_v49, 1  ;;  %v2923_v34 = vpack.c.bf16 %v2656_v14, %v2656_v14 }
 0xba9   : > { %v2640_v24 = vmul.f32 %v2623_v19, %v4084_v28 }
 0xbaa   : > { %v2673_v48 = vadd.f32 %v2672_v46, %v2671_v42  ;;  %v2668_v53 = vadd.f32 %v2667_v44, %v2666_v2  ;;  %v2663_v18 = vadd.f32 %v2662_v21, %v2661_v49  ;;  %v2732_v9 = vunpack.c.l.b16 %v2923_v34 }
 0xbab   : > { %v2678_v51 = vsel %vm289_vm0, %v2640_v24, 0.0 }
 0xbac   : > { %v2674_v55 = vrot.slane %v2673_v48, 2  ;;  %v2628_v27 = vpop.permute.xlu0 %2627  ;;  %v2679_v58 = vrot.slane %v2678_v51, 4  ;;  %v2669_v28 = vrot.slane %v2668_v53, 1  ;;  %v2924_v26 = vpack.c.bf16 %v2663_v18, %v2663_v18 }
 0xbad   : > { %v2641_v59 = vmul.f32 %v2628_v27, %v4091_v30  ;;  %v2739_v37 = vsel %vm2387_vm5, %v2732_v9, %v2731_v33 }
 0xbae   : > { %v2675_v61 = vadd.f32 %v2674_v55, %v2673_v48  ;;  %v2680_v22 = vadd.f32 %v2679_v58, %v2678_v51  ;;  %v2670_v15 = vadd.f32 %v2669_v28, %v2668_v53  ;;  %v2733_v32 = vunpack.c.l.b16 %v2924_v26 }
 0xbaf   : > { %v2685_v0 = vsel %vm289_vm0, %v2641_v59, 0.0 }
 0xbb0   : > { %v2686_v4 = vrot.slane %v2685_v0, 4  ;;  %v2633_v5 = vpop.permute.xlu0 %2632  ;;  %v2676_v8 = vrot.slane %v2675_v61, 1  ;;  %v2681_v63 = vrot.slane %v2680_v22, 2  ;;  %v2740_v2 = vsel %vm2389_vm6, %v2733_v32, %v2739_v37 }
 0xbb1   : > { %v2642_v10 = vmul.f32 %v2633_v5, %v4095_v31  ;;  %v2925_v31 = vpack.c.bf16 %v2670_v15, %v2670_v15 }
 0xbb2   : > { %v2687_v13 = vadd.f32 %v2686_v4, %v2685_v0  ;;  %v2682_v6 = vadd.f32 %v2681_v63, %v2680_v22  ;;  %v2677_v40 = vadd.f32 %v2676_v8, %v2675_v61 }
 0xbb3   : > { %v2692_v30 = vsel %vm289_vm0, %v2642_v10, 0.0  ;;  %v2734_v35 = vunpack.c.l.b16 %v2925_v31 }
 0xbb4   : > { %v2688_v20 = vrot.slane %v2687_v13, 2  ;;  %v2693_v16 = vrot.slane %v2692_v30, 4  ;;  %v2683_v25 = vrot.slane %v2682_v6, 1  ;;  %v2926_v29 = vpack.c.bf16 %v2677_v40, %v2677_v40 }
 0xbb5   : > { %v2741_v42 = vsel %vm2391_vm7, %v2734_v35, %v2740_v2 }
 0xbb6   : > { %v2689_v57 = vadd.f32 %v2688_v20, %v2687_v13  ;;  %v2694_v39 = vadd.f32 %v2693_v16, %v2692_v30  ;;  %v2684_v62 = vadd.f32 %v2683_v25, %v2682_v6  ;;  %v2735_v36 = vunpack.c.l.b16 %v2926_v29 }
 0xbb8   : > { %v2690_v50 = vrot.slane %v2689_v57, 1  ;;  %v2695_v1 = vrot.slane %v2694_v39, 2  ;;  %v2927_v7 = vpack.c.bf16 %v2684_v62, %v2684_v62  ;;  %v2742_v44 = vsel %vm2393_vm8, %v2735_v36, %v2741_v42 }
 0xbba   : > { %v2691_v47 = vadd.f32 %v2690_v50, %v2689_v57  ;;  %v2696_v54 = vadd.f32 %v2695_v1, %v2694_v39  ;;  %v2736_v56 = vunpack.c.l.b16 %v2927_v7 }
 0xbbc   : > { %v2928_v17 = vpack.c.bf16 %v2691_v47, %v2691_v47  ;;  %v2697_v23 = vrot.slane %v2696_v54, 1  ;;  %v2743_v46 = vsel %vm2395_vm9, %v2736_v56, %v2742_v44 }
 0xbbe   : > { %v2698_v41 = vadd.f32 %v2697_v23, %v2696_v54  ;;  %v2737_v11 = vunpack.c.l.b16 %v2928_v17 }
 0xbc0   : > { %v2929_v43 = vpack.c.bf16 %v2698_v41, %v2698_v41  ;;  %v2744_v24 = vsel %vm2397_vm10, %v2737_v11, %v2743_v46 }
 0xbc2   : > { %v2738_v19 = vunpack.c.l.b16 %v2929_v43 }
 0xbc4   : > { %v2745_v12 = vsel %vm2399_vm11, %v2738_v19, %v2744_v24 }
 0xbc5   : > { %v2746_v48 = vpack.c.b16 %v2745_v12, %v2745_v12 }
 0xbc7   : > { %2749 = vst.msk [vmem:[%s242_s8] sm:$0xf] %vm2748_vm12, %v2746_v48 }
 0xbc8   : > { %3434 = shalt.err (!%p3431_p2)
}
 0xbc9   : > { %s3435_s23 = scalar_lea.hbm %s4219_s11, 64  ;;  %s3439_s12 = scalar_lea.hbm %s4268_s5, 128 }
 0xbca   : > { %p3436_p4 = scmp.ne.s32.totalorder %s4219_s11, %s3435_s23  ;;  %p3440_p9 = scmp.lt.u32.totalorder %s4219_s11, %s4268_s5 }
 0xbcb   : > { %p3441_p1 = scmp.lt.u32.totalorder %s3439_s12, %s3435_s23  ;;  %p3443_p6 = scmp.lt.u32.totalorder %s3435_s23, %s4219_s11 }
 0xbcc   : > { %p3437_p5 = pnand %p3436_p4, %p4275_p11 }
 0xbcd   : > { %p3442_p3 = por %p3441_p1, %p3440_p9 }
 0xbce   : > { %p3438_p7 = pneg %p3437_p5 }
 0xbcf   : > { %p3444_p12 = por %p3443_p6, %p3442_p3 }
 0xbd1   : > { %p3445_p13 = pnand %p3444_p12, %p3438_p7 }
 0xbd3   : > { %3448 = shalt.err (!%p3445_p13)
}
 0xbd4   : > { %3228 = dma.vmem_to_hbm [thread:$0]  (%p4275_p11), %s4221_s7, 64, %s4219_s11, %s2751_s22  }
 0xbd5 PF: > { %s2776_s29 = sand.u32 1, %s3475_s18   ;;  %p4276_p8 = scmp.ne.s32.totalorder %s4273_s6, 0 }
 0xbd6   : > { %p4277_p10 = scmp.ge.s32.totalorder %s3487_s21, 2  ;;  %s2777_s8 = scalar_lea.sflag [#allocation4], %s2776_s29 }
 0xbd8   : > { %p3235_p0 = pnand %p4277_p10, %p4276_p8 }
 0xbda   : > { %3470 = dma.done.wait (!%p3235_p0), %s2777_s8, 64  }
 0xbdb   : > { %3472 = vsyncadd (!%p3235_p0), %s2777_s8, 4294967232  ;;  %p18_p2 = scmp.ge.s32.totalorder %s3557_s24, 4   ;;  %s4278_s18 = smov %s3479_s19 }
 0xbdc   : > { %s4279_s19 = smov %s3483_s20  ;;  %s4280_s20 = smov %s3569_s27 }
 0xbdd   : > { %s4281_s21 = smov %s3557_s24  ;;  %20 = sbr.rel (!%p18_p2) target bundleno = 5 (0x5), region = 85 }
 0xbe4   :  { %2782 = vsyncpa [#allocation3], 1 }
 0xbe5   :  { %2784 = vsyncpa [#allocation3 + $0x1], 1 }
 0xbe6   :  { %2785 = vsyncpa [#allocation4], 1 }
 0xbe7   :  { %2787 = vsyncpa [#allocation4 + $0x1], 1 }

</bundles_post_ra>
